<compile_context>
chip_gen: v7x
topology: tpu7x:2x2x1
jax: 0.10.0
libtpu: 0.0.40
codegen_flags: <defaults>
</compile_context>

<pallas_src>
import functools

import jax
import jax.numpy as jnp
from jax.experimental import pallas as pl
from jax.experimental.pallas import tpu as pltpu

EPS = 1e-5


def _make_kernel(m_true: int, matmul_dtype):
    inv_m = 1.0 / float(m_true)

    def kernel(x_ref, r_ref, gb_ref, w_ref, o_ref):
        # x_ref, r_ref : (tile_c, M) f32
        # gb_ref       : (tile_c, 2) f32   [:, 0] = gamma, [:, 1] = beta
        # w_ref        : (Cout, tile_c)    (matmul_dtype)
        # o_ref        : (Cout, M) f32     resident accumulator (one HBM writeback)
        i = pl.program_id(0)
        x = x_ref[...]

        # ---- training-mode BN batch stats (biased variance), centered -------
        mean = jnp.sum(x, axis=1, keepdims=True) * inv_m            # (tile_c, 1)
        xc = x - mean
        var = jnp.sum(xc * xc, axis=1, keepdims=True) * inv_m       # (tile_c, 1)

        gamma = gb_ref[:, 0:1]                                       # (tile_c, 1)
        beta = gb_ref[:, 1:2]                                        # (tile_c, 1)
        scale = gamma * jax.lax.rsqrt(var + EPS)                     # (tile_c, 1)

        # ---- normalize + affine + residual add + ReLU ------------------------
        z = jnp.maximum(xc * scale + (r_ref[...] + beta), 0.0)       # (tile_c, M)

        # ---- 1x1 conv == MXU matmul, accumulated over Cin tiles --------------
        partial = jnp.dot(w_ref[...], z.astype(matmul_dtype),
                          preferred_element_type=jnp.float32)        # (Cout, M)

        @pl.when(i == 0)
        def _init():
            o_ref[...] = partial

        @pl.when(i != 0)
        def _acc():
            o_ref[...] += partial

    return kernel


@functools.partial(jax.jit, static_argnames=("tile_c", "matmul_dtype"))
def fused_forward(x177, x170, gamma, beta, w, *, tile_c=256,
                  matmul_dtype=jnp.float32):
    """x177, x170: (N, Cin, H, W) f32; w: (Cout, Cin, 1, 1). Returns (N, Cout, H, W)."""
    N, Cin, H, W = x177.shape
    Cout = w.shape[0]
    M = N * H * W
    assert Cin % tile_c == 0, (Cin, tile_c)

    # NCHW -> channels-first (Cin, M) slab.  For N == 1 this is a free reshape
    # (size-1 axis transpose); it stays inside this jit so XLA fuses it.
    x2d = jnp.transpose(x177, (1, 0, 2, 3)).reshape(Cin, M)
    r2d = jnp.transpose(x170, (1, 0, 2, 3)).reshape(Cin, M)
    w2d = w.reshape(Cout, Cin).astype(matmul_dtype)
    gb = jnp.stack([gamma, beta], axis=1)                 # (Cin, 2)

    f32 = 4
    w_bytes = Cout * Cin * jnp.dtype(matmul_dtype).itemsize
    cost = pl.CostEstimate(
        flops=2 * M * Cin * Cout + 8 * M * Cin,
        transcendentals=Cin,
        bytes_accessed=f32 * (2 * Cin * M + 2 * Cin + Cout * M) + w_bytes,
    )

    out2d = pl.pallas_call(
        _make_kernel(M, matmul_dtype),
        out_shape=jax.ShapeDtypeStruct((Cout, M), jnp.float32),
        grid=(Cin // tile_c,),
        in_specs=[
            pl.BlockSpec((tile_c, M), lambda i: (i, 0)),       # x slab
            pl.BlockSpec((tile_c, M), lambda i: (i, 0)),       # residual slab
            pl.BlockSpec((tile_c, 2), lambda i: (i, 0)),       # packed gamma/beta
            pl.BlockSpec((Cout, tile_c), lambda i: (0, i)),    # weight (read once)
        ],
        out_specs=pl.BlockSpec((Cout, M), lambda i: (0, 0)),   # resident accumulator
        compiler_params=pltpu.CompilerParams(
            dimension_semantics=("arbitrary",),                # Cin is a reduction axis
        ),
        cost_estimate=cost,
    )(x2d, r2d, gb, w2d)

    # (Cout, M) -> NCHW
    out = out2d.reshape(Cout, N, H, W)
    return jnp.transpose(out, (1, 0, 2, 3))


def reference_forward(x177, x170, gamma, beta, w):
    mean = jnp.mean(x177, axis=(0, 2, 3), keepdims=True)
    var = jnp.var(x177, axis=(0, 2, 3), keepdims=True)        # biased (training BN)
    y = (x177 - mean) * jax.lax.rsqrt(var + EPS)
    y = y * gamma.reshape(1, -1, 1, 1) + beta.reshape(1, -1, 1, 1)
    z = jnp.maximum(y + x170, 0.0)
    return jax.lax.conv_general_dilated(
        z, w, window_strides=(1, 1), padding="VALID",
        dimension_numbers=("NCHW", "OIHW", "NCHW"))


if __name__ == "__main__":
    key = jax.random.PRNGKey(0)
    k1, k2, k3, k4, k5 = jax.random.split(key, 5)

    # Shapes implied by the module: BatchNorm2d(1024) / Conv2d(1024, 256, 1x1)
    N, Cin, H, W, Cout = 1, 1024, 14, 14, 256

    x177 = jax.random.normal(k1, (N, Cin, H, W), dtype=jnp.float32)
    x170 = jax.random.normal(k2, (N, Cin, H, W), dtype=jnp.float32)
    gamma = 1.0 + 0.1 * jax.random.normal(k3, (Cin,), dtype=jnp.float32)
    beta = 0.1 * jax.random.normal(k4, (Cin,), dtype=jnp.float32)
    w = jax.random.normal(k5, (Cout, Cin, 1, 1), dtype=jnp.float32) * (1.0 / jnp.sqrt(Cin))

    out = jax.block_until_ready(fused_forward(x177, x170, gamma, beta, w))
    ref = jax.block_until_ready(reference_forward(x177, x170, gamma, beta, w))

    assert out.shape == (N, Cout, H, W), out.shape
    assert jnp.allclose(out, ref, atol=1e-3, rtol=1e-3), float(jnp.max(jnp.abs(out - ref)))
    print("KERNEL_OK")
</pallas_src>

<mosaic_0001>
module attributes {stable_mosaic.version = 11 : i64} {
  func.func @kernel(%arg0: i32, %arg1: memref<256x196xf32, #tpu.memory_space<vmem>>, %arg2: memref<256x196xf32, #tpu.memory_space<vmem>>, %arg3: memref<256x2xf32, #tpu.memory_space<vmem>>, %arg4: memref<256x256xf32, #tpu.memory_space<vmem>>, %arg5: memref<256x196xf32, #tpu.memory_space<vmem>>) attributes {dimension_semantics = [#tpu.dimension_semantics<arbitrary>], iteration_bounds = array<i64: 4>, scalar_prefetch = 0 : i64, scratch_operands = 0 : i64, tpu.core_type = #tpu.core_type<tc>, window_params = [{transform_indices = @transform_0, window_bounds = array<i64: 256, 196>}, {transform_indices = @transform_1, window_bounds = array<i64: 256, 196>}, {transform_indices = @transform_2, window_bounds = array<i64: 256, 2>}, {transform_indices = @transform_3, window_bounds = array<i64: 256, 256>}, {pipeline_mode = #tpu.pipeline_mode<synchronous>, transform_indices = @transform_4, window_bounds = array<i64: 256, 196>}]} {
    %c0 = arith.constant 0 : index
    %c0_0 = arith.constant 0 : index
    %0 = vector.load %arg1[%c0, %c0_0] : memref<256x196xf32, #tpu.memory_space<vmem>>, vector<256x196xf32>
    %cst = arith.constant dense<0.000000e+00> : vector<256xf32>
    %1 = vector.multi_reduction <add>, %0, %cst [1] : vector<256x196xf32> to vector<256xf32>
    %2 = vector.shape_cast %1 : vector<256xf32> to vector<256x1xf32>
    %cst_1 = arith.constant 0.00510204071 : f32
    %3 = vector.broadcast %cst_1 : f32 to vector<256x1xf32>
    %4 = arith.mulf %2, %3 : vector<256x1xf32>
    %5 = vector.broadcast %4 : vector<256x1xf32> to vector<256x196xf32>
    %6 = arith.subf %0, %5 : vector<256x196xf32>
    %7 = arith.mulf %6, %6 : vector<256x196xf32>
    %cst_2 = arith.constant dense<0.000000e+00> : vector<256xf32>
    %8 = vector.multi_reduction <add>, %7, %cst_2 [1] : vector<256x196xf32> to vector<256xf32>
    %9 = vector.shape_cast %8 : vector<256xf32> to vector<256x1xf32>
    %cst_3 = arith.constant 0.00510204071 : f32
    %10 = vector.broadcast %cst_3 : f32 to vector<256x1xf32>
    %11 = arith.mulf %9, %10 : vector<256x1xf32>
    %c0_4 = arith.constant 0 : index
    %c0_5 = arith.constant 0 : index
    %12 = vector.load %arg3[%c0_4, %c0_5] : memref<256x2xf32, #tpu.memory_space<vmem>>, vector<256x1xf32>
    %c0_6 = arith.constant 0 : index
    %c1 = arith.constant 1 : index
    %13 = vector.load %arg3[%c0_6, %c1] : memref<256x2xf32, #tpu.memory_space<vmem>>, vector<256x1xf32>
    %cst_7 = arith.constant 9.99999974E-6 : f32
    %14 = vector.broadcast %cst_7 : f32 to vector<256x1xf32>
    %15 = arith.addf %11, %14 : vector<256x1xf32>
    %16 = math.rsqrt %15 : vector<256x1xf32>
    %17 = arith.mulf %12, %16 : vector<256x1xf32>
    %18 = vector.broadcast %17 : vector<256x1xf32> to vector<256x196xf32>
    %19 = arith.mulf %6, %18 : vector<256x196xf32>
    %c0_8 = arith.constant 0 : index
    %c0_9 = arith.constant 0 : index
    %20 = vector.load %arg2[%c0_8, %c0_9] : memref<256x196xf32, #tpu.memory_space<vmem>>, vector<256x196xf32>
    %21 = vector.broadcast %13 : vector<256x1xf32> to vector<256x196xf32>
    %22 = arith.addf %20, %21 : vector<256x196xf32>
    %23 = arith.addf %19, %22 : vector<256x196xf32>
    %cst_10 = arith.constant 0.000000e+00 : f32
    %24 = vector.broadcast %cst_10 : f32 to vector<256x196xf32>
    %25 = arith.maximumf %23, %24 : vector<256x196xf32>
    %c0_11 = arith.constant 0 : index
    %c0_12 = arith.constant 0 : index
    %26 = vector.load %arg4[%c0_11, %c0_12] : memref<256x256xf32, #tpu.memory_space<vmem>>, vector<256x256xf32>
    %cst_13 = arith.constant dense<0.000000e+00> : vector<256x196xf32>
    %27 = tpu.matmul %26, %25, %cst_13 {dimension_numbers = #tpu.dot_dimension_numbers<[1], [0], [0], [1], [0, 0, 1, 1], [], []>} : vector<256x256xf32>, vector<256x196xf32>, vector<256x196xf32> -> vector<256x196xf32>
    %c0_i32 = arith.constant 0 : i32
    %28 = arith.cmpi eq, %arg0, %c0_i32 : i32
    %29 = arith.extui %28 : i1 to i32
    %c0_i32_14 = arith.constant 0 : i32
    %30 = arith.cmpi ne, %29, %c0_i32_14 : i32
    scf.if %30 {
      %c0_17 = arith.constant 0 : index
      %c0_18 = arith.constant 0 : index
      %34 = vector.load %arg5[%c0_17, %c0_18] : memref<256x196xf32, #tpu.memory_space<vmem>>, vector<256x196xf32>
      tpu.vector_store %arg5[%c0_17, %c0_18], %27 {strides = array<i32>} : memref<256x196xf32, #tpu.memory_space<vmem>>, vector<256x196xf32>,
    } else {
    }
    %c0_i32_15 = arith.constant 0 : i32
    %31 = arith.cmpi ne, %arg0, %c0_i32_15 : i32
    %32 = arith.extui %31 : i1 to i32
    %c0_i32_16 = arith.constant 0 : i32
    %33 = arith.cmpi ne, %32, %c0_i32_16 : i32
    scf.if %33 {
      %c0_17 = arith.constant 0 : index
      %c0_18 = arith.constant 0 : index
      %34 = vector.load %arg5[%c0_17, %c0_18] : memref<256x196xf32, #tpu.memory_space<vmem>>, vector<256x196xf32>
      %35 = arith.addf %34, %27 : vector<256x196xf32>
      %c0_19 = arith.constant 0 : index
      %c0_20 = arith.constant 0 : index
      %36 = vector.load %arg5[%c0_19, %c0_20] : memref<256x196xf32, #tpu.memory_space<vmem>>, vector<256x196xf32>
      tpu.vector_store %arg5[%c0_19, %c0_20], %35 {strides = array<i32>} : memref<256x196xf32, #tpu.memory_space<vmem>>, vector<256x196xf32>,
    } else {
    }
    return
  }
  func.func @transform_0(%arg0: i32) -> (i32, i32) {
    %c0_i32 = arith.constant 0 : i32
    %c0_i32_0 = arith.constant 0 : i32
    return %arg0, %c0_i32 : i32, i32
  }
  func.func @transform_1(%arg0: i32) -> (i32, i32) {
    %c0_i32 = arith.constant 0 : i32
    %c0_i32_0 = arith.constant 0 : i32
    return %arg0, %c0_i32 : i32, i32
  }
  func.func @transform_2(%arg0: i32) -> (i32, i32) {
    %c0_i32 = arith.constant 0 : i32
    %c0_i32_0 = arith.constant 0 : i32
    return %arg0, %c0_i32 : i32, i32
  }
  func.func @transform_3(%arg0: i32) -> (i32, i32) {
    %c0_i32 = arith.constant 0 : i32
    %c0_i32_0 = arith.constant 0 : i32
    return %c0_i32, %arg0 : i32, i32
  }
  func.func @transform_4(%arg0: i32) -> (i32, i32) {
    %c0_i32 = arith.constant 0 : i32
    %c0_i32_0 = arith.constant 0 : i32
    %c0_i32_1 = arith.constant 0 : i32
    return %c0_i32, %c0_i32_0 : i32, i32
  }
}

</mosaic_0001>

<bundles_post_ra>
// kernel: fused_forward.1
= control target key start
LH: loop header
LB: loop body
LE: loop exit
PB: predicated region body
PF: predicated region fallthrough
CT: control target
= control target key end

     0   :  { %s2610_s15 = smov 0   ;;  %s2612_s16 = smov 0   ;;  %s4840_s0 = inlined_call_operand.vmem [shape: f32[1024,196], index: 0, kind: input, shape index: {}]   ;;  %s4841_s1 = inlined_call_operand.vmem [shape: f32[1024,196], index: 1, kind: input, shape index: {}]   ;;  %s4842_s2 = inlined_call_operand.vmem [shape: f32[1024,2], index: 2, kind: input, shape index: {}]   ;;  %s4843_s3 = inlined_call_operand.vmem [shape: f32[256,1024], index: 3, kind: input, shape index: {}]   ;;  %s4844_s4 = inlined_call_operand.vmem [shape: f32[256,196], index: 4, kind: output, shape index: {}]  }
   0x1   :  { %s2614_s17 = smov 0  }
   0x2 LB: > { %s2626_s18 = sadd.s32 4294967295, %s2581_s17   ;;  %s2629_s19 = sadd.s32 1, %s2581_s17   ;;  %s2581_s17 = sphi %s2614_s17, %s5120_s17   ;;  %s2577_s16 = sphi %s2612_s16, %s5119_s16   ;;  %s2573_s15 = sphi %s2610_s15, %s5118_s15  }
   0x3   : > { %s96_s20 = ssub.s32 %s2581_s17, %s2629_s19  ;;  %s99_s21 = sadd.s32 1, %s2577_s16 }
   0x4   : > { %p97_p0 = scmp.eq.s32.totalorder %s96_s20, 0  ;;  %p106_p1 = scmp.ne.s32.totalorder %s2577_s16, %s2573_s15 }
   0x5   : > { %p107_p2 = scmp.eq.s32.totalorder %s2581_s17, 0  ;;  %p2340_p4 = scmp.ge.s32.totalorder %s2581_s17, 4 }
   0x6   : > { %s2638_s22 = scalar_select %p97_p0, %s2577_s16, %s99_s21  }
   0x7   : > { %p108_p3 = por %p107_p2, %p106_p1  ;;  %153 = sbr.rel (%p2340_p4) target bundleno = 50 (0x32), region = 16 }
   0xe   : > { %185 = sbr.rel (!%p108_p3) target bundleno = 50 (0x32), region = 32  ;;  %s187_s23 = sand.u32 (%p108_p3), 1, %s2577_s16  }
   0xf   : > { %s2358_s24 = sshll.u32 (%p108_p3), %s2581_s17, 4  ;;  %s2341_s25 = sshll.u32 (%p108_p3), %s187_s23, 9 }
  0x10   : > { %s2646_s28 = scalar_lea.vmem (%p108_p3), %s4843_s3, %s2358_s24  ;;  %s2651_s29 = scalar_lea.vmem (%p108_p3), [#allocation2], %s2341_s25 }
  0x11   : > { %v205_v0 = vld [vmem:[%s2646_s28] sm:$0xff] (%p108_p3)  ;;  %v207_v1 = vld [vmem:[%s2646_s28 + $0x8] sm:$0xff] (%p108_p3) }
  0x12   : > { %v209_v2 = vld [vmem:[%s2646_s28 + $0x40] sm:$0xff] (%p108_p3)  ;;  %206 = vst [vmem:[%s2651_s29] sm:$0xff] (%p108_p3), %v205_v0  ;;  %208 = vst [vmem:[%s2651_s29 + $0x8] sm:$0xff] (%p108_p3), %v207_v1  ;;  %v211_v3 = vld [vmem:[%s2646_s28 + $0x48] sm:$0xff] (%p108_p3) }
  0x13   : > { %210 = vst [vmem:[%s2651_s29 + $0x10] sm:$0xff] (%p108_p3), %v209_v2  ;;  %v213_v4 = vld [vmem:[%s2646_s28 + $0x80] sm:$0xff] (%p108_p3)  ;;  %v215_v5 = vld [vmem:[%s2646_s28 + $0x88] sm:$0xff] (%p108_p3)  ;;  %212 = vst [vmem:[%s2651_s29 + $0x18] sm:$0xff] (%p108_p3), %v211_v3 }
  0x14   : > { %214 = vst [vmem:[%s2651_s29 + $0x20] sm:$0xff] (%p108_p3), %v213_v4  ;;  %216 = vst [vmem:[%s2651_s29 + $0x28] sm:$0xff] (%p108_p3), %v215_v5  ;;  %v217_v6 = vld [vmem:[%s2646_s28 + $0xc0] sm:$0xff] (%p108_p3)  ;;  %v219_v7 = vld [vmem:[%s2646_s28 + $0xc8] sm:$0xff] (%p108_p3) }
  0x15   : > { %v221_v8 = vld [vmem:[%s2646_s28 + $0x100] sm:$0xff]  ;;  %218 = vst [vmem:[%s2651_s29 + $0x30] sm:$0xff] %v217_v6  ;;  %220 = vst [vmem:[%s2651_s29 + $0x38] sm:$0xff] %v219_v7  ;;  %v223_v9 = vld [vmem:[%s2646_s28 + $0x108] sm:$0xff] }
  0x16   : > { %222 = vst [vmem:[%s2651_s29 + $0x40] sm:$0xff] %v221_v8  ;;  %v225_v10 = vld [vmem:[%s2646_s28 + $0x140] sm:$0xff]  ;;  %v227_v11 = vld [vmem:[%s2646_s28 + $0x148] sm:$0xff]  ;;  %224 = vst [vmem:[%s2651_s29 + $0x48] sm:$0xff] %v223_v9 }
  0x17   : > { %226 = vst [vmem:[%s2651_s29 + $0x50] sm:$0xff] %v225_v10  ;;  %228 = vst [vmem:[%s2651_s29 + $0x58] sm:$0xff] %v227_v11  ;;  %v229_v12 = vld [vmem:[%s2646_s28 + $0x180] sm:$0xff]  ;;  %v231_v13 = vld [vmem:[%s2646_s28 + $0x188] sm:$0xff] }
  0x18   : > { %v233_v14 = vld [vmem:[%s2646_s28 + $0x1c0] sm:$0xff]  ;;  %230 = vst [vmem:[%s2651_s29 + $0x60] sm:$0xff] %v229_v12  ;;  %232 = vst [vmem:[%s2651_s29 + $0x68] sm:$0xff] %v231_v13  ;;  %v235_v15 = vld [vmem:[%s2646_s28 + $0x1c8] sm:$0xff] }
  0x19   : > { %234 = vst [vmem:[%s2651_s29 + $0x70] sm:$0xff] %v233_v14  ;;  %v237_v16 = vld [vmem:[%s2646_s28 + $0x200] sm:$0xff]  ;;  %v239_v17 = vld [vmem:[%s2646_s28 + $0x208] sm:$0xff]  ;;  %236 = vst [vmem:[%s2651_s29 + $0x78] sm:$0xff] %v235_v15 }
  0x1a   : > { %238 = vst [vmem:[%s2651_s29 + $0x80] sm:$0xff] %v237_v16  ;;  %240 = vst [vmem:[%s2651_s29 + $0x88] sm:$0xff] %v239_v17  ;;  %v241_v18 = vld [vmem:[%s2646_s28 + $0x240] sm:$0xff]  ;;  %v243_v19 = vld [vmem:[%s2646_s28 + $0x248] sm:$0xff] }
  0x1b   : > { %v245_v20 = vld [vmem:[%s2646_s28 + $0x280] sm:$0xff]  ;;  %242 = vst [vmem:[%s2651_s29 + $0x90] sm:$0xff] %v241_v18  ;;  %244 = vst [vmem:[%s2651_s29 + $0x98] sm:$0xff] %v243_v19  ;;  %v247_v21 = vld [vmem:[%s2646_s28 + $0x288] sm:$0xff] }
  0x1c   : > { %246 = vst [vmem:[%s2651_s29 + $0xa0] sm:$0xff] %v245_v20  ;;  %v249_v22 = vld [vmem:[%s2646_s28 + $0x2c0] sm:$0xff]  ;;  %v251_v23 = vld [vmem:[%s2646_s28 + $0x2c8] sm:$0xff]  ;;  %248 = vst [vmem:[%s2651_s29 + $0xa8] sm:$0xff] %v247_v21 }
  0x1d   : > { %250 = vst [vmem:[%s2651_s29 + $0xb0] sm:$0xff] %v249_v22  ;;  %252 = vst [vmem:[%s2651_s29 + $0xb8] sm:$0xff] %v251_v23  ;;  %v253_v24 = vld [vmem:[%s2646_s28 + $0x300] sm:$0xff]  ;;  %v255_v25 = vld [vmem:[%s2646_s28 + $0x308] sm:$0xff] }
  0x1e   : > { %v257_v26 = vld [vmem:[%s2646_s28 + $0x340] sm:$0xff]  ;;  %254 = vst [vmem:[%s2651_s29 + $0xc0] sm:$0xff] %v253_v24  ;;  %256 = vst [vmem:[%s2651_s29 + $0xc8] sm:$0xff] %v255_v25  ;;  %v259_v27 = vld [vmem:[%s2646_s28 + $0x348] sm:$0xff] }
  0x1f   : > { %258 = vst [vmem:[%s2651_s29 + $0xd0] sm:$0xff] %v257_v26  ;;  %v261_v28 = vld [vmem:[%s2646_s28 + $0x380] sm:$0xff]  ;;  %v263_v29 = vld [vmem:[%s2646_s28 + $0x388] sm:$0xff]  ;;  %260 = vst [vmem:[%s2651_s29 + $0xd8] sm:$0xff] %v259_v27 }
  0x20   : > { %262 = vst [vmem:[%s2651_s29 + $0xe0] sm:$0xff] %v261_v28  ;;  %264 = vst [vmem:[%s2651_s29 + $0xe8] sm:$0xff] %v263_v29  ;;  %v265_v30 = vld [vmem:[%s2646_s28 + $0x3c0] sm:$0xff]  ;;  %v267_v31 = vld [vmem:[%s2646_s28 + $0x3c8] sm:$0xff] }
  0x21   : > { %v269_v32 = vld [vmem:[%s2646_s28 + $0x400] sm:$0xff]  ;;  %266 = vst [vmem:[%s2651_s29 + $0xf0] sm:$0xff] %v265_v30  ;;  %268 = vst [vmem:[%s2651_s29 + $0xf8] sm:$0xff] %v267_v31  ;;  %v271_v33 = vld [vmem:[%s2646_s28 + $0x408] sm:$0xff] }
  0x22   : > { %270 = vst [vmem:[%s2651_s29 + $0x100] sm:$0xff] %v269_v32  ;;  %v273_v34 = vld [vmem:[%s2646_s28 + $0x440] sm:$0xff]  ;;  %v275_v35 = vld [vmem:[%s2646_s28 + $0x448] sm:$0xff]  ;;  %272 = vst [vmem:[%s2651_s29 + $0x108] sm:$0xff] %v271_v33 }
  0x23   : > { %274 = vst [vmem:[%s2651_s29 + $0x110] sm:$0xff] %v273_v34  ;;  %276 = vst [vmem:[%s2651_s29 + $0x118] sm:$0xff] %v275_v35  ;;  %v277_v36 = vld [vmem:[%s2646_s28 + $0x480] sm:$0xff]  ;;  %v279_v37 = vld [vmem:[%s2646_s28 + $0x488] sm:$0xff] }
  0x24   : > { %v281_v38 = vld [vmem:[%s2646_s28 + $0x4c0] sm:$0xff]  ;;  %278 = vst [vmem:[%s2651_s29 + $0x120] sm:$0xff] %v277_v36  ;;  %280 = vst [vmem:[%s2651_s29 + $0x128] sm:$0xff] %v279_v37  ;;  %v283_v39 = vld [vmem:[%s2646_s28 + $0x4c8] sm:$0xff] }
  0x25   : > { %282 = vst [vmem:[%s2651_s29 + $0x130] sm:$0xff] %v281_v38  ;;  %v285_v40 = vld [vmem:[%s2646_s28 + $0x500] sm:$0xff]  ;;  %v287_v41 = vld [vmem:[%s2646_s28 + $0x508] sm:$0xff]  ;;  %284 = vst [vmem:[%s2651_s29 + $0x138] sm:$0xff] %v283_v39 }
  0x26   : > { %286 = vst [vmem:[%s2651_s29 + $0x140] sm:$0xff] %v285_v40  ;;  %288 = vst [vmem:[%s2651_s29 + $0x148] sm:$0xff] %v287_v41  ;;  %v289_v42 = vld [vmem:[%s2646_s28 + $0x540] sm:$0xff]  ;;  %v291_v43 = vld [vmem:[%s2646_s28 + $0x548] sm:$0xff] }
  0x27   : > { %v293_v44 = vld [vmem:[%s2646_s28 + $0x580] sm:$0xff]  ;;  %290 = vst [vmem:[%s2651_s29 + $0x150] sm:$0xff] %v289_v42  ;;  %292 = vst [vmem:[%s2651_s29 + $0x158] sm:$0xff] %v291_v43  ;;  %v295_v45 = vld [vmem:[%s2646_s28 + $0x588] sm:$0xff] }
  0x28   : > { %294 = vst [vmem:[%s2651_s29 + $0x160] sm:$0xff] %v293_v44  ;;  %v297_v46 = vld [vmem:[%s2646_s28 + $0x5c0] sm:$0xff]  ;;  %v299_v47 = vld [vmem:[%s2646_s28 + $0x5c8] sm:$0xff]  ;;  %296 = vst [vmem:[%s2651_s29 + $0x168] sm:$0xff] %v295_v45 }
  0x29   : > { %298 = vst [vmem:[%s2651_s29 + $0x170] sm:$0xff] %v297_v46  ;;  %300 = vst [vmem:[%s2651_s29 + $0x178] sm:$0xff] %v299_v47  ;;  %v301_v48 = vld [vmem:[%s2646_s28 + $0x600] sm:$0xff]  ;;  %v303_v49 = vld [vmem:[%s2646_s28 + $0x608] sm:$0xff] }
  0x2a   : > { %v305_v50 = vld [vmem:[%s2646_s28 + $0x640] sm:$0xff]  ;;  %302 = vst [vmem:[%s2651_s29 + $0x180] sm:$0xff] %v301_v48  ;;  %304 = vst [vmem:[%s2651_s29 + $0x188] sm:$0xff] %v303_v49  ;;  %v307_v51 = vld [vmem:[%s2646_s28 + $0x648] sm:$0xff] }
  0x2b   : > { %306 = vst [vmem:[%s2651_s29 + $0x190] sm:$0xff] %v305_v50  ;;  %v309_v52 = vld [vmem:[%s2646_s28 + $0x680] sm:$0xff]  ;;  %v311_v53 = vld [vmem:[%s2646_s28 + $0x688] sm:$0xff]  ;;  %308 = vst [vmem:[%s2651_s29 + $0x198] sm:$0xff] %v307_v51 }
  0x2c   : > { %310 = vst [vmem:[%s2651_s29 + $0x1a0] sm:$0xff] %v309_v52  ;;  %312 = vst [vmem:[%s2651_s29 + $0x1a8] sm:$0xff] %v311_v53  ;;  %v313_v54 = vld [vmem:[%s2646_s28 + $0x6c0] sm:$0xff]  ;;  %v315_v55 = vld [vmem:[%s2646_s28 + $0x6c8] sm:$0xff] }
  0x2d   : > { %v317_v56 = vld [vmem:[%s2646_s28 + $0x700] sm:$0xff]  ;;  %314 = vst [vmem:[%s2651_s29 + $0x1b0] sm:$0xff] %v313_v54  ;;  %316 = vst [vmem:[%s2651_s29 + $0x1b8] sm:$0xff] %v315_v55  ;;  %v319_v57 = vld [vmem:[%s2646_s28 + $0x708] sm:$0xff] }
  0x2e   : > { %318 = vst [vmem:[%s2651_s29 + $0x1c0] sm:$0xff] %v317_v56  ;;  %v321_v58 = vld [vmem:[%s2646_s28 + $0x740] sm:$0xff]  ;;  %v323_v59 = vld [vmem:[%s2646_s28 + $0x748] sm:$0xff]  ;;  %320 = vst [vmem:[%s2651_s29 + $0x1c8] sm:$0xff] %v319_v57 }
  0x2f   : > { %322 = vst [vmem:[%s2651_s29 + $0x1d0] sm:$0xff] %v321_v58  ;;  %324 = vst [vmem:[%s2651_s29 + $0x1d8] sm:$0xff] %v323_v59  ;;  %v325_v60 = vld [vmem:[%s2646_s28 + $0x780] sm:$0xff]  ;;  %v327_v61 = vld [vmem:[%s2646_s28 + $0x788] sm:$0xff] }
  0x30   : > { %v329_v62 = vld [vmem:[%s2646_s28 + $0x7c0] sm:$0xff]  ;;  %326 = vst [vmem:[%s2651_s29 + $0x1e0] sm:$0xff] %v325_v60  ;;  %328 = vst [vmem:[%s2651_s29 + $0x1e8] sm:$0xff] %v327_v61  ;;  %v331_v63 = vld [vmem:[%s2646_s28 + $0x7c8] sm:$0xff] }
  0x31   : > { %330 = vst [vmem:[%s2651_s29 + $0x1f0] sm:$0xff] %v329_v62  ;;  %332 = vst [vmem:[%s2651_s29 + $0x1f8] sm:$0xff] %v331_v63 }
  0x32 PF: > { %p2344_p5 = scmp.ge.s32.totalorder %s2581_s17, 1  ;;  %p337_p6 = scmp.lt.s32.totalorder %s2581_s17, 5 }
  0x34   : > { %p338_p7 = pnand %p2344_p5, %p337_p6 }
  0x36   : > { %341 = sbr.rel (%p338_p7) target bundleno = 946 (0x3b2), region = 55 }
  0x3d   : > { %s2346_s30 = sshll.u32 %s2626_s18, 5  ;;  %v4845_v0 = vmov 1   ;;  %vm466_vm0 = vcmask 556032   ;;  %s344_s13 = sand.u32 1, %s2573_s15  }
  0x3e   : > { %p382_p8 = scmp.lt.s32.totalorder %s2346_s30, 127  ;;  %2483 = vset.pattern.permute.xlu1 %v4845_v0  ;;  %2484 = vset.pattern.permute.xlu0 %v4845_v0  ;;  %s2345_s14 = sshll.u32 %s344_s13, 9 }
  0x3f   : > { %s3668_s23 = scalar_lea.vmem [#allocation2], %s2345_s14  ;;  %p2354_p9 = scmp.ne.s32.totalorder %s2626_s18, 0 }
  0x40   : > { %s5122_s30 = smov (!%p382_p8, %s2346_s30), 127 }
  0x41   : > { %s2359_s5 = sshll.u32 %s5122_s30, 4  ;;  %s2353_s9 = sshll.u32 %s5122_s30, 3 }
  0x42   : > { %s2791_s8 = scalar_lea.vmem %s4840_s0, %s2359_s5  ;;  %s3085_s12 = scalar_lea.vmem %s4842_s2, %s2353_s9 }
  0x43   : > { %v2794_v1 = vld [vmem:[%s2791_s8 + $0x20] sm:$0xff]  ;;  %v2797_v2 = vld [vmem:[%s2791_s8 + $0x28] sm:$0xff]  ;;  %v2808_v6 = vld [vmem:[%s2791_s8 + $0x30] sm:$0xff]  ;;  %s3664_s21 = scalar_lea.vmem %s4841_s1, %s2359_s5 }
  0x44   : > { %v2800_v3 = vld [vmem:[%s2791_s8] sm:$0xff]  ;;  %v475_v4 = vsel %vm466_vm0, %v2797_v2, 0.0  ;;  %v2805_v5 = vld [vmem:[%s2791_s8 + $0x8] sm:$0xff]  ;;  %v2811_v7 = vld [vmem:[%s2791_s8 + $0x38] sm:$0xff] }
  0x45   : > { %v476_v8 = vadd.f32 %v475_v4, %v2794_v1  ;;  %v467_v9 = vsel %vm466_vm0, %v2805_v5, 0.0  ;;  %v479_v10 = vsel %vm466_vm0, %v2811_v7, 0.0  ;;  %v2819_v11 = vld [vmem:[%s2791_s8 + $0x10] sm:$0xff]  ;;  %v2822_v12 = vld [vmem:[%s2791_s8 + $0x18] sm:$0xff]  ;;  %v2831_v16 = vld [vmem:[%s2791_s8 + $0x48] sm:$0xff] }
  0x46   : > { %v468_v13 = vadd.f32 %v467_v9, %v2800_v3  ;;  %v471_v14 = vsel %vm466_vm0, %v2822_v12, 0.0  ;;  %v2828_v15 = vld [vmem:[%s2791_s8 + $0x58] sm:$0xff]  ;;  %v480_v17 = vadd.f32 %v479_v10, %v2808_v6  ;;  %v2836_v19 = vld [vmem:[%s2791_s8 + $0x50] sm:$0xff]  ;;  %v2841_v21 = vld [vmem:[%s2791_s8 + $0x40] sm:$0xff]  ;;  %v483_v22 = vsel %vm466_vm0, %v2831_v16, 0.0 }
  0x47   : > { %477 = vadd.xlane.f32.xlu1 %v476_v8  ;;  %v472_v18 = vadd.f32 %v471_v14, %v2819_v11  ;;  %v487_v20 = vsel %vm466_vm0, %v2828_v15, 0.0  ;;  %v2846_v23 = vld [vmem:[%s2791_s8 + $0x78] sm:$0xff]  ;;  %v2849_v24 = vld [vmem:[%s2791_s8 + $0x68] sm:$0xff]  ;;  %v484_v26 = vadd.f32 %v483_v22, %v2841_v21  ;;  %v2854_v27 = vld [vmem:[%s2791_s8 + $0x70] sm:$0xff] }
  0x48   : > { %469 = vadd.xlane.f32.xlu0 %v468_v13  ;;  %v488_v25 = vadd.f32 %v487_v20, %v2836_v19  ;;  %v495_v28 = vsel %vm466_vm0, %v2846_v23, 0.0  ;;  %v2859_v29 = vld [vmem:[%s2791_s8 + $0x60] sm:$0xff]  ;;  %v491_v30 = vsel %vm466_vm0, %v2849_v24, 0.0  ;;  %v2864_v31 = vld [vmem:[%s2791_s8 + $0x98] sm:$0xff]  ;;  %v2867_v32 = vld [vmem:[%s2791_s8 + $0x88] sm:$0xff] }
  0x49   : > { %v496_v33 = vadd.f32 %v495_v28, %v2854_v27  ;;  %v492_v34 = vadd.f32 %v491_v30, %v2859_v29  ;;  %v2872_v35 = vld [vmem:[%s2791_s8 + $0x90] sm:$0xff]  ;;  %v503_v36 = vsel %vm466_vm0, %v2864_v31, 0.0  ;;  %v2877_v37 = vld [vmem:[%s2791_s8 + $0x80] sm:$0xff]  ;;  %v499_v38 = vsel %vm466_vm0, %v2867_v32, 0.0  ;;  %v2882_v39 = vld [vmem:[%s2791_s8 + $0xb8] sm:$0xff] }
  0x4a   : > { %v2885_v40 = vld [vmem:[%s2791_s8 + $0xa8] sm:$0xff]  ;;  %v504_v41 = vadd.f32 %v503_v36, %v2872_v35  ;;  %v500_v42 = vadd.f32 %v499_v38, %v2877_v37  ;;  %v2890_v43 = vld [vmem:[%s2791_s8 + $0xb0] sm:$0xff]  ;;  %v511_v44 = vsel %vm466_vm0, %v2882_v39, 0.0  ;;  %v2895_v45 = vld [vmem:[%s2791_s8 + $0xa0] sm:$0xff] }
  0x4b   : > { %481 = vadd.xlane.f32.xlu1 %v480_v17  ;;  %v507_v46 = vsel %vm466_vm0, %v2885_v40, 0.0  ;;  %v2900_v47 = vld [vmem:[%s2791_s8 + $0xd8] sm:$0xff]  ;;  %v2903_v48 = vld [vmem:[%s2791_s8 + $0xc8] sm:$0xff]  ;;  %v512_v49 = vadd.f32 %v511_v44, %v2890_v43  ;;  %v2908_v51 = vld [vmem:[%s2791_s8 + $0xd0] sm:$0xff] }
  0x4c   : > { %473 = vadd.xlane.f32.xlu0 %v472_v18  ;;  %v508_v50 = vadd.f32 %v507_v46, %v2895_v45  ;;  %v519_v52 = vsel %vm466_vm0, %v2900_v47, 0.0  ;;  %v2913_v53 = vld [vmem:[%s2791_s8 + $0xc0] sm:$0xff]  ;;  %v515_v54 = vsel %vm466_vm0, %v2903_v48, 0.0  ;;  %v2918_v55 = vld [vmem:[%s2791_s8 + $0xf8] sm:$0xff]  ;;  %v2921_v56 = vld [vmem:[%s2791_s8 + $0xe8] sm:$0xff] }
  0x4d   : > { %v520_v57 = vadd.f32 %v519_v52, %v2908_v51  ;;  %v516_v58 = vadd.f32 %v515_v54, %v2913_v53  ;;  %v2926_v59 = vld [vmem:[%s2791_s8 + $0xf0] sm:$0xff]  ;;  %v527_v60 = vsel %vm466_vm0, %v2918_v55, 0.0  ;;  %v2931_v61 = vld [vmem:[%s2791_s8 + $0xe0] sm:$0xff]  ;;  %v523_v62 = vsel %vm466_vm0, %v2921_v56, 0.0  ;;  %v2936_v63 = vld [vmem:[%s2791_s8 + $0x118] sm:$0xff] }
  0x4e   : > { %v2939_v4 = vld [vmem:[%s2791_s8 + $0x108] sm:$0xff]  ;;  %v528_v8 = vadd.f32 %v527_v60, %v2926_v59  ;;  %v524_v9 = vadd.f32 %v523_v62, %v2931_v61  ;;  %v2944_v10 = vld [vmem:[%s2791_s8 + $0x110] sm:$0xff]  ;;  %v535_v13 = vsel %vm466_vm0, %v2936_v63, 0.0  ;;  %v2949_v14 = vld [vmem:[%s2791_s8 + $0x100] sm:$0xff] }
  0x4f   : > { %489 = vadd.xlane.f32.xlu1 %v488_v25  ;;  %v531_v17 = vsel %vm466_vm0, %v2939_v4, 0.0  ;;  %v2954_v18 = vld [vmem:[%s2791_s8 + $0x138] sm:$0xff]  ;;  %v2957_v20 = vld [vmem:[%s2791_s8 + $0x128] sm:$0xff]  ;;  %v536_v22 = vadd.f32 %v535_v13, %v2944_v10  ;;  %v2967_v30 = vld [vmem:[%s2791_s8 + $0x120] sm:$0xff] }
  0x50   : > { %485 = vadd.xlane.f32.xlu0 %v484_v26  ;;  %v532_v25 = vadd.f32 %v531_v17, %v2949_v14  ;;  %v2962_v26 = vld [vmem:[%s2791_s8 + $0x130] sm:$0xff]  ;;  %v543_v28 = vsel %vm466_vm0, %v2954_v18, 0.0  ;;  %v2975_v36 = vld [vmem:[%s2791_s8 + $0x148] sm:$0xff]  ;;  %v2985_v46 = vld [vmem:[%s2791_s8 + $0x140] sm:$0xff] }
  0x51   : > { %v544_v38 = vadd.f32 %v543_v28, %v2962_v26  ;;  %v2993_v52 = vld [vmem:[%s2791_s8 + $0x168] sm:$0xff]  ;;  %v3003_v62 = vld [vmem:[%s2791_s8 + $0x160] sm:$0xff] }
  0x52   : > { %v3011_v13 = vld [vmem:[%s2791_s8 + $0x188] sm:$0xff] }
  0x53   : > { %497 = vadd.xlane.f32.xlu1 %v496_v33  ;;  %v539_v33 = vsel %vm466_vm0, %v2957_v20, 0.0  ;;  %4939 = vst [vmem:[#allocation4_spill] sm:$0xff] %v3011_v13 }
  0x54   : > { %493 = vadd.xlane.f32.xlu0 %v492_v34  ;;  %v2972_v34 = vld [vmem:[%s2791_s8 + $0x158] sm:$0xff] }
  0x55   : > { %v551_v44 = vsel %vm466_vm0, %v2972_v34, 0.0 }
  0x57   : > { %505 = vadd.xlane.f32.xlu1 %v504_v41  ;;  %v540_v41 = vadd.f32 %v539_v33, %v2967_v30  ;;  %v3021_v33 = vld [vmem:[%s2791_s8 + $0x180] sm:$0xff] }
  0x58   : > { %501 = vadd.xlane.f32.xlu0 %v500_v42  ;;  %v2980_v42 = vld [vmem:[%s2791_s8 + $0x150] sm:$0xff]  ;;  %4940 = vst [vmem:[#allocation5_spill] sm:$0xff] %v3021_v33 }
  0x59   : > { %v552_v54 = vadd.f32 %v551_v44, %v2980_v42  ;;  %v3029_v44 = vld [vmem:[%s2791_s8 + $0x1a8] sm:$0xff] }
  0x5a   : > { %4942 = vst [vmem:[#allocation7_spill] sm:$0xff] %v3029_v44  ;;  %v571_v0 = vsel %vm466_vm0, %v3029_v44, 0.0 }
  0x5b   : > { %513 = vadd.xlane.f32.xlu1 %v512_v49  ;;  %v547_v49 = vsel %vm466_vm0, %v2975_v36, 0.0 }
  0x5c   : > { %509 = vadd.xlane.f32.xlu0 %v508_v50  ;;  %v2990_v50 = vld [vmem:[%s2791_s8 + $0x178] sm:$0xff] }
  0x5d   : > { %v559_v60 = vsel %vm466_vm0, %v2990_v50, 0.0 }
  0x5f   : > { %521 = vadd.xlane.f32.xlu1 %v520_v57  ;;  %v548_v57 = vadd.f32 %v547_v49, %v2985_v46 }
  0x60   : > { %517 = vadd.xlane.f32.xlu0 %v516_v58  ;;  %v2998_v58 = vld [vmem:[%s2791_s8 + $0x170] sm:$0xff] }
  0x61   : > { %v560_v17 = vadd.f32 %v559_v60, %v2998_v58 }
  0x63   : > { %529 = vadd.xlane.f32.xlu1 %v528_v8  ;;  %v555_v8 = vsel %vm466_vm0, %v2993_v52, 0.0 }
  0x64   : > { %525 = vadd.xlane.f32.xlu0 %v524_v9  ;;  %v3008_v9 = vld [vmem:[%s2791_s8 + $0x198] sm:$0xff] }
  0x65   : > { %4938 = vst [vmem:[#allocation3_spill] sm:$0xff] %v3008_v9  ;;  %v567_v28 = vsel %vm466_vm0, %v3008_v9, 0.0  ;;  %v3062_v9 = vld [vmem:[%s2791_s8 + $0x1f8] sm:$0xff] }
  0x66   : > { %4947 = vst [vmem:[#allocation12_spill] sm:$0xff] %v3062_v9 }
  0x67   : > { %537 = vadd.xlane.f32.xlu1 %v536_v22  ;;  %v556_v22 = vadd.f32 %v555_v8, %v3003_v62  ;;  %v3039_v8 = vld [vmem:[%s2791_s8 + $0x1a0] sm:$0xff] }
  0x68   : > { %533 = vadd.xlane.f32.xlu0 %v532_v25  ;;  %v3016_v25 = vld [vmem:[%s2791_s8 + $0x190] sm:$0xff]  ;;  %4944 = vst [vmem:[#allocation9_spill] sm:$0xff] %v3039_v8 }
  0x69   : > { %v568_v49 = vadd.f32 %v567_v28, %v3016_v25  ;;  %v572_v28 = vadd.f32 %v571_v0, %v3039_v8  ;;  %v3075_v8 = vld [vmem:[%s2791_s8 + $0x1e0] sm:$0xff] }
  0x6a   : > { %4949 = vst [vmem:[#allocation14_spill] sm:$0xff] %v3075_v8 }
  0x6b   : > { %545 = vadd.xlane.f32.xlu1 %v544_v38  ;;  %v563_v38 = vsel %vm466_vm0, %v3011_v13, 0.0  ;;  %v3044_v13 = vld [vmem:[%s2791_s8 + $0x1d8] sm:$0xff] }
  0x6c   : > { %541 = vadd.xlane.f32.xlu0 %v540_v41  ;;  %v3026_v41 = vld [vmem:[%s2791_s8 + $0x1b8] sm:$0xff]  ;;  %4945 = vst [vmem:[#allocation10_spill] sm:$0xff] %v3044_v13 }
  0x6d   : > { %4941 = vst [vmem:[#allocation6_spill] sm:$0xff] %v3026_v41  ;;  %v575_v60 = vsel %vm466_vm0, %v3026_v41, 0.0  ;;  %v583_v41 = vsel %vm466_vm0, %v3044_v13, 0.0  ;;  %v591_v13 = vsel %vm466_vm0, %v3062_v9, 0.0 }
  0x6f   : > { %553 = vadd.xlane.f32.xlu1 %v552_v54  ;;  %v564_v54 = vadd.f32 %v563_v38, %v3021_v33  ;;  %v3052_v38 = vld [vmem:[%s2791_s8 + $0x1d0] sm:$0xff]  ;;  %v3057_v33 = vld [vmem:[%s2791_s8 + $0x1c0] sm:$0xff] }
  0x70   : > { %549 = vadd.xlane.f32.xlu0 %v548_v57  ;;  %v3034_v57 = vld [vmem:[%s2791_s8 + $0x1b0] sm:$0xff] }
  0x71   : > { %4943 = vst [vmem:[#allocation8_spill] sm:$0xff] %v3034_v57 }
  0x73   : > { %561 = vadd.xlane.f32.xlu1 %v560_v17  ;;  %v3047_v17 = vld [vmem:[%s2791_s8 + $0x1c8] sm:$0xff] }
  0x74   : > { %557 = vadd.xlane.f32.xlu0 %v556_v22  ;;  %4946 = vst [vmem:[#allocation11_spill] sm:$0xff] %v3047_v17  ;;  %v576_v22 = vadd.f32 %v575_v60, %v3034_v57  ;;  %v579_v44 = vsel %vm466_vm0, %v3047_v17, 0.0  ;;  %v3070_v60 = vld [vmem:[%s2791_s8 + $0x1f0] sm:$0xff] }
  0x75   : > { %v580_v0 = vadd.f32 %v579_v44, %v3057_v33  ;;  %v592_v57 = vadd.f32 %v591_v13, %v3070_v60  ;;  %v3088_v13 = vld [vmem:[%s3085_s12] sm:$0xff]  ;;  %v3095_v44 = vld [vmem:[%s3085_s12 + $0x28] sm:$0xff] }
  0x76   : > { %4950 = vst [vmem:[#allocation15_spill] sm:$0xff] %v3088_v13  ;;  %4952 = vst [vmem:[#allocation17_spill] sm:$0xff] %v3095_v44 }
  0x77   : > { %569 = vadd.xlane.f32.xlu1 %v568_v49  ;;  %v3065_v49 = vld [vmem:[%s2791_s8 + $0x1e8] sm:$0xff] }
  0x78   : > { %565 = vadd.xlane.f32.xlu0 %v564_v54  ;;  %4948 = vst [vmem:[#allocation13_spill] sm:$0xff] %v3065_v49  ;;  %v584_v54 = vadd.f32 %v583_v41, %v3052_v38  ;;  %v587_v17 = vsel %vm466_vm0, %v3065_v49, 0.0  ;;  %v3092_v41 = vld [vmem:[%s3085_s12 + $0x8] sm:$0xff] }
  0x79   : > { %4951 = vst [vmem:[#allocation16_spill] sm:$0xff] %v3092_v41 }
  0x7b   : > { %577 = vadd.xlane.f32.xlu1 %v576_v22  ;;  %v588_v22 = vadd.f32 %v587_v17, %v3075_v8  ;;  %v3103_v17 = vld [vmem:[%s3085_s12 + $0x30] sm:$0xff] }
  0x7c   : > { %573 = vadd.xlane.f32.xlu0 %v572_v28  ;;  %4954 = vst [vmem:[#allocation19_spill] sm:$0xff] %v3103_v17  ;;  %v3107_v28 = vld [vmem:[%s3085_s12 + $0x18] sm:$0xff] }
  0x7d   : > { %4955 = vst [vmem:[#allocation20_spill] sm:$0xff] %v3107_v28 }
  0x7f   : > { %585 = vadd.xlane.f32.xlu1 %v584_v54  ;;  %v3111_v54 = vld [vmem:[%s3085_s12 + $0x48] sm:$0xff] }
  0x80   : > { %581 = vadd.xlane.f32.xlu0 %v580_v0  ;;  %4956 = vst [vmem:[#allocation21_spill] sm:$0xff] %v3111_v54  ;;  %v3115_v0 = vld [vmem:[%s3085_s12 + $0x20] sm:$0xff] }
  0x81   : > { %4957 = vst [vmem:[#allocation22_spill] sm:$0xff] %v3115_v0 }
  0x83   : > { %593 = vadd.xlane.f32.xlu1 %v592_v57  ;;  %v3099_v57 = vld [vmem:[%s3085_s12 + $0x10] sm:$0xff] }
  0x84   : > { %589 = vadd.xlane.f32.xlu0 %v588_v22  ;;  %4953 = vst [vmem:[#allocation18_spill] sm:$0xff] %v3099_v57  ;;  %v3119_v22 = vld [vmem:[%s3085_s12 + $0x50] sm:$0xff] }
  0x85   : > { %4958 = vst [vmem:[#allocation23_spill] sm:$0xff] %v3119_v22 }
  0x94   : > { %1333 = vperm.xlu1 %2483, %v3088_v13  }
  0x98   : > { %1338 = vperm.xlu1 %2483, %v3092_v41  }
  0x9a   : > { %1358 = vperm.xlu0 %2484, %v3095_v44   ;;  %v3123_v44 = vld [vmem:[%s3085_s12 + $0x38] sm:$0xff] }
  0x9b   : > { %4959 = vst [vmem:[#allocation24_spill] sm:$0xff] %v3123_v44 }
  0x9c   : > { %1343 = vperm.xlu1 %2483, %v3099_v57   ;;  %v3127_v57 = vld [vmem:[%s3085_s12 + $0x68] sm:$0xff] }
  0x9d   : > { %4960 = vst [vmem:[#allocation25_spill] sm:$0xff] %v3127_v57 }
  0x9e   : > { %1363 = vperm.xlu0 %2484, %v3103_v17   ;;  %v3131_v17 = vld [vmem:[%s3085_s12 + $0x40] sm:$0xff] }
  0x9f   : > { %4961 = vst [vmem:[#allocation26_spill] sm:$0xff] %v3131_v17 }
  0xa0   : > { %1348 = vperm.xlu1 %2483, %v3107_v28   ;;  %v3135_v28 = vld [vmem:[%s3085_s12 + $0x70] sm:$0xff] }
  0xa1   : > { %4962 = vst [vmem:[#allocation27_spill] sm:$0xff] %v3135_v28 }
  0xa2   : > { %1378 = vperm.xlu0 %2484, %v3111_v54   ;;  %v3139_v54 = vld [vmem:[%s3085_s12 + $0x58] sm:$0xff] }
  0xa3   : > { %4963 = vst [vmem:[#allocation28_spill] sm:$0xff] %v3139_v54 }
  0xa4   : > { %1353 = vperm.xlu1 %2483, %v3115_v0   ;;  %v3144_v0 = vld [vmem:[%s3085_s12 + $0x60] sm:$0xff] }
  0xa5   : > { %4964 = vst [vmem:[#allocation29_spill] sm:$0xff] %v3144_v0 }
  0xa6   : > { %1383 = vperm.xlu0 %2484, %v3119_v22  }
  0xa8   : > { %1368 = vperm.xlu1 %2483, %v3123_v44  }
  0xaa   : > { %1398 = vperm.xlu0 %2484, %v3127_v57  }
  0xac   : > { %1373 = vperm.xlu1 %2483, %v3131_v17  }
  0xae   : > { %1403 = vperm.xlu0 %2484, %v3135_v28  }
  0xb0   : > { %1388 = vperm.xlu1 %2483, %v3139_v54  }
  0xb4   : > { %1393 = vperm.xlu1 %2483, %v3144_v0  }
  0xd4   : > { %v478_v22 = vpop.xlane.xlu1 %477 }
  0xd5   : > { %v597_v44 = vmul.f32 0.0051020407, %v478_v22  ;;  %v470_v41 = vpop.xlane.xlu0 %469 }
  0xd6   : > { %v595_v13 = vmul.f32 0.0051020407, %v470_v41 }
  0xd7   : > { %v3148_v57 = vsub.f32 %v2794_v1, %v597_v44  ;;  %v3151_v49 = vsub.f32 %v2797_v2, %v597_v44 }
  0xd8   : > { %v3154_v17 = vsub.f32 %v2800_v3, %v595_v13  ;;  %v3157_v28 = vsub.f32 %v2805_v5, %v595_v13  ;;  %v482_v54 = vpop.xlane.xlu1 %481 }
  0xd9   : > { %4965 = vst [vmem:[#allocation30_spill] sm:$0xff] %v3148_v57  ;;  %4966 = vst [vmem:[#allocation31_spill] sm:$0xff] %v3151_v49  ;;  %v598_v8 = vmul.f32 0.0051020407, %v482_v54  ;;  %v474_v9 = vpop.xlane.xlu0 %473  ;;  %v696_v22 = vmul.f32 %v3151_v49, %v3151_v49  ;;  %v695_v5 = vmul.f32 %v3148_v57, %v3148_v57 }
  0xda   : > { %4967 = vst [vmem:[#allocation32_spill] sm:$0xff] %v3154_v17  ;;  %4968 = vst [vmem:[#allocation33_spill] sm:$0xff] %v3157_v28  ;;  %v596_v0 = vmul.f32 0.0051020407, %v474_v9  ;;  %v691_v1 = vmul.f32 %v3154_v17, %v3154_v17  ;;  %v692_v2 = vmul.f32 %v3157_v28, %v3157_v28 }
  0xdb   : > { %v3166_v41 = vsub.f32 %v2808_v6, %v598_v8  ;;  %v3169_v3 = vsub.f32 %v2811_v7, %v598_v8  ;;  %v763_v49 = vsel %vm466_vm0, %v696_v22, 0.0 }
  0xdc   : > { %v3174_v13 = vsub.f32 %v2819_v11, %v596_v0  ;;  %v3177_v9 = vsub.f32 %v2822_v12, %v596_v0  ;;  %v490_v44 = vpop.xlane.xlu1 %489  ;;  %v755_v54 = vsel %vm466_vm0, %v692_v2, 0.0 }
  0xdd   : > { %4969 = vst [vmem:[#allocation34_spill] sm:$0xff] %v3166_v41  ;;  %4970 = vst [vmem:[#allocation35_spill] sm:$0xff] %v3169_v3  ;;  %v600_v28 = vmul.f32 0.0051020407, %v490_v44  ;;  %v486_v6 = vpop.xlane.xlu0 %485  ;;  %v756_v17 = vadd.f32 %v755_v54, %v691_v1  ;;  %v698_v7 = vmul.f32 %v3169_v3, %v3169_v3  ;;  %v697_v12 = vmul.f32 %v3166_v41, %v3166_v41 }
  0xde   : > { %4971 = vst [vmem:[#allocation36_spill] sm:$0xff] %v3177_v9  ;;  %v599_v8 = vmul.f32 0.0051020407, %v486_v6  ;;  %v693_v57 = vmul.f32 %v3174_v13, %v3174_v13  ;;  %v694_v11 = vmul.f32 %v3177_v9, %v3177_v9  ;;  %v764_v1 = vadd.f32 %v763_v49, %v695_v5 }
  0xdf   : > { %v3190_v0 = vsub.f32 %v2836_v19, %v600_v28  ;;  %v3193_v22 = vsub.f32 %v2828_v15, %v600_v28  ;;  %757 = vadd.xlane.f32.xlu0 %v756_v17  ;;  %v767_v2 = vsel %vm466_vm0, %v698_v7, 0.0 }
  0xe0   : > { %v3197_v44 = vsub.f32 %v2841_v21, %v599_v8  ;;  %v3200_v54 = vsub.f32 %v2831_v16, %v599_v8  ;;  %v498_v6 = vpop.xlane.xlu1 %497  ;;  %v759_v3 = vsel %vm466_vm0, %v694_v11, 0.0  ;;  %v768_v17 = vadd.f32 %v767_v2, %v697_v12 }
  0xe1   : > { %v602_v41 = vmul.f32 0.0051020407, %v498_v6  ;;  %v494_v9 = vpop.xlane.xlu0 %493  ;;  %v760_v19 = vadd.f32 %v759_v3, %v693_v57  ;;  %v702_v15 = vmul.f32 %v3193_v22, %v3193_v22  ;;  %v701_v57 = vmul.f32 %v3190_v0, %v3190_v0 }
  0xe2   : > { %v601_v28 = vmul.f32 0.0051020407, %v494_v9  ;;  %v699_v49 = vmul.f32 %v3197_v44, %v3197_v44  ;;  %v700_v21 = vmul.f32 %v3200_v54, %v3200_v54 }
  0xe3   : > { %v3210_v16 = vsub.f32 %v2854_v27, %v602_v41  ;;  %v3213_v5 = vsub.f32 %v2846_v23, %v602_v41  ;;  %765 = vadd.xlane.f32.xlu0 %v764_v1  ;;  %761 = vadd.xlane.f32.xlu1 %v760_v19  ;;  %v775_v27 = vsel %vm466_vm0, %v702_v15, 0.0 }
  0xe4   : > { %v3218_v3 = vsub.f32 %v2859_v29, %v601_v28  ;;  %v3221_v9 = vsub.f32 %v2849_v24, %v601_v28  ;;  %v506_v7 = vpop.xlane.xlu1 %505  ;;  %v771_v8 = vsel %vm466_vm0, %v700_v21, 0.0  ;;  %v776_v15 = vadd.f32 %v775_v27, %v701_v57 }
  0xe5   : > { %4972 = vst [vmem:[#allocation37_spill] sm:$0xff] %v3213_v5  ;;  %v604_v11 = vmul.f32 0.0051020407, %v506_v7  ;;  %v502_v12 = vpop.xlane.xlu0 %501  ;;  %v772_v23 = vadd.f32 %v771_v8, %v699_v49  ;;  %v706_v41 = vmul.f32 %v3213_v5, %v3213_v5  ;;  %v705_v24 = vmul.f32 %v3210_v16, %v3210_v16 }
  0xe6   : > { %v603_v1 = vmul.f32 0.0051020407, %v502_v12  ;;  %v703_v2 = vmul.f32 %v3218_v3, %v3218_v3  ;;  %v704_v29 = vmul.f32 %v3221_v9, %v3221_v9 }
  0xe7   : > { %v3234_v6 = vsub.f32 %v2872_v35, %v604_v11  ;;  %v3237_v19 = vsub.f32 %v2864_v31, %v604_v11  ;;  %769 = vadd.xlane.f32.xlu1 %v768_v17  ;;  %773 = vadd.xlane.f32.xlu0 %v772_v23  ;;  %v783_v28 = vsel %vm466_vm0, %v706_v41, 0.0 }
  0xe8   : > { %v3241_v49 = vsub.f32 %v2877_v37, %v603_v1  ;;  %v3244_v21 = vsub.f32 %v2867_v32, %v603_v1  ;;  %v514_v7 = vpop.xlane.xlu1 %513  ;;  %v779_v8 = vsel %vm466_vm0, %v704_v29, 0.0  ;;  %v784_v11 = vadd.f32 %v783_v28, %v705_v24 }
  0xe9   : > { %v606_v12 = vmul.f32 0.0051020407, %v514_v7  ;;  %v510_v35 = vpop.xlane.xlu0 %509  ;;  %v780_v5 = vadd.f32 %v779_v8, %v703_v2  ;;  %v710_v31 = vmul.f32 %v3237_v19, %v3237_v19  ;;  %v709_v23 = vmul.f32 %v3234_v6, %v3234_v6 }
  0xea   : > { %v605_v17 = vmul.f32 0.0051020407, %v510_v35  ;;  %v707_v57 = vmul.f32 %v3241_v49, %v3241_v49  ;;  %v708_v37 = vmul.f32 %v3244_v21, %v3244_v21 }
  0xeb   : > { %v3254_v32 = vsub.f32 %v2890_v43, %v606_v12  ;;  %v3257_v27 = vsub.f32 %v2882_v39, %v606_v12  ;;  %777 = vadd.xlane.f32.xlu1 %v776_v15  ;;  %781 = vadd.xlane.f32.xlu0 %v780_v5  ;;  %v791_v43 = vsel %vm466_vm0, %v710_v31, 0.0 }
  0xec   : > { %v3262_v41 = vsub.f32 %v2895_v45, %v605_v17  ;;  %v3265_v1 = vsub.f32 %v2885_v40, %v605_v17  ;;  %v522_v2 = vpop.xlane.xlu1 %521  ;;  %v787_v29 = vsel %vm466_vm0, %v708_v37, 0.0  ;;  %v792_v35 = vadd.f32 %v791_v43, %v709_v23 }
  0xed   : > { %4973 = vst [vmem:[#allocation38_spill] sm:$0xff] %v3254_v32  ;;  %4974 = vst [vmem:[#allocation39_spill] sm:$0xff] %v3257_v27  ;;  %v608_v24 = vmul.f32 0.0051020407, %v522_v2  ;;  %v518_v28 = vpop.xlane.xlu0 %517  ;;  %v788_v39 = vadd.f32 %v787_v29, %v707_v57  ;;  %v714_v5 = vmul.f32 %v3257_v27, %v3257_v27  ;;  %v713_v40 = vmul.f32 %v3254_v32, %v3254_v32 }
  0xee   : > { %v607_v15 = vmul.f32 0.0051020407, %v518_v28  ;;  %v711_v7 = vmul.f32 %v3262_v41, %v3262_v41  ;;  %v712_v45 = vmul.f32 %v3265_v1, %v3265_v1 }
  0xef   : > { %v3278_v8 = vsub.f32 %v2908_v51, %v608_v24  ;;  %v3281_v12 = vsub.f32 %v2900_v47, %v608_v24  ;;  %785 = vadd.xlane.f32.xlu1 %v784_v11  ;;  %789 = vadd.xlane.f32.xlu0 %v788_v39  ;;  %v799_v31 = vsel %vm466_vm0, %v714_v5, 0.0 }
  0xf0   : > { %v3285_v17 = vsub.f32 %v2913_v53, %v607_v15  ;;  %v3288_v57 = vsub.f32 %v2903_v48, %v607_v15  ;;  %v530_v37 = vpop.xlane.xlu1 %529  ;;  %v795_v2 = vsel %vm466_vm0, %v712_v45, 0.0  ;;  %v800_v24 = vadd.f32 %v799_v31, %v713_v40 }
  0xf1   : > { %4975 = vst [vmem:[#allocation40_spill] sm:$0xff] %v3278_v8  ;;  %4976 = vst [vmem:[#allocation41_spill] sm:$0xff] %v3281_v12  ;;  %v610_v29 = vmul.f32 0.0051020407, %v530_v37  ;;  %v526_v51 = vpop.xlane.xlu0 %525  ;;  %v796_v28 = vadd.f32 %v795_v2, %v711_v7  ;;  %v718_v47 = vmul.f32 %v3281_v12, %v3281_v12  ;;  %v717_v39 = vmul.f32 %v3278_v8, %v3278_v8  ;;  %v5030_v12 = vld [vmem:[#allocation16_spill] sm:$0xff]  ;;  %v5033_v8 = vld [vmem:[#allocation17_spill] sm:$0xff] }
  0xf2   : > { %4977 = vst [vmem:[#allocation42_spill] sm:$0xff] %v3288_v57  ;;  %v609_v11 = vmul.f32 0.0051020407, %v526_v51  ;;  %v715_v23 = vmul.f32 %v3285_v17, %v3285_v17  ;;  %v716_v53 = vmul.f32 %v3288_v57, %v3288_v57 }
  0xf3   : > { %v3298_v48 = vsub.f32 %v2926_v59, %v610_v29  ;;  %v3301_v43 = vsub.f32 %v2918_v55, %v610_v29  ;;  %793 = vadd.xlane.f32.xlu1 %v792_v35  ;;  %797 = vadd.xlane.f32.xlu0 %v796_v28  ;;  %v807_v59 = vsel %vm466_vm0, %v718_v47, 0.0 }
  0xf4   : > { %v3306_v5 = vsub.f32 %v2931_v61, %v609_v11  ;;  %v3309_v15 = vsub.f32 %v2921_v56, %v609_v11  ;;  %v538_v7 = vpop.xlane.xlu1 %537  ;;  %v803_v45 = vsel %vm466_vm0, %v716_v53, 0.0  ;;  %v808_v28 = vadd.f32 %v807_v59, %v717_v39 }
  0xf5   : > { %4978 = vst [vmem:[#allocation43_spill] sm:$0xff] %v3298_v48  ;;  %4979 = vst [vmem:[#allocation44_spill] sm:$0xff] %v3301_v43  ;;  %v612_v40 = vmul.f32 0.0051020407, %v538_v7  ;;  %v534_v31 = vpop.xlane.xlu0 %533  ;;  %v804_v55 = vadd.f32 %v803_v45, %v715_v23  ;;  %v722_v35 = vmul.f32 %v3301_v43, %v3301_v43  ;;  %v721_v56 = vmul.f32 %v3298_v48, %v3298_v48 }
  0xf6   : > { %4980 = vst [vmem:[#allocation45_spill] sm:$0xff] %v3306_v5  ;;  %4981 = vst [vmem:[#allocation46_spill] sm:$0xff] %v3309_v15  ;;  %v611_v37 = vmul.f32 0.0051020407, %v534_v31  ;;  %v719_v2 = vmul.f32 %v3306_v5, %v3306_v5  ;;  %v720_v61 = vmul.f32 %v3309_v15, %v3309_v15 }
  0xf7   : > { %v3322_v29 = vsub.f32 %v2944_v10, %v612_v40  ;;  %v3325_v51 = vsub.f32 %v2936_v63, %v612_v40  ;;  %801 = vadd.xlane.f32.xlu1 %v800_v24  ;;  %805 = vadd.xlane.f32.xlu0 %v804_v55  ;;  %v815_v47 = vsel %vm466_vm0, %v722_v35, 0.0 }
  0xf8   : > { %v3329_v11 = vsub.f32 %v2949_v14, %v611_v37  ;;  %v3332_v23 = vsub.f32 %v2939_v4, %v611_v37  ;;  %v546_v53 = vpop.xlane.xlu1 %545  ;;  %v811_v7 = vsel %vm466_vm0, %v720_v61, 0.0  ;;  %v816_v40 = vadd.f32 %v815_v47, %v721_v56 }
  0xf9   : > { %4982 = vst [vmem:[#allocation47_spill] sm:$0xff] %v3322_v29  ;;  %4983 = vst [vmem:[#allocation48_spill] sm:$0xff] %v3325_v51  ;;  %v614_v45 = vmul.f32 0.0051020407, %v546_v53  ;;  %v542_v10 = vpop.xlane.xlu0 %541  ;;  %v812_v31 = vadd.f32 %v811_v7, %v719_v2  ;;  %v726_v63 = vmul.f32 %v3325_v51, %v3325_v51  ;;  %v725_v55 = vmul.f32 %v3322_v29, %v3322_v29 }
  0xfa   : > { %4984 = vst [vmem:[#allocation49_spill] sm:$0xff] %v3329_v11  ;;  %4985 = vst [vmem:[#allocation50_spill] sm:$0xff] %v3332_v23  ;;  %v613_v24 = vmul.f32 0.0051020407, %v542_v10  ;;  %v723_v39 = vmul.f32 %v3329_v11, %v3329_v11  ;;  %v724_v14 = vmul.f32 %v3332_v23, %v3332_v23 }
  0xfb   : > { %v3342_v4 = vsub.f32 %v2962_v26, %v614_v45  ;;  %v3345_v59 = vsub.f32 %v2954_v18, %v614_v45  ;;  %809 = vadd.xlane.f32.xlu1 %v808_v28  ;;  %813 = vadd.xlane.f32.xlu0 %v812_v31  ;;  %v823_v26 = vsel %vm466_vm0, %v726_v63, 0.0 }
  0xfc   : > { %v3350_v35 = vsub.f32 %v2967_v30, %v613_v24  ;;  %v3353_v37 = vsub.f32 %v2957_v20, %v613_v24  ;;  %v554_v2 = vpop.xlane.xlu1 %553  ;;  %v819_v61 = vsel %vm466_vm0, %v724_v14, 0.0  ;;  %v824_v31 = vadd.f32 %v823_v26, %v725_v55 }
  0xfd   : > { %4986 = vst [vmem:[#allocation51_spill] sm:$0xff] %v3342_v4  ;;  %4987 = vst [vmem:[#allocation52_spill] sm:$0xff] %v3345_v59  ;;  %v616_v56 = vmul.f32 0.0051020407, %v554_v2  ;;  %v550_v47 = vpop.xlane.xlu0 %549  ;;  %v820_v18 = vadd.f32 %v819_v61, %v723_v39  ;;  %v730_v28 = vmul.f32 %v3345_v59, %v3345_v59  ;;  %v729_v20 = vmul.f32 %v3342_v4, %v3342_v4 }
  0xfe   : > { %4988 = vst [vmem:[#allocation53_spill] sm:$0xff] %v3350_v35  ;;  %4989 = vst [vmem:[#allocation54_spill] sm:$0xff] %v3353_v37  ;;  %v615_v53 = vmul.f32 0.0051020407, %v550_v47  ;;  %v727_v7 = vmul.f32 %v3350_v35, %v3350_v35  ;;  %v728_v30 = vmul.f32 %v3353_v37, %v3353_v37 }
  0xff   : > { %v3366_v45 = vsub.f32 %v2980_v42, %v616_v56  ;;  %v3369_v10 = vsub.f32 %v2972_v34, %v616_v56  ;;  %817 = vadd.xlane.f32.xlu1 %v816_v40  ;;  %821 = vadd.xlane.f32.xlu0 %v820_v18  ;;  %v831_v63 = vsel %vm466_vm0, %v730_v28, 0.0 }
 0x100   : > { %v3373_v24 = vsub.f32 %v2985_v46, %v615_v53  ;;  %v3376_v39 = vsub.f32 %v2975_v36, %v615_v53  ;;  %v562_v14 = vpop.xlane.xlu1 %561  ;;  %v827_v2 = vsel %vm466_vm0, %v728_v30, 0.0  ;;  %v832_v56 = vadd.f32 %v831_v63, %v729_v20 }
 0x101   : > { %4990 = vst [vmem:[#allocation55_spill] sm:$0xff] %v3366_v45  ;;  %4991 = vst [vmem:[#allocation56_spill] sm:$0xff] %v3369_v10  ;;  %v618_v61 = vmul.f32 0.0051020407, %v562_v14  ;;  %v558_v42 = vpop.xlane.xlu0 %557  ;;  %v828_v47 = vadd.f32 %v827_v2, %v727_v7  ;;  %v734_v34 = vmul.f32 %v3369_v10, %v3369_v10  ;;  %v733_v18 = vmul.f32 %v3366_v45, %v3366_v45 }
 0x102   : > { %4992 = vst [vmem:[#allocation57_spill] sm:$0xff] %v3373_v24  ;;  %4993 = vst [vmem:[#allocation58_spill] sm:$0xff] %v3376_v39  ;;  %v617_v40 = vmul.f32 0.0051020407, %v558_v42  ;;  %v731_v55 = vmul.f32 %v3373_v24, %v3373_v24  ;;  %v732_v46 = vmul.f32 %v3376_v39, %v3376_v39  ;;  %v4999_v42 = vld [vmem:[#allocation3_spill] sm:$0xff] }
 0x103   : > { %v3386_v36 = vsub.f32 %v2998_v58, %v618_v61  ;;  %v3389_v26 = vsub.f32 %v2990_v50, %v618_v61  ;;  %825 = vadd.xlane.f32.xlu1 %v824_v31  ;;  %829 = vadd.xlane.f32.xlu0 %v828_v47  ;;  %v839_v58 = vsel %vm466_vm0, %v734_v34, 0.0 }
 0x104   : > { %v3394_v28 = vsub.f32 %v3003_v62, %v617_v40  ;;  %v3397_v53 = vsub.f32 %v2993_v52, %v617_v40  ;;  %v570_v7 = vpop.xlane.xlu1 %569  ;;  %v835_v30 = vsel %vm466_vm0, %v732_v46, 0.0  ;;  %v840_v34 = vadd.f32 %v839_v58, %v733_v18 }
 0x105   : > { %4994 = vst [vmem:[#allocation59_spill] sm:$0xff] %v3386_v36  ;;  %4995 = vst [vmem:[#allocation60_spill] sm:$0xff] %v3389_v26  ;;  %v620_v20 = vmul.f32 0.0051020407, %v570_v7  ;;  %v566_v63 = vpop.xlane.xlu0 %565  ;;  %v836_v50 = vadd.f32 %v835_v30, %v731_v55  ;;  %v738_v31 = vmul.f32 %v3389_v26, %v3389_v26  ;;  %v737_v52 = vmul.f32 %v3386_v36, %v3386_v36  ;;  %v5001_v55 = vld [vmem:[#allocation5_spill] sm:$0xff]  ;;  %v5003_v7 = vld [vmem:[#allocation4_spill] sm:$0xff] }
 0x106   : > { %4996 = vst [vmem:[#allocation61_spill] sm:$0xff] %v3394_v28  ;;  %4997 = vst [vmem:[#allocation62_spill] sm:$0xff] %v3397_v53  ;;  %v619_v14 = vmul.f32 0.0051020407, %v566_v63  ;;  %v735_v2 = vmul.f32 %v3394_v28, %v3394_v28  ;;  %v736_v62 = vmul.f32 %v3397_v53, %v3397_v53 }
 0x107   : > { %v3410_v61 = vsub.f32 %v3016_v25, %v620_v20  ;;  %v3413_v47 = vsub.f32 %v4999_v42, %v620_v20  ;;  %833 = vadd.xlane.f32.xlu1 %v832_v56  ;;  %837 = vadd.xlane.f32.xlu0 %v836_v50  ;;  %v847_v40 = vsel %vm466_vm0, %v738_v31, 0.0  ;;  %v5005_v31 = vld [vmem:[#allocation8_spill] sm:$0xff]  ;;  %v5007_v42 = vld [vmem:[#allocation6_spill] sm:$0xff] }
 0x108   : > { %v3417_v46 = vsub.f32 %v5001_v55, %v619_v14  ;;  %v3420_v30 = vsub.f32 %v5003_v7, %v619_v14  ;;  %v578_v63 = vpop.xlane.xlu1 %577  ;;  %v843_v26 = vsel %vm466_vm0, %v736_v62, 0.0  ;;  %v848_v50 = vadd.f32 %v847_v40, %v737_v52  ;;  %v5011_v52 = vld [vmem:[#allocation7_spill] sm:$0xff] }
 0x109   : > { %4998 = vst [vmem:[#allocation63_spill] sm:$0xff] %v3410_v61  ;;  %5000 = vst [vmem:[#allocation3_spill] sm:$0xff] %v3413_v47  ;;  %v622_v36 = vmul.f32 0.0051020407, %v578_v63  ;;  %v574_v25 = vpop.xlane.xlu0 %573  ;;  %v844_v53 = vadd.f32 %v843_v26, %v735_v2  ;;  %v742_v20 = vmul.f32 %v3413_v47, %v3413_v47  ;;  %v741_v26 = vmul.f32 %v3410_v61, %v3410_v61  ;;  %v5009_v2 = vld [vmem:[#allocation9_spill] sm:$0xff] }
 0x10a   : > { %5002 = vst [vmem:[#allocation5_spill] sm:$0xff] %v3417_v46  ;;  %5004 = vst [vmem:[#allocation4_spill] sm:$0xff] %v3420_v30  ;;  %v621_v56 = vmul.f32 0.0051020407, %v574_v25  ;;  %v739_v18 = vmul.f32 %v3417_v46, %v3417_v46  ;;  %v740_v58 = vmul.f32 %v3420_v30, %v3420_v30 }
 0x10b   : > { %v3430_v14 = vsub.f32 %v5005_v31, %v622_v36  ;;  %v3433_v55 = vsub.f32 %v5007_v42, %v622_v36  ;;  %841 = vadd.xlane.f32.xlu1 %v840_v34  ;;  %845 = vadd.xlane.f32.xlu0 %v844_v53  ;;  %v855_v25 = vsel %vm466_vm0, %v742_v20, 0.0  ;;  %v5014_v20 = vld [vmem:[#allocation10_spill] sm:$0xff] }
 0x10c   : > { %v3438_v62 = vsub.f32 %v5009_v2, %v621_v56  ;;  %v3441_v40 = vsub.f32 %v5011_v52, %v621_v56  ;;  %v586_v7 = vpop.xlane.xlu1 %585  ;;  %v851_v63 = vsel %vm466_vm0, %v740_v58, 0.0 }
 0x10d   : > { %5006 = vst [vmem:[#allocation8_spill] sm:$0xff] %v3430_v14  ;;  %5008 = vst [vmem:[#allocation6_spill] sm:$0xff] %v3433_v55  ;;  %v624_v31 = vmul.f32 0.0051020407, %v586_v7  ;;  %v582_v47 = vpop.xlane.xlu0 %581  ;;  %v852_v36 = vadd.f32 %v851_v63, %v739_v18  ;;  %v746_v53 = vmul.f32 %v3433_v55, %v3433_v55  ;;  %v745_v56 = vmul.f32 %v3430_v14, %v3430_v14  ;;  %v5017_v63 = vld [vmem:[#allocation11_spill] sm:$0xff] }
 0x10e   : > { %5010 = vst [vmem:[#allocation9_spill] sm:$0xff] %v3438_v62  ;;  %5012 = vst [vmem:[#allocation7_spill] sm:$0xff] %v3441_v40  ;;  %v623_v34 = vmul.f32 0.0051020407, %v582_v47  ;;  %v743_v42 = vmul.f32 %v3438_v62, %v3438_v62  ;;  %v744_v2 = vmul.f32 %v3441_v40, %v3441_v40  ;;  %v856_v18 = vadd.f32 %v855_v25, %v741_v26 }
 0x10f   : > { %v3454_v58 = vsub.f32 %v3052_v38, %v624_v31  ;;  %v3457_v52 = vsub.f32 %v5014_v20, %v624_v31  ;;  %849 = vadd.xlane.f32.xlu1 %v848_v50  ;;  %853 = vadd.xlane.f32.xlu0 %v852_v36  ;;  %v863_v47 = vsel %vm466_vm0, %v746_v53, 0.0  ;;  %v5020_v53 = vld [vmem:[#allocation12_spill] sm:$0xff] }
 0x110   : > { %v3461_v7 = vsub.f32 %v3057_v33, %v623_v34  ;;  %v3464_v55 = vsub.f32 %v5017_v63, %v623_v34  ;;  %v594_v40 = vpop.xlane.xlu1 %593  ;;  %v859_v14 = vsel %vm466_vm0, %v744_v2, 0.0  ;;  %v864_v36 = vadd.f32 %v863_v47, %v745_v56  ;;  %v5024_v2 = vld [vmem:[#allocation13_spill] sm:$0xff] }
 0x111   : > { %5013 = vst [vmem:[#allocation64_spill] sm:$0xff] %v3454_v58  ;;  %5015 = vst [vmem:[#allocation10_spill] sm:$0xff] %v3457_v52  ;;  %v626_v62 = vmul.f32 0.0051020407, %v594_v40  ;;  %v590_v38 = vpop.xlane.xlu0 %589  ;;  %v860_v61 = vadd.f32 %v859_v14, %v743_v42  ;;  %v750_v31 = vmul.f32 %v3457_v52, %v3457_v52  ;;  %v749_v14 = vmul.f32 %v3454_v58, %v3454_v58  ;;  %v5022_v40 = vld [vmem:[#allocation14_spill] sm:$0xff] }
 0x112   : > { %5016 = vst [vmem:[#allocation65_spill] sm:$0xff] %v3461_v7  ;;  %5018 = vst [vmem:[#allocation11_spill] sm:$0xff] %v3464_v55  ;;  %v625_v50 = vmul.f32 0.0051020407, %v590_v38  ;;  %v747_v26 = vmul.f32 %v3461_v7, %v3461_v7  ;;  %v748_v33 = vmul.f32 %v3464_v55, %v3464_v55 }
 0x113   : > { %v3474_v25 = vsub.f32 %v3070_v60, %v626_v62  ;;  %v3477_v34 = vsub.f32 %v5020_v53, %v626_v62  ;;  %857 = vadd.xlane.f32.xlu1 %v856_v18  ;;  %861 = vadd.xlane.f32.xlu0 %v860_v61  ;;  %v871_v47 = vsel %vm466_vm0, %v750_v31, 0.0  ;;  %v3503_v53 = vld [vmem:[%s3085_s12 + $0x88] sm:$0xff] }
 0x114   : > { %v3482_v42 = vsub.f32 %v5022_v40, %v625_v50  ;;  %v3485_v56 = vsub.f32 %v5024_v2, %v625_v50  ;;  %v867_v20 = vsel %vm466_vm0, %v748_v33, 0.0  ;;  %v872_v63 = vadd.f32 %v871_v47, %v749_v14  ;;  %v3508_v14 = vld [vmem:[%s3085_s12 + $0x80] sm:$0xff]  ;;  %v3511_v40 = vld [vmem:[%s3085_s12 + $0x90] sm:$0xff]  ;;  %v3516_v2 = vld [vmem:[%s3085_s12 + $0x98] sm:$0xff] }
 0x115   : > { %5019 = vst [vmem:[#allocation66_spill] sm:$0xff] %v3474_v25  ;;  %5021 = vst [vmem:[#allocation12_spill] sm:$0xff] %v3477_v34  ;;  %v868_v60 = vadd.f32 %v867_v20, %v747_v26  ;;  %v754_v18 = vmul.f32 %v3477_v34, %v3477_v34  ;;  %v753_v38 = vmul.f32 %v3474_v25, %v3474_v25  ;;  %v3519_v20 = vld [vmem:[%s3085_s12 + $0xa8] sm:$0xff]  ;;  %v3524_v47 = vld [vmem:[%s3085_s12 + $0xa0] sm:$0xff] }
 0x116   : > { %5023 = vst [vmem:[#allocation14_spill] sm:$0xff] %v3482_v42  ;;  %5025 = vst [vmem:[#allocation13_spill] sm:$0xff] %v3485_v56  ;;  %v751_v62 = vmul.f32 %v3482_v42, %v3482_v42  ;;  %v752_v61 = vmul.f32 %v3485_v56, %v3485_v56 }
 0x117   : > { %865 = vadd.xlane.f32.xlu1 %v864_v36  ;;  %869 = vadd.xlane.f32.xlu0 %v868_v60  ;;  %v879_v50 = vsel %vm466_vm0, %v754_v18, 0.0  ;;  %v3500_v36 = vld [vmem:[%s3085_s12 + $0x78] sm:$0xff]  ;;  %v3527_v60 = vld [vmem:[%s3085_s12 + $0xb0] sm:$0xff]  ;;  %v3537_v18 = vld [vmem:[%s3085_s12 + $0xc8] sm:$0xff] }
 0x118   : > { %v875_v31 = vsel %vm466_vm0, %v752_v61, 0.0  ;;  %v880_v33 = vadd.f32 %v879_v50, %v753_v38  ;;  %v3534_v61 = vld [vmem:[%s3085_s12 + $0xb8] sm:$0xff] }
 0x119   : > { %v876_v26 = vadd.f32 %v875_v31, %v751_v62  ;;  %v3529_v62 = vpop.permute.xlu1 %1333  ;;  %v4899_v31 = vmov 0  }
 0x11b   : > { %873 = vadd.xlane.f32.xlu1 %v872_v63  ;;  %877 = vadd.xlane.f32.xlu0 %v876_v26  ;;  %v3542_v63 = vld [vmem:[%s3085_s12 + $0xc0] sm:$0xff]  ;;  %v3551_v26 = vpop.permute.xlu0 %1358 }
 0x11d   : > { %v3544_v38 = vpop.permute.xlu1 %1338 }
 0x11f   : > { %881 = vadd.xlane.f32.xlu1 %v880_v33  ;;  %v3555_v34 = vpop.permute.xlu0 %1363 }
 0x121   : > { %v3548_v50 = vpop.permute.xlu1 %1343 }
 0x123   : > { %v3559_v56 = vpop.permute.xlu0 %1378 }
 0x125   : > { %v3553_v33 = vpop.permute.xlu1 %1348 }
 0x127   : > { %v3563_v52 = vpop.permute.xlu0 %1383 }
 0x129   : > { %v3557_v25 = vpop.permute.xlu1 %1353 }
 0x12b   : > { %v3567_v55 = vpop.permute.xlu0 %1398 }
 0x12c   : > { %5026 = vst [vmem:[#allocation67_spill] sm:$0xff] %v3567_v55 }
 0x12d   : > { %v3561_v42 = vpop.permute.xlu1 %1368 }
 0x130   : > { %1408 = vperm.xlu1 %2483, %v3500_v36  }
 0x131   : > { %1418 = vperm.xlu0 %2484, %v3503_v53   ;;  %v3565_v58 = vpop.permute.xlu1 %1373 }
 0x134   : > { %1413 = vperm.xlu1 %2483, %v3508_v14  }
 0x135   : > { %1423 = vperm.xlu0 %2484, %v3511_v40   ;;  %v3569_v7 = vpop.permute.xlu1 %1388 }
 0x138   : > { %1428 = vperm.xlu1 %2483, %v3516_v2  }
 0x139   : > { %1438 = vperm.xlu0 %2484, %v3519_v20   ;;  %v3573_v30 = vpop.permute.xlu1 %1393 }
 0x13a   : > { %5028 = vst [vmem:[#allocation69_spill] sm:$0xff] %v3573_v30 }
 0x13c   : > { %1433 = vperm.xlu1 %2483, %v3524_v47  }
 0x13d   : > { %1443 = vperm.xlu0 %2484, %v3527_v60  }
 0x140   : > { %1448 = vperm.xlu1 %2483, %v3534_v61  }
 0x141   : > { %1458 = vperm.xlu0 %2484, %v3537_v18  }
 0x144   : > { %1453 = vperm.xlu1 %2483, %v3542_v63  }
 0x145   : > { %2485 = vset.pattern.permute.xlu0 %v4899_v31 }
 0x148   : > { %2486 = vset.pattern.permute.xlu1 %v4899_v31  ;;  %v3571_v31 = vpop.permute.xlu0 %1403 }
 0x149   : > { %5027 = vst [vmem:[#allocation68_spill] sm:$0xff] %v3571_v31 }
 0x16c   : > { %v758_v46 = vpop.xlane.xlu0 %757 }
 0x16d   : > { %v883_v28 = vmul.f32 0.0051020407, %v758_v46 }
 0x16f   : > { %v947_v10 = vadd.f32 1e-05, %v883_v28 }
 0x170   : > { %v762_v45 = vpop.xlane.xlu1 %761  ;;  %v766_v59 = vpop.xlane.xlu0 %765 }
 0x171   : > { %2495 = vrsqrt.f32 %v947_v10  ;;  %v884_v4 = vmul.f32 0.0051020407, %v762_v45  ;;  %v885_v39 = vmul.f32 0.0051020407, %v766_v59  ;;  %v5029_v59 = vld [vmem:[#allocation15_spill] sm:$0xff] }
 0x173   : > { %v948_v24 = vadd.f32 1e-05, %v884_v4  ;;  %v949_v37 = vadd.f32 1e-05, %v885_v39 }
 0x174   : > { %v770_v35 = vpop.xlane.xlu1 %769  ;;  %v774_v51 = vpop.xlane.xlu0 %773 }
 0x175   : > { %2497 = vrsqrt.f32 %v948_v24  ;;  %v886_v29 = vmul.f32 0.0051020407, %v770_v35  ;;  %v887_v43 = vmul.f32 0.0051020407, %v774_v51 }
 0x176   : > { %2499 = vrsqrt.f32 %v949_v37 }
 0x177   : > { %v950_v48 = vadd.f32 1e-05, %v886_v29  ;;  %v951_v11 = vadd.f32 1e-05, %v887_v43 }
 0x178   : > { %v778_v23 = vpop.xlane.xlu1 %777  ;;  %v782_v31 = vpop.xlane.xlu0 %781 }
 0x179   : > { %2501 = vrsqrt.f32 %v950_v48  ;;  %v888_v46 = vmul.f32 0.0051020407, %v778_v23  ;;  %v889_v28 = vmul.f32 0.0051020407, %v782_v31  ;;  %v5031_v23 = vld [vmem:[#allocation18_spill] sm:$0xff] }
 0x17a   : > { %2503 = vrsqrt.f32 %v951_v11 }
 0x17b   : > { %v2496_v15 = vpop.eup %2495  ;;  %v952_v5 = vadd.f32 1e-05, %v888_v46  ;;  %v953_v10 = vadd.f32 1e-05, %v889_v28 }
 0x17c   : > { %v790_v45 = vpop.xlane.xlu0 %789  ;;  %v1011_v4 = vmul.f32 %v2496_v15, %v5029_v59  ;;  %v786_v24 = vpop.xlane.xlu1 %785 }
 0x17d   : > { %2505 = vrsqrt.f32 %v952_v5  ;;  %v891_v39 = vmul.f32 0.0051020407, %v790_v45  ;;  %v890_v35 = vmul.f32 0.0051020407, %v786_v24  ;;  %v5032_v45 = vld [vmem:[#allocation20_spill] sm:$0xff] }
 0x17e   : > { %1045 = vperm.xlu0 %2485, %v1011_v4   ;;  %2507 = vrsqrt.f32 %v953_v10 }
 0x17f   : > { %v2498_v51 = vpop.eup %2497  ;;  %v955_v29 = vadd.f32 1e-05, %v891_v39  ;;  %v954_v46 = vadd.f32 1e-05, %v890_v35 }
 0x180   : > { %v2500_v43 = vpop.eup %2499  ;;  %v798_v37 = vpop.xlane.xlu0 %797  ;;  %v1012_v48 = vmul.f32 %v2498_v51, %v5030_v12  ;;  %v5034_v12 = vld [vmem:[#allocation22_spill] sm:$0xff] }
 0x181   : > { %2509 = vrsqrt.f32 %v955_v29  ;;  %v1013_v11 = vmul.f32 %v2500_v43, %v5031_v23  ;;  %v794_v29 = vpop.xlane.xlu1 %793 }
 0x182   : > { %1050 = vperm.xlu1 %2486, %v1012_v48   ;;  %2511 = vrsqrt.f32 %v954_v46  ;;  %v892_v48 = vmul.f32 0.0051020407, %v794_v29  ;;  %v5036_v46 = vld [vmem:[#allocation19_spill] sm:$0xff] }
 0x183   : > { %v2502_v31 = vpop.eup %2501 }
 0x184   : > { %v806_v15 = vpop.xlane.xlu0 %805  ;;  %v2504_v28 = vpop.eup %2503  ;;  %v1014_v59 = vmul.f32 %v2502_v31, %v5032_v45 }
 0x185   : > { %v895_v5 = vmul.f32 0.0051020407, %v806_v15  ;;  %v1015_v10 = vmul.f32 %v2504_v28, %v5034_v12  ;;  %v3586_v28 = vld [vmem:[%s3085_s12 + $0xd0] sm:$0xff]  ;;  %v5037_v12 = vmov 1  }
 0x186   : > { %1055 = vperm.xlu1 %2486, %v1013_v11   ;;  %v5035_v11 = vld [vmem:[#allocation26_spill] sm:$0xff] }
 0x187   : > { %v2506_v4 = vpop.eup %2505  ;;  %v959_v39 = vadd.f32 1e-05, %v895_v5  ;;  %v893_v5 = vmul.f32 0.0051020407, %v798_v37  ;;  %v5038_v37 = vld [vmem:[#allocation24_spill] sm:$0xff] }
 0x188   : > { %v814_v24 = vpop.xlane.xlu0 %813  ;;  %v1016_v55 = vmul.f32 %v2506_v4, %v5033_v8  ;;  %v2508_v51 = vpop.eup %2507 }
 0x189   : > { %2513 = vrsqrt.f32 %v959_v39  ;;  %v1017_v15 = vmul.f32 %v2508_v51, %v5036_v46  ;;  %v802_v4 = vpop.xlane.xlu1 %801  ;;  %v957_v39 = vadd.f32 1e-05, %v893_v5  ;;  %v5040_v46 = vmov 0   ;;  %v3596_v5 = vld [vmem:[%s3085_s12 + $0xd8] sm:$0xff] }
 0x18a   : > { %1070 = vperm.xlu0 %2485, %v1016_v55   ;;  %1060 = vperm.xlu1 %2486, %v1014_v59   ;;  %v956_v59 = vadd.f32 1e-05, %v892_v48  ;;  %v894_v29 = vmul.f32 0.0051020407, %v802_v4 }
 0x18b   : > { %v2510_v35 = vpop.eup %2509 }
 0x18c   : > { %v822_v43 = vpop.xlane.xlu0 %821  ;;  %v1019_v31 = vmul.f32 %v2510_v35, %v5035_v11  ;;  %v2512_v55 = vpop.eup %2511 }
 0x18d   : > { %v899_v23 = vmul.f32 0.0051020407, %v822_v43  ;;  %v1018_v51 = vmul.f32 %v2512_v55, %v5038_v37 }
 0x18e   : > { %1065 = vperm.xlu1 %2486, %v1015_v10   ;;  %1085 = vperm.xlu0 %2485, %v1019_v31   ;;  %v810_v31 = vpop.xlane.xlu1 %809 }
 0x18f   : > { %v963_v45 = vadd.f32 1e-05, %v899_v23  ;;  %v5039_v23 = vld [vmem:[#allocation29_spill] sm:$0xff]  ;;  %v896_v30 = vmul.f32 0.0051020407, %v810_v31 }
 0x190   : > { %v3583_v8 = vpop.xlane.xlu0 %829  ;;  %v5041_v31 = vld [vmem:[#allocation21_spill] sm:$0xff] }
 0x191   : > { %2515 = vrsqrt.f32 %v963_v45  ;;  %v958_v45 = vadd.f32 1e-05, %v894_v29 }
 0x192   : > { %1075 = vperm.xlu1 %2486, %v1017_v15   ;;  %2487 = vset.pattern.permute.xlu0 %v5037_v12  ;;  %2517 = vrsqrt.f32 %v956_v59  ;;  %v897_v59 = vmul.f32 0.0051020407, %v814_v24 }
 0x193   : > { %v2514_v35 = vpop.eup %2513  ;;  %1463 = vperm.xlu0 %2487, %v3586_v28   ;;  %2519 = vrsqrt.f32 %v957_v39  ;;  %v3601_v39 = vld [vmem:[%s3085_s12 + $0xe0] sm:$0xff] }
 0x194   : > { %v838_v10 = vpop.xlane.xlu0 %837  ;;  %v1023_v48 = vmul.f32 %v2514_v35, %v5039_v23  ;;  %v960_v35 = vadd.f32 1e-05, %v896_v30  ;;  %v961_v23 = vadd.f32 1e-05, %v897_v59 }
 0x195   : > { %v903_v43 = vmul.f32 0.0051020407, %v838_v10 }
 0x196   : > { %1080 = vperm.xlu1 %2486, %v1018_v51   ;;  %v818_v51 = vpop.xlane.xlu1 %817 }
 0x197   : > { %v967_v11 = vadd.f32 1e-05, %v903_v43  ;;  %2490 = vset.pattern.permute.xlu0 %v5040_v46  ;;  %v898_v24 = vmul.f32 0.0051020407, %v818_v51 }
 0x198   : > { %v3593_v15 = vpop.xlane.xlu0 %845  ;;  %1105 = vperm.xlu0 %2490, %v1023_v48  }
 0x199   : > { %2521 = vrsqrt.f32 %v967_v11 }
 0x19a   : > { %2488 = vset.pattern.permute.xlu1 %v5037_v12  ;;  %2523 = vrsqrt.f32 %v958_v45 }
 0x19b   : > { %1468 = vperm.xlu1 %2488, %v3596_v5   ;;  %v2516_v55 = vpop.eup %2515  ;;  %2525 = vrsqrt.f32 %v960_v35 }
 0x19c   : > { %v854_v4 = vpop.xlane.xlu0 %853  ;;  %v1027_v37 = vmul.f32 %v2516_v55, %v3508_v14  ;;  %v2518_v43 = vpop.eup %2517  ;;  %v5042_v55 = vld [vmem:[#allocation23_spill] sm:$0xff] }
 0x19d   : > { %v907_v10 = vmul.f32 0.0051020407, %v854_v4  ;;  %v2520_v11 = vpop.eup %2519  ;;  %v1020_v27 = vmul.f32 %v2518_v43, %v5041_v31  ;;  %v826_v14 = vpop.xlane.xlu1 %825 }
 0x19e   : > { %1125 = vperm.xlu0 %2490, %v1027_v37   ;;  %v1021_v4 = vmul.f32 %v2520_v11, %v5042_v55  ;;  %v900_v59 = vmul.f32 0.0051020407, %v826_v14 }
 0x19f   : > { %v971_v29 = vadd.f32 1e-05, %v907_v10  ;;  %1473 = vperm.xlu1 %2488, %v3601_v39   ;;  %v962_v10 = vadd.f32 1e-05, %v898_v24 }
 0x1a0   : > { %v3605_v48 = vpop.xlane.xlu0 %861  ;;  %v964_v43 = vadd.f32 1e-05, %v900_v59  ;;  %v5045_v59 = vld [vmem:[#allocation27_spill] sm:$0xff] }
 0x1a1   : > { %2527 = vrsqrt.f32 %v971_v29  ;;  %v901_v29 = vmul.f32 0.0051020407, %v3583_v8  ;;  %v834_v31 = vpop.xlane.xlu1 %833  ;;  %v5044_v8 = vld [vmem:[#allocation25_spill] sm:$0xff] }
 0x1a2   : > { %2529 = vrsqrt.f32 %v961_v23  ;;  %v3613_v23 = vld [vmem:[%s3085_s12 + $0xe8] sm:$0xff] }
 0x1a3   : > { %2489 = vset.pattern.permute.xlu1 %v5040_v46  ;;  %v2522_v30 = vpop.eup %2521  ;;  %2531 = vrsqrt.f32 %v962_v10 }
 0x1a4   : > { %1090 = vperm.xlu1 %2489, %v1020_v27   ;;  %v870_v45 = vpop.xlane.xlu0 %869  ;;  %v1031_v32 = vmul.f32 %v2522_v30, %v3524_v47  ;;  %v2524_v35 = vpop.eup %2523  ;;  %v5043_v27 = vld [vmem:[#allocation28_spill] sm:$0xff]  ;;  %v902_v47 = vmul.f32 0.0051020407, %v834_v31 }
 0x1a5   : > { %v911_v37 = vmul.f32 0.0051020407, %v870_v45  ;;  %v1022_v57 = vmul.f32 %v2524_v35, %v5043_v27  ;;  %v2526_v11 = vpop.eup %2525  ;;  %v842_v55 = vpop.xlane.xlu1 %841 }
 0x1a6   : > { %1145 = vperm.xlu0 %2490, %v1031_v32   ;;  %v965_v32 = vadd.f32 1e-05, %v901_v29  ;;  %v1024_v45 = vmul.f32 %v2526_v11, %v5044_v8  ;;  %v904_v10 = vmul.f32 0.0051020407, %v842_v55 }
 0x1a7   : > { %v975_v51 = vadd.f32 1e-05, %v911_v37 }
 0x1a8   : > { %1095 = vperm.xlu1 %2489, %v1021_v4   ;;  %v966_v4 = vadd.f32 1e-05, %v902_v47 }
 0x1a9   : > { %2533 = vrsqrt.f32 %v975_v51  ;;  %v968_v51 = vadd.f32 1e-05, %v904_v10 }
 0x1aa   : > { %2491 = vset.pattern.permute.xlu0 %v5037_v12  ;;  %2535 = vrsqrt.f32 %v964_v43  ;;  %v850_v43 = vpop.xlane.xlu1 %849 }
 0x1ab   : > { %v2528_v24 = vpop.eup %2527  ;;  %1478 = vperm.xlu0 %2491, %v3613_v23   ;;  %2537 = vrsqrt.f32 %v965_v32  ;;  %v906_v11 = vmul.f32 0.0051020407, %v850_v43 }
 0x1ac   : > { %1100 = vperm.xlu1 %2489, %v1022_v57   ;;  %v1035_v30 = vmul.f32 %v2528_v24, %v3542_v63  ;;  %v2530_v14 = vpop.eup %2529  ;;  %2539 = vrsqrt.f32 %v966_v4  ;;  %v905_v63 = vmul.f32 0.0051020407, %v3593_v15 }
 0x1ad   : > { %v1025_v37 = vmul.f32 %v2530_v14, %v5045_v59  ;;  %v2532_v35 = vpop.eup %2531  ;;  %2541 = vrsqrt.f32 %v968_v51  ;;  %v970_v15 = vadd.f32 1e-05, %v906_v11 }
 0x1ae   : > { %v969_v27 = vadd.f32 1e-05, %v905_v63  ;;  %v858_v47 = vpop.xlane.xlu1 %857 }
 0x1af   : > { %2492 = vset.pattern.permute.xlu0 %v5040_v46  ;;  %v1026_v46 = vmul.f32 %v2532_v35, %v3500_v36  ;;  %v908_v14 = vmul.f32 0.0051020407, %v858_v47 }
 0x1b0   : > { %1110 = vperm.xlu1 %2489, %v1024_v45   ;;  %1165 = vperm.xlu0 %2492, %v1035_v30   ;;  %v945_v30 = vld [vmem:[%s3085_s12 + $0xf0] sm:$0xff]  ;;  %2543 = vrsqrt.f32 %v969_v27  ;;  %v909_v45 = vmul.f32 0.0051020407, %v3605_v48  ;;  %v878_v48 = vpop.xlane.xlu0 %877 }
 0x1b1   : > { %2545 = vrsqrt.f32 %v970_v15  ;;  %v972_v8 = vadd.f32 1e-05, %v908_v14 }
 0x1b2   : > { %v866_v55 = vpop.xlane.xlu1 %865  ;;  %v973_v10 = vadd.f32 1e-05, %v909_v45 }
 0x1b3   : > { %v2534_v57 = vpop.eup %2533  ;;  %2547 = vrsqrt.f32 %v972_v8  ;;  %v910_v59 = vmul.f32 0.0051020407, %v866_v55 }
 0x1b4   : > { %1115 = vperm.xlu1 %2489, %v1025_v37   ;;  %v1039_v29 = vmul.f32 %v2534_v57, %v3601_v39  ;;  %v2536_v31 = vpop.eup %2535  ;;  %2549 = vrsqrt.f32 %v973_v10 }
 0x1b5   : > { %v1028_v24 = vmul.f32 %v2536_v31, %v3503_v53  ;;  %v2538_v32 = vpop.eup %2537 }
 0x1b6   : > { %1185 = vperm.xlu0 %2492, %v1039_v29   ;;  %v1029_v36 = vmul.f32 %v2538_v32, %v3511_v40  ;;  %v2540_v39 = vpop.eup %2539  ;;  %v874_v57 = vpop.xlane.xlu1 %873  ;;  %v974_v40 = vadd.f32 1e-05, %v910_v59  ;;  %v913_v29 = vmul.f32 0.0051020407, %v878_v48  ;;  %v5046_v48 = vld [vmem:[#allocation32_spill] sm:$0xff] }
 0x1b7   : > { %v1030_v53 = vmul.f32 %v2540_v39, %v3516_v2  ;;  %v2542_v4 = vpop.eup %2541  ;;  %v912_v51 = vmul.f32 0.0051020407, %v874_v57  ;;  %v1716_v57 = vld [vmem:[%s3668_s23 + $0x108] sm:$0xff] }
 0x1b8   : > { %1120 = vperm.xlu1 %2489, %v1026_v46   ;;  %v1032_v37 = vmul.f32 %v2542_v4, %v3519_v20  ;;  %2551 = vrsqrt.f32 %v974_v40  ;;  %v977_v11 = vadd.f32 1e-05, %v913_v29  ;;  %1907 = vmatprep.mubr.f32.mxu1 %v1716_v57  ;;  %v1267_v40 = vld [vmem:[%s3664_s21] sm:$0xff]  ;;  %v5047_v29 = vld [vmem:[#allocation33_spill] sm:$0xff] }
 0x1b9   : > { %v976_v2 = vadd.f32 1e-05, %v912_v51  ;;  %v1268_v51 = vld [vmem:[%s3664_s21 + $0x8] sm:$0xff]  ;;  %v1273_v57 = vld [vmem:[%s3664_s21 + $0x30] sm:$0xff] }
 0x1ba   : > { %2493 = vset.pattern.permute.xlu0 %v5037_v12  ;;  %v2544_v35 = vpop.eup %2543  ;;  %v882_v27 = vpop.xlane.xlu1 %881 }
 0x1bb   : > { %1483 = vperm.xlu0 %2493, %v945_v30   ;;  %v1033_v63 = vmul.f32 %v2544_v35, %v3527_v60  ;;  %v2546_v43 = vpop.eup %2545  ;;  %2553 = vrsqrt.f32 %v976_v2  ;;  %v914_v20 = vmul.f32 0.0051020407, %v882_v27  ;;  %v1684_v35 = vld [vmem:[%s3668_s23 + $0x8] sm:$0xff]  ;;  %v1492_v27 = vadd.f32 %v3529_v62, %v1268_v51 }
 0x1bc   : > { %1130 = vperm.xlu1 %2489, %v1028_v24   ;;  %v1034_v46 = vmul.f32 %v2546_v43, %v3534_v61  ;;  %2555 = vrsqrt.f32 %v977_v11  ;;  %1811 = vmatprep.mubr.f32.mxu0 %v1684_v35  ;;  %v1270_v11 = vld [vmem:[%s3664_s21 + $0x18] sm:$0xff] }
 0x1bd   : > { %v2548_v31 = vpop.eup %2547  ;;  %v978_v47 = vadd.f32 1e-05, %v914_v20  ;;  %v1269_v20 = vld [vmem:[%s3664_s21 + $0x10] sm:$0xff] }
 0x1be   : > { %v1036_v24 = vmul.f32 %v2548_v31, %v3537_v18  ;;  %v2550_v32 = vpop.eup %2549  ;;  %v3638_v8 = vpop.permute.xlu1 %1408  ;;  %v1491_v31 = vadd.f32 %v3529_v62, %v1267_v40  ;;  %v5049_v40 = vld [vmem:[#allocation30_spill] sm:$0xff] }
 0x1bf   : > { %v1037_v60 = vmul.f32 %v2550_v32, %v3586_v28  ;;  %2557 = vrsqrt.f32 %v978_v47  ;;  %v3640_v18 = vpop.permute.xlu0 %1418  ;;  %v946_v28 = vld [vmem:[%s3085_s12 + $0xf8] sm:$0xff] }
 0x1c0   : > { %1135 = vperm.xlu1 %2489, %v1029_v36  }
 0x1c2   : > { %v2552_v15 = vpop.eup %2551 }
 0x1c3   : > { %v1038_v61 = vmul.f32 %v2552_v15, %v3596_v5  ;;  %v3645_v5 = vpop.permute.xlu0 %1423  ;;  %v1494_v15 = vadd.f32 %v3544_v38, %v1270_v11  ;;  %v1278_v11 = vld [vmem:[%s3664_s21 + $0x58] sm:$0xff] }
 0x1c4   : > { %1140 = vperm.xlu1 %2489, %v1030_v53   ;;  %v3643_v53 = vpop.permute.xlu1 %1413 }
 0x1c5   : > { %v2554_v14 = vpop.eup %2553 }
 0x1c6   : > { %v1040_v36 = vmul.f32 %v2554_v14, %v3613_v23  ;;  %v2556_v39 = vpop.eup %2555  ;;  %v5048_v14 = vld [vmem:[#allocation36_spill] sm:$0xff] }
 0x1c7   : > { %v1041_v45 = vmul.f32 %v2556_v39, %v945_v30  ;;  %v3650_v23 = vpop.permute.xlu0 %1438  ;;  %v1271_v39 = vld [vmem:[%s3664_s21 + $0x20] sm:$0xff] }
 0x1c8   : > { %1150 = vperm.xlu1 %2489, %v1032_v37   ;;  %v3647_v10 = vpop.permute.xlu1 %1428 }
 0x1c9   : > { %v2558_v55 = vpop.eup %2557 }
 0x1ca   : > { %v1042_v4 = vmul.f32 %v2558_v55, %v946_v28 }
 0x1cb   : > { %v3654_v30 = vpop.permute.xlu0 %1443 }
 0x1cc   : > { %1155 = vperm.xlu1 %2489, %v1033_v63   ;;  %v3652_v59 = vpop.permute.xlu1 %1433 }
 0x1d0   : > { %1160 = vperm.xlu1 %2489, %v1034_v46   ;;  %v3657_v37 = vpop.permute.xlu1 %1448 }
 0x1d4   : > { %1170 = vperm.xlu1 %2489, %v1036_v24   ;;  %v3674_v63 = vpop.permute.xlu1 %1453 }
 0x1d8   : > { %1175 = vperm.xlu1 %2489, %v1037_v60   ;;  %v1493_v60 = vadd.f32 %v3544_v38, %v1269_v20  ;;  %v1277_v20 = vld [vmem:[%s3664_s21 + $0x50] sm:$0xff] }
 0x1dc   : > { %1180 = vperm.xlu1 %2489, %v1038_v61  }
 0x1e0   : > { %1190 = vperm.xlu1 %2489, %v1040_v36  }
 0x1e4   : > { %1195 = vperm.xlu1 %2489, %v1041_v45   ;;  %v1272_v45 = vld [vmem:[%s3664_s21 + $0x28] sm:$0xff] }
 0x1e8   : > { %1200 = vperm.xlu1 %2489, %v1042_v4  }
 0x1ec   : > { %2494 = vset.pattern.permute.xlu1 %v5037_v12  ;;  %v3666_v12 = vpop.permute.xlu0 %1458 }
 0x1ed   : > { %1488 = vperm.xlu1 %2494, %v946_v28  }
 0x1fd   : > { %v1046_v43 = vpop.permute.xlu0 %1045 }
 0x1fe   : > { %v1203_v2 = vmul.f32 %v1046_v43, %v5046_v48  ;;  %v1204_v46 = vmul.f32 %v1046_v43, %v5047_v29  ;;  %v5050_v43 = vld [vmem:[#allocation31_spill] sm:$0xff]  ;;  %v1496_v29 = vadd.f32 %v3548_v50, %v1272_v45 }
 0x200   : > { %v1555_v24 = vadd.f32 %v1491_v31, %v1203_v2  ;;  %v1556_v32 = vadd.f32 %v1492_v27, %v1204_v46  ;;  %v1495_v2 = vadd.f32 %v3548_v50, %v1271_v39  ;;  %v1274_v46 = vld [vmem:[%s3664_s21 + $0x38] sm:$0xff]  ;;  %v5052_v39 = vld [vmem:[#allocation35_spill] sm:$0xff] }
 0x201   : > { %v1051_v47 = vpop.permute.xlu1 %1050 }
 0x202   : > { %v1205_v61 = vmul.f32 %v1051_v47, %v3174_v13  ;;  %v1206_v36 = vmul.f32 %v1051_v47, %v5048_v14  ;;  %v1620_v4 = vmax.f32 %v1556_v32, 0.0  ;;  %v1619_v35 = vmax.f32 %v1555_v24, 0.0  ;;  %v1275_v14 = vld [vmem:[%s3664_s21 + $0x40] sm:$0xff] }
 0x203   : > { %v1497_v24 = vadd.f32 %v3553_v33, %v1273_v57 }
 0x204   : > { %v1557_v55 = vadd.f32 %v1493_v60, %v1205_v61  ;;  %v1558_v62 = vadd.f32 %v1494_v15, %v1206_v36  ;;  %v1498_v61 = vadd.f32 %v3553_v33, %v1274_v46  ;;  %v1276_v36 = vld [vmem:[%s3664_s21 + $0x48] sm:$0xff] }
 0x205   : > { %v1056_v28 = vpop.permute.xlu1 %1055 }
 0x206   : > { %v1207_v51 = vmul.f32 %v1056_v28, %v5049_v40  ;;  %v1208_v48 = vmul.f32 %v1056_v28, %v5050_v43  ;;  %v1622_v38 = vmax.f32 %v1558_v62, 0.0  ;;  %v1621_v13 = vmax.f32 %v1557_v55, 0.0  ;;  %v5051_v55 = vld [vmem:[#allocation34_spill] sm:$0xff] }
 0x207   : > { %v1499_v40 = vadd.f32 %v3557_v25, %v1275_v14 }
 0x208   : > { %v2361_v31 = vpack.c.bf16 %v1622_v38, %v1620_v4  ;;  %v2363_v27 = vpack.c.bf16 %v1621_v13, %v1619_v35  ;;  %v1559_v32 = vadd.f32 %v1495_v2, %v1207_v51  ;;  %v1560_v47 = vadd.f32 %v1496_v29, %v1208_v48 }
 0x209   : > { %v1061_v60 = vpop.permute.xlu1 %1060  ;;  %v1071_v15 = vpop.permute.xlu0 %1070  ;;  %v1501_v4 = vadd.f32 %v3551_v26, %v1277_v20  ;;  %v1502_v35 = vadd.f32 %v3551_v26, %v1278_v11  ;;  %v1500_v51 = vadd.f32 %v3557_v25, %v1276_v36  ;;  %v1279_v11 = vld [vmem:[%s3664_s21 + $0x60] sm:$0xff] }
 0x20a   : > { %v1209_v62 = vmul.f32 %v1061_v60, %v5051_v55  ;;  %v1210_v28 = vmul.f32 %v1061_v60, %v5052_v39  ;;  %2362 = vmatprep.subr.bf16.mxu0 %v2361_v31  ;;  %2425 = vmatprep.subr.bf16.mxu1 %v2361_v31  ;;  %v1213_v50 = vmul.f32 %v1071_v15, %v3190_v0  ;;  %v1623_v43 = vmax.f32 %v1559_v32, 0.0  ;;  %v1281_v32 = vld [vmem:[%s3664_s21 + $0x70] sm:$0xff]  ;;  %v1282_v60 = vld [vmem:[%s3664_s21 + $0x78] sm:$0xff] }
 0x20b   : > { %v1214_v45 = vmul.f32 %v1071_v15, %v3193_v22  ;;  %2364 = vmatpush1.bf16.msra.mxu0 %v2363_v27  ;;  %2441 = vmatpush1.bf16.msra.mxu1 %v2363_v27  ;;  %v1624_v48 = vmax.f32 %v1560_v47, 0.0  ;;  %v1503_v36 = vadd.f32 %v3555_v34, %v1279_v11  ;;  %v1506_v39 = vadd.f32 %v3561_v42, %v1282_v60 }
 0x20c   : > { %v1561_v57 = vadd.f32 %v1497_v24, %v1209_v62  ;;  %v1562_v33 = vadd.f32 %v1498_v61, %v1210_v28  ;;  %v1565_v26 = vadd.f32 %v1501_v4, %v1213_v50  ;;  %v1280_v24 = vld [vmem:[%s3664_s21 + $0x68] sm:$0xff]  ;;  %v1505_v62 = vadd.f32 %v3561_v42, %v1281_v32 }
 0x20d   : > { %v1066_v0 = vpop.permute.xlu1 %1065  ;;  %v1566_v29 = vadd.f32 %v1502_v35, %v1214_v45  ;;  %v1504_v55 = vadd.f32 %v3555_v34, %v1280_v24  ;;  %v5053_v35 = vld [vmem:[#allocation37_spill] sm:$0xff] }
 0x20e   : > { %v1625_v22 = vmax.f32 %v1561_v57, 0.0  ;;  %v1626_v38 = vmax.f32 %v1562_v33, 0.0  ;;  %v1211_v13 = vmul.f32 %v1066_v0, %v3197_v44  ;;  %v1212_v2 = vmul.f32 %v1066_v0, %v3200_v54  ;;  %v1086_v0 = vpop.permute.xlu0 %1085 }
 0x20f   : > { %v1629_v44 = vmax.f32 %v1565_v26, 0.0  ;;  %v1630_v54 = vmax.f32 %v1566_v29, 0.0  ;;  %v1219_v26 = vmul.f32 %v1086_v0, %v3241_v49  ;;  %v1220_v29 = vmul.f32 %v1086_v0, %v3244_v21 }
 0x210   : > { %v1563_v46 = vadd.f32 %v1499_v40, %v1211_v13  ;;  %v1564_v31 = vadd.f32 %v1500_v51, %v1212_v2  ;;  %v2365_v27 = vpack.c.bf16 %v1626_v38, %v1624_v48  ;;  %v2367_v20 = vpack.c.bf16 %v1625_v22, %v1623_v43  ;;  %v1283_v38 = vld [vmem:[%s3664_s21 + $0x80] sm:$0xff]  ;;  %v1284_v13 = vld [vmem:[%s3664_s21 + $0x88] sm:$0xff] }
 0x211   : > { %v1076_v25 = vpop.permute.xlu1 %1075 }
 0x212   : > { %v1627_v47 = vmax.f32 %v1563_v46, 0.0  ;;  %v1628_v15 = vmax.f32 %v1564_v31, 0.0  ;;  %v1215_v61 = vmul.f32 %v1076_v25, %v3218_v3  ;;  %v1216_v14 = vmul.f32 %v1076_v25, %v3221_v9  ;;  %2366 = vmatprep.subr.bf16.mxu0 %v2365_v27  ;;  %2426 = vmatprep.subr.bf16.mxu1 %v2365_v27  ;;  %v1285_v46 = vld [vmem:[%s3664_s21 + $0x90] sm:$0xff]  ;;  %v1286_v31 = vld [vmem:[%s3664_s21 + $0x98] sm:$0xff]  ;;  %v3734_v11 = vpop.permute.xlu0 %1463 }
 0x213   : > { %2368 = vmatpush1.bf16.msra.mxu0 %v2367_v20  ;;  %2442 = vmatpush1.bf16.msra.mxu1 %v2367_v20  ;;  %v1507_v27 = vadd.f32 %v3565_v58, %v1283_v38  ;;  %v1508_v20 = vadd.f32 %v3565_v58, %v1284_v13  ;;  %v1509_v49 = vadd.f32 %v3559_v56, %v1285_v46  ;;  %v5057_v13 = vld [vmem:[#allocation69_spill] sm:$0xff] }
 0x214   : > { %v2369_v50 = vpack.c.bf16 %v1630_v54, %v1628_v15  ;;  %v2371_v45 = vpack.c.bf16 %v1629_v44, %v1627_v47  ;;  %v1567_v3 = vadd.f32 %v1503_v36, %v1215_v61  ;;  %v1568_v4 = vadd.f32 %v1504_v55, %v1216_v14  ;;  %v1287_v15 = vld [vmem:[%s3664_s21 + $0xa0] sm:$0xff]  ;;  %v1288_v61 = vld [vmem:[%s3664_s21 + $0xa8] sm:$0xff]  ;;  %v1289_v44 = vld [vmem:[%s3664_s21 + $0xb0] sm:$0xff] }
 0x215   : > { %v1081_v28 = vpop.permute.xlu1 %1080  ;;  %v1571_v24 = vadd.f32 %v1507_v27, %v1219_v26  ;;  %v1572_v25 = vadd.f32 %v1508_v20, %v1220_v29  ;;  %v1510_v60 = vadd.f32 %v3559_v56, %v1286_v31 }
 0x216   : > { %v1217_v9 = vmul.f32 %v1081_v28, %v3210_v16  ;;  %v1218_v57 = vmul.f32 %v1081_v28, %v5053_v35  ;;  %2370 = vmatprep.subr.bf16.mxu0 %v2369_v50  ;;  %2427 = vmatprep.subr.bf16.mxu1 %v2369_v50  ;;  %v1631_v34 = vmax.f32 %v1567_v3, 0.0  ;;  %v1632_v51 = vmax.f32 %v1568_v4, 0.0  ;;  %v1291_v4 = vld [vmem:[%s3664_s21 + $0xc0] sm:$0xff] }
 0x217   : > { %2372 = vmatpush1.bf16.msra.mxu0 %v2371_v45  ;;  %2443 = vmatpush1.bf16.msra.mxu1 %v2371_v45  ;;  %v1635_v54 = vmax.f32 %v1571_v24, 0.0  ;;  %v1636_v36 = vmax.f32 %v1572_v25, 0.0  ;;  %v1511_v28 = vadd.f32 %v3563_v52, %v1287_v15  ;;  %v1512_v50 = vadd.f32 %v3563_v52, %v1288_v61  ;;  %v1290_v45 = vld [vmem:[%s3664_s21 + $0xb8] sm:$0xff]  ;;  %v5060_v61 = vld [vmem:[#allocation41_spill] sm:$0xff] }
 0x218   : > { %v1569_v33 = vadd.f32 %v1505_v62, %v1217_v9  ;;  %v1570_v40 = vadd.f32 %v1506_v39, %v1218_v57  ;;  %v1106_v62 = vpop.permute.xlu0 %1105  ;;  %v1513_v3 = vadd.f32 %v3569_v7, %v1289_v44  ;;  %v1292_v9 = vld [vmem:[%s3664_s21 + $0xc8] sm:$0xff]  ;;  %v1514_v0 = vadd.f32 %v3569_v7, %v1290_v45 }
 0x219   : > { %v1515_v26 = vadd.f32 %v5057_v13, %v1291_v4  ;;  %v1516_v29 = vadd.f32 %v5057_v13, %v1292_v9  ;;  %v5061_v4 = vld [vmem:[#allocation45_spill] sm:$0xff] }
 0x21a   : > { %v1633_v42 = vmax.f32 %v1569_v33, 0.0  ;;  %v1634_v43 = vmax.f32 %v1570_v40, 0.0  ;;  %v3722_v48 = vpop.permute.xlu1 %1468  ;;  %v1293_v33 = vld [vmem:[%s3664_s21 + $0xd0] sm:$0xff]  ;;  %v1294_v40 = vld [vmem:[%s3664_s21 + $0xd8] sm:$0xff] }
 0x21c   : > { %v2373_v16 = vpack.c.bf16 %v1634_v43, %v1632_v51  ;;  %v2375_v22 = vpack.c.bf16 %v1633_v42, %v1631_v34  ;;  %v1227_v34 = vmul.f32 %v1106_v62, %v3285_v17  ;;  %v5054_v51 = vld [vmem:[#allocation42_spill] sm:$0xff]  ;;  %v5058_v17 = vld [vmem:[#allocation67_spill] sm:$0xff] }
 0x21d   : > { %v1228_v42 = vmul.f32 %v1106_v62, %v5054_v51  ;;  %v1517_v46 = vadd.f32 %v5058_v17, %v1293_v33  ;;  %v1518_v31 = vadd.f32 %v5058_v17, %v1294_v40  ;;  %v5063_v40 = vld [vmem:[#allocation68_spill] sm:$0xff] }
 0x21e   : > { %v3726_v2 = vpop.permute.xlu1 %1473  ;;  %2374 = vmatprep.subr.bf16.mxu0 %v2373_v16  ;;  %2428 = vmatprep.subr.bf16.mxu1 %v2373_v16  ;;  %v5055_v16 = vld [vmem:[#allocation38_spill] sm:$0xff]  ;;  %v1579_v7 = vadd.f32 %v1515_v26, %v1227_v34  ;;  %v5065_v26 = vld [vmem:[#allocation49_spill] sm:$0xff] }
 0x21f   : > { %2376 = vmatpush1.bf16.msra.mxu0 %v2375_v22  ;;  %2444 = vmatpush1.bf16.msra.mxu1 %v2375_v22  ;;  %v5056_v22 = vld [vmem:[#allocation39_spill] sm:$0xff]  ;;  %v1580_v24 = vadd.f32 %v1516_v29, %v1228_v42 }
 0x220   : > { %v1643_v62 = vmax.f32 %v1579_v7, 0.0  ;;  %v5067_v7 = vld [vmem:[#allocation44_spill] sm:$0xff] }
 0x223   : > { %v1091_v32 = vpop.permute.xlu1 %1090 }
 0x224   : > { %v1221_v21 = vmul.f32 %v1091_v32, %v3234_v6  ;;  %v1222_v47 = vmul.f32 %v1091_v32, %v3237_v19 }
 0x226   : > { %v1573_v14 = vadd.f32 %v1509_v49, %v1221_v21  ;;  %v1574_v58 = vadd.f32 %v1510_v60, %v1222_v47  ;;  %v5059_v47 = vld [vmem:[#allocation40_spill] sm:$0xff] }
 0x227   : > { %v1096_v55 = vpop.permute.xlu1 %1095 }
 0x228   : > { %v1637_v39 = vmax.f32 %v1573_v14, 0.0  ;;  %v1638_v56 = vmax.f32 %v1574_v58, 0.0  ;;  %v1223_v6 = vmul.f32 %v1096_v55, %v3262_v41  ;;  %v1224_v19 = vmul.f32 %v1096_v55, %v3265_v1  ;;  %v1295_v55 = vld [vmem:[%s3664_s21 + $0xe0] sm:$0xff] }
 0x229   : > { %v1519_v34 = vadd.f32 %v5063_v40, %v1295_v55 }
 0x22a   : > { %v2377_v35 = vpack.c.bf16 %v1638_v56, %v1636_v36  ;;  %v2379_v57 = vpack.c.bf16 %v1637_v39, %v1635_v54  ;;  %v1575_v41 = vadd.f32 %v1511_v28, %v1223_v6  ;;  %v1576_v43 = vadd.f32 %v1512_v50, %v1224_v19  ;;  %v1296_v56 = vld [vmem:[%s3664_s21 + $0xe8] sm:$0xff]  ;;  %v1297_v6 = vld [vmem:[%s3664_s21 + $0xf0] sm:$0xff]  ;;  %v1298_v19 = vld [vmem:[%s3664_s21 + $0xf8] sm:$0xff]  ;;  %v1126_v50 = vpop.permute.xlu0 %1125 }
 0x22b   : > { %v1101_v1 = vpop.permute.xlu1 %1100  ;;  %v1644_v28 = vmax.f32 %v1580_v24, 0.0  ;;  %v1235_v29 = vmul.f32 %v1126_v50, %v5065_v26  ;;  %v5073_v26 = vld [vmem:[#allocation58_spill] sm:$0xff] }
 0x22c   : > { %v1225_v52 = vmul.f32 %v1101_v1, %v5055_v16  ;;  %v1226_v38 = vmul.f32 %v1101_v1, %v5056_v22  ;;  %2378 = vmatprep.subr.bf16.mxu0 %v2377_v35  ;;  %2429 = vmatprep.subr.bf16.mxu1 %v2377_v35  ;;  %v1639_v25 = vmax.f32 %v1575_v41, 0.0  ;;  %v1640_v32 = vmax.f32 %v1576_v43, 0.0  ;;  %v1300_v35 = vld [vmem:[%s3664_s21 + $0x108] sm:$0xff]  ;;  %v5064_v16 = vld [vmem:[#allocation50_spill] sm:$0xff] }
 0x22d   : > { %2380 = vmatpush1.bf16.msra.mxu0 %v2379_v57  ;;  %2445 = vmatpush1.bf16.msra.mxu1 %v2379_v57  ;;  %v5062_v57 = vld [vmem:[#allocation46_spill] sm:$0xff]  ;;  %v1520_v41 = vadd.f32 %v5063_v40, %v1296_v56  ;;  %v1521_v43 = vadd.f32 %v3638_v8, %v1297_v6  ;;  %v1522_v1 = vadd.f32 %v3638_v8, %v1298_v19  ;;  %v1305_v19 = vld [vmem:[%s3664_s21 + $0x130] sm:$0xff] }
 0x22e   : > { %v1577_v27 = vadd.f32 %v1513_v3, %v1225_v52  ;;  %v1578_v20 = vadd.f32 %v1514_v0, %v1226_v38  ;;  %v1299_v0 = vld [vmem:[%s3664_s21 + $0x100] sm:$0xff]  ;;  %v1236_v52 = vmul.f32 %v1126_v50, %v5064_v16  ;;  %v1301_v38 = vld [vmem:[%s3664_s21 + $0x110] sm:$0xff]  ;;  %v1524_v13 = vadd.f32 %v3643_v53, %v1300_v35  ;;  %v1146_v50 = vpop.permute.xlu0 %1145  ;;  %v1308_v16 = vld [vmem:[%s3664_s21 + $0x148] sm:$0xff] }
 0x22f   : > { %v1111_v49 = vpop.permute.xlu1 %1110  ;;  %v1523_v8 = vadd.f32 %v3643_v53, %v1299_v0  ;;  %v1304_v53 = vld [vmem:[%s3664_s21 + $0x128] sm:$0xff]  ;;  %v5070_v35 = vld [vmem:[#allocation53_spill] sm:$0xff]  ;;  %v1307_v0 = vld [vmem:[%s3664_s21 + $0x140] sm:$0xff] }
 0x230   : > { %v1641_v60 = vmax.f32 %v1577_v27, 0.0  ;;  %v1642_v21 = vmax.f32 %v1578_v20, 0.0  ;;  %v1229_v15 = vmul.f32 %v1111_v49, %v5059_v47  ;;  %v1230_v14 = vmul.f32 %v1111_v49, %v5060_v61  ;;  %v5066_v27 = vld [vmem:[#allocation43_spill] sm:$0xff] }
 0x231   : > { %v5068_v61 = vld [vmem:[#allocation47_spill] sm:$0xff] }
 0x232   : > { %v1581_v58 = vadd.f32 %v1517_v46, %v1229_v15  ;;  %v1582_v44 = vadd.f32 %v1518_v31, %v1230_v14  ;;  %v2381_v54 = vpack.c.bf16 %v1642_v21, %v1640_v32  ;;  %v2383_v36 = vpack.c.bf16 %v1641_v60, %v1639_v25  ;;  %v1302_v46 = vld [vmem:[%s3664_s21 + $0x118] sm:$0xff] }
 0x233   : > { %v1116_v39 = vpop.permute.xlu1 %1115  ;;  %v1525_v25 = vadd.f32 %v3640_v18, %v1301_v38  ;;  %v1588_v32 = vadd.f32 %v1524_v13, %v1236_v52  ;;  %v1526_v47 = vadd.f32 %v3640_v18, %v1302_v46  ;;  %v1587_v15 = vadd.f32 %v1523_v8, %v1235_v29  ;;  %v5072_v52 = vld [vmem:[#allocation57_spill] sm:$0xff]  ;;  %v1310_v13 = vld [vmem:[%s3664_s21 + $0x158] sm:$0xff] }
 0x234   : > { %v1645_v45 = vmax.f32 %v1581_v58, 0.0  ;;  %v1646_v3 = vmax.f32 %v1582_v44, 0.0  ;;  %v1231_v9 = vmul.f32 %v1116_v39, %v5061_v4  ;;  %2382 = vmatprep.subr.bf16.mxu0 %v2381_v54  ;;  %2430 = vmatprep.subr.bf16.mxu1 %v2381_v54  ;;  %v1232_v33 = vmul.f32 %v1116_v39, %v5062_v57  ;;  %v5069_v58 = vld [vmem:[#allocation48_spill] sm:$0xff]  ;;  %v1303_v39 = vld [vmem:[%s3664_s21 + $0x120] sm:$0xff] }
 0x235   : > { %2384 = vmatpush1.bf16.msra.mxu0 %v2383_v36  ;;  %2446 = vmatpush1.bf16.msra.mxu1 %v2383_v36  ;;  %v1244_v29 = vmul.f32 %v1146_v50, %v5073_v26 }
 0x236   : > { %v2385_v51 = vpack.c.bf16 %v1646_v3, %v1644_v28  ;;  %v2387_v42 = vpack.c.bf16 %v1645_v45, %v1643_v62  ;;  %v1583_v17 = vadd.f32 %v1519_v34, %v1231_v9  ;;  %v1584_v31 = vadd.f32 %v1520_v41, %v1232_v33  ;;  %v5071_v33 = vld [vmem:[#allocation54_spill] sm:$0xff] }
 0x237   : > { %v1121_v22 = vpop.permute.xlu1 %1120  ;;  %v1652_v28 = vmax.f32 %v1588_v32, 0.0  ;;  %v1527_v34 = vadd.f32 %v3645_v5, %v1303_v39  ;;  %v1651_v41 = vmax.f32 %v1587_v15, 0.0  ;;  %v1531_v32 = vadd.f32 %v3652_v59, %v1307_v0  ;;  %v1316_v0 = vld [vmem:[%s3664_s21 + $0x188] sm:$0xff] }
 0x238   : > { %2386 = vmatprep.subr.bf16.mxu0 %v2385_v51  ;;  %2431 = vmatprep.subr.bf16.mxu1 %v2385_v51  ;;  %v1233_v20 = vmul.f32 %v1121_v22, %v5066_v27  ;;  %v1234_v24 = vmul.f32 %v1121_v22, %v5067_v7  ;;  %v1647_v54 = vmax.f32 %v1583_v17, 0.0  ;;  %v1648_v36 = vmax.f32 %v1584_v31, 0.0 }
 0x239   : > { %2388 = vmatpush1.bf16.msra.mxu0 %v2387_v42  ;;  %2447 = vmatpush1.bf16.msra.mxu1 %v2387_v42  ;;  %v1528_v51 = vadd.f32 %v3645_v5, %v1304_v53  ;;  %v1306_v42 = vld [vmem:[%s3664_s21 + $0x138] sm:$0xff]  ;;  %v1243_v22 = vmul.f32 %v1146_v50, %v5072_v52  ;;  %v1312_v53 = vld [vmem:[%s3664_s21 + $0x168] sm:$0xff]  ;;  %v1313_v50 = vld [vmem:[%s3664_s21 + $0x170] sm:$0xff] }
 0x23a   : > { %v1585_v49 = vadd.f32 %v1521_v43, %v1233_v20  ;;  %v1586_v60 = vadd.f32 %v1522_v1, %v1234_v24  ;;  %v1529_v43 = vadd.f32 %v3647_v10, %v1305_v19  ;;  %v1309_v1 = vld [vmem:[%s3664_s21 + $0x150] sm:$0xff]  ;;  %v1530_v27 = vadd.f32 %v3647_v10, %v1306_v42  ;;  %v5074_v20 = vld [vmem:[#allocation51_spill] sm:$0xff]  ;;  %v5075_v24 = vld [vmem:[#allocation52_spill] sm:$0xff] }
 0x23b   : > { %v1131_v21 = vpop.permute.xlu1 %1130  ;;  %v1595_v15 = vadd.f32 %v1531_v32, %v1243_v22  ;;  %v1536_v42 = vadd.f32 %v3654_v30, %v1312_v53  ;;  %v1317_v22 = vld [vmem:[%s3664_s21 + $0x190] sm:$0xff] }
 0x23c   : > { %v1237_v14 = vmul.f32 %v1131_v21, %v5068_v61  ;;  %v1238_v44 = vmul.f32 %v1131_v21, %v5069_v58  ;;  %v1649_v55 = vmax.f32 %v1585_v49, 0.0  ;;  %v1650_v62 = vmax.f32 %v1586_v60, 0.0  ;;  %v3810_v21 = vpop.permute.xlu0 %1478 }
 0x23d   : > { %v1532_v49 = vadd.f32 %v3652_v59, %v1308_v16  ;;  %v1534_v60 = vadd.f32 %v3650_v23, %v1310_v13  ;;  %v5080_v13 = vld [vmem:[#allocation5_spill] sm:$0xff]  ;;  %v1541_v32 = vadd.f32 %v3666_v12, %v1317_v22  ;;  %v5089_v22 = vld [vmem:[#allocation11_spill] sm:$0xff] }
 0x23e   : > { %v1589_v56 = vadd.f32 %v1525_v25, %v1237_v14  ;;  %v1590_v6 = vadd.f32 %v1526_v47, %v1238_v44  ;;  %v2389_v45 = vpack.c.bf16 %v1650_v62, %v1648_v36  ;;  %v2391_v3 = vpack.c.bf16 %v1649_v55, %v1647_v54  ;;  %v5076_v55 = vld [vmem:[#allocation55_spill] sm:$0xff]  ;;  %v5077_v62 = vld [vmem:[#allocation56_spill] sm:$0xff] }
 0x23f   : > { %v1136_v18 = vpop.permute.xlu1 %1135  ;;  %v1533_v25 = vadd.f32 %v3650_v23, %v1309_v1  ;;  %v1596_v61 = vadd.f32 %v1532_v49, %v1244_v29  ;;  %v1311_v23 = vld [vmem:[%s3664_s21 + $0x160] sm:$0xff]  ;;  %v5081_v29 = vld [vmem:[#allocation4_spill] sm:$0xff] }
 0x240   : > { %v1653_v4 = vmax.f32 %v1589_v56, 0.0  ;;  %v1654_v9 = vmax.f32 %v1590_v6, 0.0  ;;  %v1239_v57 = vmul.f32 %v1136_v18, %v5070_v35  ;;  %v1240_v40 = vmul.f32 %v1136_v18, %v5071_v33  ;;  %2390 = vmatprep.subr.bf16.mxu0 %v2389_v45  ;;  %2432 = vmatprep.subr.bf16.mxu1 %v2389_v45  ;;  %v1315_v1 = vld [vmem:[%s3664_s21 + $0x180] sm:$0xff] }
 0x241   : > { %2392 = vmatpush1.bf16.msra.mxu0 %v2391_v3  ;;  %2448 = vmatpush1.bf16.msra.mxu1 %v2391_v3  ;;  %v1659_v18 = vmax.f32 %v1595_v15, 0.0  ;;  %v1660_v45 = vmax.f32 %v1596_v61, 0.0 }
 0x242   : > { %v2393_v38 = vpack.c.bf16 %v1654_v9, %v1652_v28  ;;  %v1591_v17 = vadd.f32 %v1527_v34, %v1239_v57  ;;  %v1592_v46 = vadd.f32 %v1528_v51, %v1240_v40  ;;  %v2395_v31 = vpack.c.bf16 %v1653_v4, %v1651_v41  ;;  %v1166_v4 = vpop.permute.xlu0 %1165  ;;  %v5078_v57 = vld [vmem:[#allocation61_spill] sm:$0xff]  ;;  %v5079_v40 = vld [vmem:[#allocation62_spill] sm:$0xff] }
 0x243   : > { %v1141_v5 = vpop.permute.xlu1 %1140  ;;  %v1535_v51 = vadd.f32 %v3654_v30, %v1311_v23  ;;  %v1314_v41 = vld [vmem:[%s3664_s21 + $0x178] sm:$0xff]  ;;  %v1251_v26 = vmul.f32 %v1166_v4, %v5080_v13 }
 0x244   : > { %v1241_v7 = vmul.f32 %v1141_v5, %v5074_v20  ;;  %v1242_v8 = vmul.f32 %v1141_v5, %v5075_v24  ;;  %2394 = vmatprep.subr.bf16.mxu0 %v2393_v38  ;;  %2433 = vmatprep.subr.bf16.mxu1 %v2393_v38  ;;  %v1655_v14 = vmax.f32 %v1591_v17, 0.0  ;;  %v1656_v58 = vmax.f32 %v1592_v46, 0.0  ;;  %v1318_v38 = vld [vmem:[%s3664_s21 + $0x198] sm:$0xff] }
 0x245   : > { %2396 = vmatpush1.bf16.msra.mxu0 %v2395_v31  ;;  %2449 = vmatpush1.bf16.msra.mxu1 %v2395_v31  ;;  %v1252_v17 = vmul.f32 %v1166_v4, %v5081_v29  ;;  %v1538_v30 = vadd.f32 %v3657_v37, %v1314_v41  ;;  %v1542_v49 = vadd.f32 %v3666_v12, %v1318_v38 }
 0x246   : > { %v1593_v47 = vadd.f32 %v1529_v43, %v1241_v7  ;;  %v1594_v10 = vadd.f32 %v1530_v27, %v1242_v8  ;;  %v1537_v43 = vadd.f32 %v3657_v37, %v1313_v50  ;;  %v5082_v27 = vld [vmem:[#allocation59_spill] sm:$0xff]  ;;  %v5083_v7 = vld [vmem:[#allocation60_spill] sm:$0xff]  ;;  %v1539_v8 = vadd.f32 %v3674_v63, %v1315_v1  ;;  %v1186_v50 = vpop.permute.xlu0 %1185  ;;  %v1325_v1 = vld [vmem:[%s3664_s21 + $0x1d0] sm:$0xff] }
 0x247   : > { %v1151_v44 = vpop.permute.xlu1 %1150  ;;  %v1260_v38 = vmul.f32 %v1186_v50, %v5089_v22 }
 0x248   : > { %v1657_v54 = vmax.f32 %v1593_v47, 0.0  ;;  %v1658_v36 = vmax.f32 %v1594_v10, 0.0  ;;  %v1245_v59 = vmul.f32 %v1151_v44, %v5076_v55  ;;  %v1246_v39 = vmul.f32 %v1151_v44, %v5077_v62  ;;  %v1320_v62 = vld [vmem:[%s3664_s21 + $0x1a8] sm:$0xff] }
 0x249   : > { %v1603_v47 = vadd.f32 %v1539_v8, %v1251_v26 }
 0x24a   : > { %v1597_v56 = vadd.f32 %v1533_v25, %v1245_v59  ;;  %v1598_v6 = vadd.f32 %v1534_v60, %v1246_v39  ;;  %v2397_v19 = vpack.c.bf16 %v1658_v36, %v1656_v58  ;;  %v2399_v28 = vpack.c.bf16 %v1657_v54, %v1655_v14  ;;  %v5084_v54 = vld [vmem:[#allocation63_spill] sm:$0xff] }
 0x24b   : > { %v1156_v3 = vpop.permute.xlu1 %1155  ;;  %v1540_v25 = vadd.f32 %v3674_v63, %v1316_v0  ;;  %v5085_v36 = vld [vmem:[#allocation3_spill] sm:$0xff]  ;;  %v1326_v0 = vld [vmem:[%s3664_s21 + $0x1d8] sm:$0xff] }
 0x24c   : > { %v1661_v9 = vmax.f32 %v1597_v56, 0.0  ;;  %v1662_v35 = vmax.f32 %v1598_v6, 0.0  ;;  %v1247_v33 = vmul.f32 %v1156_v3, %v5078_v57  ;;  %v1248_v34 = vmul.f32 %v1156_v3, %v5079_v40  ;;  %2398 = vmatprep.subr.bf16.mxu0 %v2397_v19  ;;  %2434 = vmatprep.subr.bf16.mxu1 %v2397_v19  ;;  %v1319_v59 = vld [vmem:[%s3664_s21 + $0x1a0] sm:$0xff]  ;;  %v1321_v56 = vld [vmem:[%s3664_s21 + $0x1b0] sm:$0xff]  ;;  %v1322_v40 = vld [vmem:[%s3664_s21 + $0x1b8] sm:$0xff] }
 0x24d   : > { %2400 = vmatpush1.bf16.msra.mxu0 %v2399_v28  ;;  %2450 = vmatpush1.bf16.msra.mxu1 %v2399_v28  ;;  %v1604_v10 = vadd.f32 %v1540_v25, %v1252_v17  ;;  %v1667_v6 = vmax.f32 %v1603_v47, 0.0  ;;  %v5086_v3 = vld [vmem:[#allocation9_spill] sm:$0xff]  ;;  %v1543_v57 = vadd.f32 %v3734_v11, %v1319_v59  ;;  %v5090_v17 = vld [vmem:[#allocation8_spill] sm:$0xff] }
 0x24e   : > { %v2401_v16 = vpack.c.bf16 %v1662_v35, %v1660_v45  ;;  %v2403_v52 = vpack.c.bf16 %v1661_v9, %v1659_v18  ;;  %v1599_v46 = vadd.f32 %v1535_v51, %v1247_v33  ;;  %v1600_v5 = vadd.f32 %v1536_v42, %v1248_v34  ;;  %v5087_v9 = vld [vmem:[#allocation7_spill] sm:$0xff]  ;;  %v1324_v42 = vld [vmem:[%s3664_s21 + $0x1c8] sm:$0xff] }
 0x24f   : > { %v1161_v31 = vpop.permute.xlu1 %1160  ;;  %v1668_v19 = vmax.f32 %v1604_v10, 0.0  ;;  %v1544_v33 = vadd.f32 %v3734_v11, %v1320_v62  ;;  %v1545_v34 = vadd.f32 %v3722_v48, %v1321_v56  ;;  %v1323_v51 = vld [vmem:[%s3664_s21 + $0x1c0] sm:$0xff]  ;;  %v1546_v11 = vadd.f32 %v3722_v48, %v1322_v40  ;;  %v5092_v10 = vld [vmem:[#allocation64_spill] sm:$0xff] }
 0x250   : > { %v1249_v20 = vmul.f32 %v1161_v31, %v5082_v27  ;;  %v1250_v24 = vmul.f32 %v1161_v31, %v5083_v7  ;;  %2402 = vmatprep.subr.bf16.mxu0 %v2401_v16  ;;  %2435 = vmatprep.subr.bf16.mxu1 %v2401_v16  ;;  %v1663_v15 = vmax.f32 %v1599_v46, 0.0  ;;  %v1664_v61 = vmax.f32 %v1600_v5, 0.0  ;;  %v5088_v16 = vld [vmem:[#allocation65_spill] sm:$0xff]  ;;  %v5091_v5 = vld [vmem:[#allocation6_spill] sm:$0xff]  ;;  %v1327_v62 = vld [vmem:[%s3664_s21 + $0x1e0] sm:$0xff] }
 0x251   : > { %2404 = vmatpush1.bf16.msra.mxu0 %v2403_v52  ;;  %2451 = vmatpush1.bf16.msra.mxu1 %v2403_v52  ;;  %v1259_v52 = vmul.f32 %v1186_v50, %v5088_v16  ;;  %v1548_v27 = vadd.f32 %v3726_v2, %v1324_v42  ;;  %v1550_v7 = vadd.f32 %v3810_v21, %v1326_v0  ;;  %v5095_v50 = vld [vmem:[#allocation13_spill] sm:$0xff] }
 0x252   : > { %v1601_v60 = vadd.f32 %v1537_v43, %v1249_v20  ;;  %v1602_v37 = vadd.f32 %v1538_v30, %v1250_v24  ;;  %v1547_v30 = vadd.f32 %v3726_v2, %v1323_v51  ;;  %v1549_v20 = vadd.f32 %v3810_v21, %v1325_v1  ;;  %v5093_v2 = vld [vmem:[#allocation10_spill] sm:$0xff] }
 0x253   : > { %v1171_v14 = vpop.permute.xlu1 %1170  ;;  %v1612_v48 = vadd.f32 %v1548_v27, %v1260_v38  ;;  %v1687_v27 = vld [vmem:[%s3668_s23 + $0x20] sm:$0xff] }
 0x254   : > { %v1665_v58 = vmax.f32 %v1601_v60, 0.0  ;;  %v1666_v44 = vmax.f32 %v1602_v37, 0.0  ;;  %v1253_v63 = vmul.f32 %v1171_v14, %v5084_v54  ;;  %v1254_v55 = vmul.f32 %v1171_v14, %v5085_v36 }
 0x255   : > { %v1611_v25 = vadd.f32 %v1547_v30, %v1259_v52  ;;  %v1676_v36 = vmax.f32 %v1612_v48, 0.0  ;;  %v1720_v30 = vld [vmem:[%s3668_s23 + $0x128] sm:$0xff] }
 0x256   : > { %v1605_v39 = vadd.f32 %v1541_v32, %v1253_v63  ;;  %v1606_v23 = vadd.f32 %v1542_v49, %v1254_v55  ;;  %v2405_v12 = vpack.c.bf16 %v1666_v44, %v1664_v61  ;;  %v2407_v53 = vpack.c.bf16 %v1665_v58, %v1663_v15  ;;  %v1692_v48 = vld [vmem:[%s3668_s23 + $0x48] sm:$0xff] }
 0x257   : > { %v1176_v28 = vpop.permute.xlu1 %1175  ;;  %v1675_v63 = vmax.f32 %v1611_v25, 0.0  ;;  %v1721_v25 = vld [vmem:[%s3668_s23 + $0x130] sm:$0xff] }
 0x258   : > { %v1669_v18 = vmax.f32 %v1605_v39, 0.0  ;;  %v1670_v45 = vmax.f32 %v1606_v23, 0.0  ;;  %v1255_v4 = vmul.f32 %v1176_v28, %v5086_v3  ;;  %v1256_v35 = vmul.f32 %v1176_v28, %v5087_v9  ;;  %2406 = vmatprep.subr.bf16.mxu0 %v2405_v12  ;;  %2436 = vmatprep.subr.bf16.mxu1 %v2405_v12  ;;  %v1484_v39 = vpop.permute.xlu0 %1483  ;;  %v1328_v23 = vld [vmem:[%s3664_s21 + $0x1e8] sm:$0xff]  ;;  %v1329_v3 = vld [vmem:[%s3664_s21 + $0x1f0] sm:$0xff] }
 0x259   : > { %2408 = vmatpush1.bf16.msra.mxu0 %v2407_v53  ;;  %2452 = vmatpush1.bf16.msra.mxu1 %v2407_v53  ;;  %v1551_v56 = vadd.f32 %v1484_v39, %v1327_v62  ;;  %v1731_v62 = vld [vmem:[%s3668_s23 + $0x180] sm:$0xff] }
 0x25a   : > { %v2409_v41 = vpack.c.bf16 %v1670_v45, %v1668_v19  ;;  %v2411_v43 = vpack.c.bf16 %v1669_v18, %v1667_v6  ;;  %v1607_v13 = vadd.f32 %v1543_v57, %v1255_v4  ;;  %v1608_v26 = vadd.f32 %v1544_v33, %v1256_v35  ;;  %v5094_v19 = vld [vmem:[#allocation14_spill] sm:$0xff] }
 0x25b   : > { %v1181_v29 = vpop.permute.xlu1 %1180  ;;  %v1552_v45 = vadd.f32 %v1484_v39, %v1328_v23  ;;  %v1330_v4 = vld [vmem:[%s3664_s21 + $0x1f8] sm:$0xff] }
 0x25c   : > { %v1257_v46 = vmul.f32 %v1181_v29, %v5090_v17  ;;  %v1258_v31 = vmul.f32 %v1181_v29, %v5091_v5  ;;  %2410 = vmatprep.subr.bf16.mxu0 %v2409_v41  ;;  %2437 = vmatprep.subr.bf16.mxu1 %v2409_v41  ;;  %v1671_v32 = vmax.f32 %v1607_v13, 0.0  ;;  %v1672_v49 = vmax.f32 %v1608_v26, 0.0  ;;  %v5096_v33 = vld [vmem:[#allocation66_spill] sm:$0xff]  ;;  %v1683_v26 = vld [vmem:[%s3668_s23] sm:$0xff]  ;;  %v1717_v5 = vld [vmem:[%s3668_s23 + $0x110] sm:$0xff] }
 0x25d   : > { %2412 = vmatpush1.bf16.msra.mxu0 %v2411_v43  ;;  %2453 = vmatpush1.bf16.msra.mxu1 %v2411_v43  ;;  %v1715_v29 = vld [vmem:[%s3668_s23 + $0x100] sm:$0xff]  ;;  %v1718_v17 = vld [vmem:[%s3668_s23 + $0x118] sm:$0xff] }
 0x25e   : > { %v1609_v24 = vadd.f32 %v1545_v34, %v1257_v46  ;;  %v1610_v8 = vadd.f32 %v1546_v11, %v1258_v31  ;;  %v5097_v34 = vld [vmem:[#allocation12_spill] sm:$0xff]  ;;  %v1686_v11 = vld [vmem:[%s3668_s23 + $0x18] sm:$0xff]  ;;  %v1685_v46 = vld [vmem:[%s3668_s23 + $0x10] sm:$0xff] }
 0x25f   : > { %v1191_v60 = vpop.permute.xlu1 %1190  ;;  %v1688_v31 = vld [vmem:[%s3668_s23 + $0x28] sm:$0xff]  ;;  %v1702_v39 = vld [vmem:[%s3668_s23 + $0x98] sm:$0xff] }
 0x260   : > { %v1673_v37 = vmax.f32 %v1609_v24, 0.0  ;;  %v1674_v47 = vmax.f32 %v1610_v8, 0.0  ;;  %v1261_v15 = vmul.f32 %v1191_v60, %v5092_v10  ;;  %v1262_v61 = vmul.f32 %v1191_v60, %v5093_v2  ;;  %v1722_v24 = vld [vmem:[%s3668_s23 + $0x138] sm:$0xff]  ;;  %v1689_v8 = vld [vmem:[%s3668_s23 + $0x30] sm:$0xff]  ;;  %v1723_v60 = vld [vmem:[%s3668_s23 + $0x140] sm:$0xff] }
 0x261   : > { %v1693_v10 = vld [vmem:[%s3668_s23 + $0x50] sm:$0xff]  ;;  %v1696_v2 = vld [vmem:[%s3668_s23 + $0x68] sm:$0xff]  ;;  %v1734_v23 = vld [vmem:[%s3668_s23 + $0x198] sm:$0xff] }
 0x262   : > { %v1613_v14 = vadd.f32 %v1549_v20, %v1261_v15  ;;  %v1614_v58 = vadd.f32 %v1550_v7, %v1262_v61  ;;  %v2413_v44 = vpack.c.bf16 %v1674_v47, %v1672_v49  ;;  %v2415_v54 = vpack.c.bf16 %v1673_v37, %v1671_v32  ;;  %v1719_v20 = vld [vmem:[%s3668_s23 + $0x120] sm:$0xff]  ;;  %v1690_v7 = vld [vmem:[%s3668_s23 + $0x38] sm:$0xff]  ;;  %v1724_v32 = vld [vmem:[%s3668_s23 + $0x148] sm:$0xff] }
 0x263   : > { %v1196_v21 = vpop.permute.xlu1 %1195  ;;  %v1691_v49 = vld [vmem:[%s3668_s23 + $0x40] sm:$0xff]  ;;  %v1694_v37 = vld [vmem:[%s3668_s23 + $0x58] sm:$0xff]  ;;  %v1725_v15 = vld [vmem:[%s3668_s23 + $0x150] sm:$0xff] }
 0x264   : > { %v1677_v55 = vmax.f32 %v1613_v14, 0.0  ;;  %v1678_v59 = vmax.f32 %v1614_v58, 0.0  ;;  %2414 = vmatprep.subr.bf16.mxu0 %v2413_v44  ;;  %2438 = vmatprep.subr.bf16.mxu1 %v2413_v44  ;;  %v1263_v28 = vmul.f32 %v1196_v21, %v5094_v19  ;;  %v1264_v18 = vmul.f32 %v1196_v21, %v5095_v50  ;;  %v1726_v47 = vld [vmem:[%s3668_s23 + $0x158] sm:$0xff]  ;;  %v1728_v61 = vld [vmem:[%s3668_s23 + $0x168] sm:$0xff]  ;;  %v1695_v14 = vld [vmem:[%s3668_s23 + $0x60] sm:$0xff] }
 0x265   : > { %2416 = vmatpush1.bf16.msra.mxu0 %v2415_v54  ;;  %2454 = vmatpush1.bf16.msra.mxu1 %v2415_v54  ;;  %v1727_v58 = vld [vmem:[%s3668_s23 + $0x160] sm:$0xff]  ;;  %v1698_v44 = vld [vmem:[%s3668_s23 + $0x78] sm:$0xff]  ;;  %v1697_v21 = vld [vmem:[%s3668_s23 + $0x70] sm:$0xff] }
 0x266   : > { %v2417_v12 = vpack.c.bf16 %v1678_v59, %v1676_v36  ;;  %v2419_v53 = vpack.c.bf16 %v1677_v55, %v1675_v63  ;;  %v1615_v9 = vadd.f32 %v1551_v56, %v1263_v28  ;;  %v1616_v35 = vadd.f32 %v1552_v45, %v1264_v18  ;;  %v1730_v54 = vld [vmem:[%s3668_s23 + $0x178] sm:$0xff]  ;;  %v1729_v63 = vld [vmem:[%s3668_s23 + $0x170] sm:$0xff]  ;;  %v1700_v36 = vld [vmem:[%s3668_s23 + $0x88] sm:$0xff] }
 0x267   : > { %v1201_v6 = vpop.permute.xlu1 %1200  ;;  %v1732_v55 = vld [vmem:[%s3668_s23 + $0x188] sm:$0xff]  ;;  %v1699_v59 = vld [vmem:[%s3668_s23 + $0x80] sm:$0xff]  ;;  %v1706_v50 = vld [vmem:[%s3668_s23 + $0xb8] sm:$0xff] }
 0x268   : > { %2418 = vmatprep.subr.bf16.mxu0 %v2417_v12  ;;  %2439 = vmatprep.subr.bf16.mxu1 %v2417_v12  ;;  %v1265_v40 = vmul.f32 %v1201_v6, %v5096_v33  ;;  %v1266_v51 = vmul.f32 %v1201_v6, %v5097_v34  ;;  %v1679_v0 = vmax.f32 %v1615_v9, 0.0  ;;  %v1680_v16 = vmax.f32 %v1616_v35, 0.0  ;;  %v1701_v12 = vld [vmem:[%s3668_s23 + $0x90] sm:$0xff]  ;;  %v1704_v56 = vld [vmem:[%s3668_s23 + $0xa8] sm:$0xff]  ;;  %v1703_v19 = vld [vmem:[%s3668_s23 + $0xa0] sm:$0xff] }
 0x269   : > { %2420 = vmatpush1.bf16.msra.mxu0 %v2419_v53  ;;  %2455 = vmatpush1.bf16.msra.mxu1 %v2419_v53  ;;  %v1733_v53 = vld [vmem:[%s3668_s23 + $0x190] sm:$0xff]  ;;  %v1736_v6 = vld [vmem:[%s3668_s23 + $0x1a8] sm:$0xff]  ;;  %v1735_v28 = vld [vmem:[%s3668_s23 + $0x1a0] sm:$0xff] }
 0x26a   : > { %v1738_v18 = vld [vmem:[%s3668_s23 + $0x1b8] sm:$0xff]  ;;  %v1705_v45 = vld [vmem:[%s3668_s23 + $0xb0] sm:$0xff]  ;;  %v1740_v9 = vld [vmem:[%s3668_s23 + $0x1c8] sm:$0xff] }
 0x26b   : > { %v1707_v35 = vld [vmem:[%s3668_s23 + $0xc0] sm:$0xff]  ;;  %v1710_v33 = vld [vmem:[%s3668_s23 + $0xd8] sm:$0xff]  ;;  %v1709_v34 = vld [vmem:[%s3668_s23 + $0xd0] sm:$0xff] }
 0x26c   : > { %v1489_v57 = vpop.permute.xlu1 %1488 }
 0x26d   : > { %v1553_v42 = vadd.f32 %v1489_v57, %v1329_v3  ;;  %v1554_v41 = vadd.f32 %v1489_v57, %v1330_v4  ;;  %v1737_v3 = vld [vmem:[%s3668_s23 + $0x1b0] sm:$0xff]  ;;  %v1708_v4 = vld [vmem:[%s3668_s23 + $0xc8] sm:$0xff]  ;;  %v1739_v57 = vld [vmem:[%s3668_s23 + $0x1c0] sm:$0xff] }
 0x26f   : > { %v1617_v43 = vadd.f32 %v1553_v42, %v1265_v40  ;;  %v1618_v1 = vadd.f32 %v1554_v41, %v1266_v51  ;;  %v1742_v40 = vld [vmem:[%s3668_s23 + $0x1d8] sm:$0xff]  ;;  %v1741_v51 = vld [vmem:[%s3668_s23 + $0x1d0] sm:$0xff]  ;;  %v1712_v42 = vld [vmem:[%s3668_s23 + $0xe8] sm:$0xff] }
 0x270   : > { %v1744_v41 = vld [vmem:[%s3668_s23 + $0x1e8] sm:$0xff] }
 0x271   : > { %v1681_v52 = vmax.f32 %v1617_v43, 0.0  ;;  %v1682_v22 = vmax.f32 %v1618_v1, 0.0  ;;  %v1711_v43 = vld [vmem:[%s3668_s23 + $0xe0] sm:$0xff] }
 0x272   : > { %v1743_v1 = vld [vmem:[%s3668_s23 + $0x1e0] sm:$0xff] }
 0x273   : > { %v2421_v38 = vpack.c.bf16 %v1682_v22, %v1680_v16  ;;  %v2423_v13 = vpack.c.bf16 %v1681_v52, %v1679_v0  ;;  %v1714_v0 = vld [vmem:[%s3668_s23 + $0xf8] sm:$0xff]  ;;  %v1713_v52 = vld [vmem:[%s3668_s23 + $0xf0] sm:$0xff] }
 0x274   : > { %v1746_v16 = vld [vmem:[%s3668_s23 + $0x1f8] sm:$0xff]  ;;  %v1745_v22 = vld [vmem:[%s3668_s23 + $0x1f0] sm:$0xff] }
 0x275   : > { %2422 = vmatprep.subr.bf16.mxu0 %v2421_v38  ;;  %2440 = vmatprep.subr.bf16.mxu1 %v2421_v38 }
 0x276   : > { %2424 = vmatpush1.bf16.msra.mxu0 %v2423_v13  ;;  %2456 = vmatpush1.bf16.msra.mxu1 %v2423_v13 }
 0x279   : > { %1812 = vmatmul.mubr.f32.vlgmr.msra.gmra.mrb[0].mxu0 %v1683_v26  ;;  %1908 = vmatmul.mubr.f32.vlgmr.msra.gmra.mrb[0].mxu1 %v1715_v29 }
 0x27a   : > { %1817 = vmatprep.mubr.f32.mxu0 %v1686_v11  ;;  %1913 = vmatprep.mubr.f32.mxu1 %v1718_v17 }
 0x27d   : > { %1818 = vmatmul.mubr.f32.gmra.mrb[2].mxu0 %v1685_v46  ;;  %1914 = vmatmul.mubr.f32.gmra.mrb[2].mxu1 %v1717_v5 }
 0x27e   : > { %1823 = vmatprep.mubr.f32.mxu0 %v1688_v31  ;;  %1919 = vmatprep.mubr.f32.mxu1 %v1720_v30 }
 0x281   : > { %1824 = vmatmul.mubr.f32.gmra.mrb[4].mxu0 %v1687_v27  ;;  %1920 = vmatmul.mubr.f32.gmra.mrb[4].mxu1 %v1719_v20 }
 0x282   : > { %1829 = vmatprep.mubr.f32.mxu0 %v1690_v7  ;;  %1925 = vmatprep.mubr.f32.mxu1 %v1722_v24 }
 0x285   : > { %1830 = vmatmul.mubr.f32.gmra.mrb[6].mxu0 %v1689_v8  ;;  %1926 = vmatmul.mubr.f32.gmra.mrb[6].mxu1 %v1721_v25 }
 0x286   : > { %1835 = vmatprep.mubr.f32.mxu0 %v1692_v48  ;;  %1931 = vmatprep.mubr.f32.mxu1 %v1724_v32 }
 0x289   : > { %1836 = vmatmul.mubr.f32.gmra.mrb[8].mxu0 %v1691_v49  ;;  %1932 = vmatmul.mubr.f32.gmra.mrb[8].mxu1 %v1723_v60 }
 0x28a   : > { %1841 = vmatprep.mubr.f32.mxu0 %v1694_v37  ;;  %1937 = vmatprep.mubr.f32.mxu1 %v1726_v47 }
 0x28d   : > { %1842 = vmatmul.mubr.f32.gmra.mrb[10].mxu0 %v1693_v10  ;;  %1938 = vmatmul.mubr.f32.gmra.mrb[10].mxu1 %v1725_v15 }
 0x28e   : > { %1847 = vmatprep.mubr.f32.mxu0 %v1696_v2  ;;  %1943 = vmatprep.mubr.f32.mxu1 %v1728_v61 }
 0x291   : > { %1848 = vmatmul.mubr.f32.gmra.mrb[12].mxu0 %v1695_v14  ;;  %1944 = vmatmul.mubr.f32.gmra.mrb[12].mxu1 %v1727_v58 }
 0x292   : > { %1853 = vmatprep.mubr.f32.mxu0 %v1698_v44  ;;  %1949 = vmatprep.mubr.f32.mxu1 %v1730_v54 }
 0x295   : > { %1854 = vmatmul.mubr.f32.gmra.mrb[14].mxu0 %v1697_v21  ;;  %1950 = vmatmul.mubr.f32.gmra.mrb[14].mxu1 %v1729_v63 }
 0x296   : > { %1859 = vmatprep.mubr.f32.mxu0 %v1700_v36  ;;  %1955 = vmatprep.mubr.f32.mxu1 %v1732_v55 }
 0x299   : > { %1860 = vmatmul.mubr.f32.gmra.mrb[16].mxu0 %v1699_v59  ;;  %1956 = vmatmul.mubr.f32.gmra.mrb[16].mxu1 %v1731_v62 }
 0x29a   : > { %1865 = vmatprep.mubr.f32.mxu0 %v1702_v39  ;;  %1961 = vmatprep.mubr.f32.mxu1 %v1734_v23 }
 0x29d   : > { %1866 = vmatmul.mubr.f32.gmra.mrb[18].mxu0 %v1701_v12  ;;  %1962 = vmatmul.mubr.f32.gmra.mrb[18].mxu1 %v1733_v53 }
 0x29e   : > { %1871 = vmatprep.mubr.f32.mxu0 %v1704_v56  ;;  %1967 = vmatprep.mubr.f32.mxu1 %v1736_v6 }
 0x2a1   : > { %1872 = vmatmul.mubr.f32.gmra.mrb[20].mxu0 %v1703_v19  ;;  %1968 = vmatmul.mubr.f32.gmra.mrb[20].mxu1 %v1735_v28 }
 0x2a2   : > { %1877 = vmatprep.mubr.f32.mxu0 %v1706_v50  ;;  %1973 = vmatprep.mubr.f32.mxu1 %v1738_v18 }
 0x2a5   : > { %1878 = vmatmul.mubr.f32.gmra.mrb[22].mxu0 %v1705_v45  ;;  %1974 = vmatmul.mubr.f32.gmra.mrb[22].mxu1 %v1737_v3 }
 0x2a6   : > { %1883 = vmatprep.mubr.f32.mxu0 %v1708_v4  ;;  %1979 = vmatprep.mubr.f32.mxu1 %v1740_v9 }
 0x2a9   : > { %1884 = vmatmul.mubr.f32.gmra.mrb[24].mxu0 %v1707_v35  ;;  %1980 = vmatmul.mubr.f32.gmra.mrb[24].mxu1 %v1739_v57 }
 0x2aa   : > { %1889 = vmatprep.mubr.f32.mxu0 %v1710_v33  ;;  %1985 = vmatprep.mubr.f32.mxu1 %v1742_v40 }
 0x2ad   : > { %1890 = vmatmul.mubr.f32.gmra.mrb[26].mxu0 %v1709_v34  ;;  %1986 = vmatmul.mubr.f32.gmra.mrb[26].mxu1 %v1741_v51 }
 0x2ae   : > { %1895 = vmatprep.mubr.f32.mxu0 %v1712_v42  ;;  %1991 = vmatprep.mubr.f32.mxu1 %v1744_v41 }
 0x2b1   : > { %1896 = vmatmul.mubr.f32.gmra.mrb[28].mxu0 %v1711_v43  ;;  %1992 = vmatmul.mubr.f32.gmra.mrb[28].mxu1 %v1743_v1 }
 0x2b2   : > { %1901 = vmatprep.mubr.f32.mxu0 %v1714_v0  ;;  %1997 = vmatprep.mubr.f32.mxu1 %v1746_v16 }
 0x2b5   : > { %1902 = vmatmul.mubr.f32.gmra.mrb[30].mxu0 %v1713_v52  ;;  %1998 = vmatmul.mubr.f32.gmra.mrb[30].mxu1 %v1745_v22 }
 0x34c   : > { %v3932_v38 = vpop.f32.mrb[0].mxu0  ;;  %v3934_v13 = vpop.f32.mrb[0].mxu1 }
 0x34d   : > { %v3936_v26 = vpop.f32.mrb[1].mxu0  ;;  %v3938_v29 = vpop.f32.mrb[1].mxu1  ;;  %2008 = vst [vmem:[%s4844_s4] sm:$0xff] (!%p2354_p9), %v3932_v38  ;;  %2040 = vst [vmem:[%s4844_s4 + $0x100] sm:$0xff] (!%p2354_p9), %v3934_v13 }
 0x34e   : > { %2009 = vst.msk [vmem:[%s4844_s4 + $0x8] sm:$0xff] (!%p2354_p9), %vm466_vm0, %v3936_v26  ;;  %2041 = vst.msk [vmem:[%s4844_s4 + $0x108] sm:$0xff] (!%p2354_p9), %vm466_vm0, %v3938_v29 }
 0x350   : > { %v3940_v11 = vpop.f32.mrb[2].mxu0  ;;  %v3942_v17 = vpop.f32.mrb[2].mxu1 }
 0x351   : > { %v3944_v46 = vpop.f32.mrb[3].mxu0  ;;  %v3946_v5 = vpop.f32.mrb[3].mxu1  ;;  %2010 = vst [vmem:[%s4844_s4 + $0x10] sm:$0xff] (!%p2354_p9), %v3940_v11  ;;  %2042 = vst [vmem:[%s4844_s4 + $0x110] sm:$0xff] (!%p2354_p9), %v3942_v17 }
 0x352   : > { %2011 = vst.msk [vmem:[%s4844_s4 + $0x18] sm:$0xff] (!%p2354_p9), %vm466_vm0, %v3944_v46  ;;  %2043 = vst.msk [vmem:[%s4844_s4 + $0x118] sm:$0xff] (!%p2354_p9), %vm466_vm0, %v3946_v5 }
 0x354   : > { %v3948_v31 = vpop.f32.mrb[4].mxu0  ;;  %v3950_v30 = vpop.f32.mrb[4].mxu1 }
 0x355   : > { %v3952_v27 = vpop.f32.mrb[5].mxu0  ;;  %v3954_v20 = vpop.f32.mrb[5].mxu1  ;;  %2012 = vst [vmem:[%s4844_s4 + $0x20] sm:$0xff] (!%p2354_p9), %v3948_v31  ;;  %2044 = vst [vmem:[%s4844_s4 + $0x120] sm:$0xff] (!%p2354_p9), %v3950_v30 }
 0x356   : > { %2013 = vst.msk [vmem:[%s4844_s4 + $0x28] sm:$0xff] (!%p2354_p9), %vm466_vm0, %v3952_v27  ;;  %2045 = vst.msk [vmem:[%s4844_s4 + $0x128] sm:$0xff] (!%p2354_p9), %vm466_vm0, %v3954_v20 }
 0x358   : > { %v3956_v7 = vpop.f32.mrb[6].mxu0  ;;  %v3958_v24 = vpop.f32.mrb[6].mxu1 }
 0x359   : > { %v3960_v8 = vpop.f32.mrb[7].mxu0  ;;  %v3962_v25 = vpop.f32.mrb[7].mxu1  ;;  %2014 = vst [vmem:[%s4844_s4 + $0x30] sm:$0xff] (!%p2354_p9), %v3956_v7  ;;  %2046 = vst [vmem:[%s4844_s4 + $0x130] sm:$0xff] (!%p2354_p9), %v3958_v24 }
 0x35a   : > { %2015 = vst.msk [vmem:[%s4844_s4 + $0x38] sm:$0xff] (!%p2354_p9), %vm466_vm0, %v3960_v8  ;;  %2047 = vst.msk [vmem:[%s4844_s4 + $0x138] sm:$0xff] (!%p2354_p9), %vm466_vm0, %v3962_v25 }
 0x35c   : > { %v3964_v48 = vpop.f32.mrb[8].mxu0  ;;  %v3966_v32 = vpop.f32.mrb[8].mxu1 }
 0x35d   : > { %v3968_v49 = vpop.f32.mrb[9].mxu0  ;;  %v3970_v60 = vpop.f32.mrb[9].mxu1  ;;  %2016 = vst [vmem:[%s4844_s4 + $0x40] sm:$0xff] (!%p2354_p9), %v3964_v48  ;;  %2048 = vst [vmem:[%s4844_s4 + $0x140] sm:$0xff] (!%p2354_p9), %v3966_v32 }
 0x35e   : > { %2017 = vst.msk [vmem:[%s4844_s4 + $0x48] sm:$0xff] (!%p2354_p9), %vm466_vm0, %v3968_v49  ;;  %2049 = vst.msk [vmem:[%s4844_s4 + $0x148] sm:$0xff] (!%p2354_p9), %vm466_vm0, %v3970_v60 }
 0x360   : > { %v3972_v37 = vpop.f32.mrb[10].mxu0  ;;  %v3974_v47 = vpop.f32.mrb[10].mxu1 }
 0x361   : > { %v3976_v10 = vpop.f32.mrb[11].mxu0  ;;  %v3978_v15 = vpop.f32.mrb[11].mxu1  ;;  %2018 = vst [vmem:[%s4844_s4 + $0x50] sm:$0xff] (!%p2354_p9), %v3972_v37  ;;  %2050 = vst [vmem:[%s4844_s4 + $0x150] sm:$0xff] (!%p2354_p9), %v3974_v47 }
 0x362   : > { %2019 = vst.msk [vmem:[%s4844_s4 + $0x58] sm:$0xff] (!%p2354_p9), %vm466_vm0, %v3976_v10  ;;  %2051 = vst.msk [vmem:[%s4844_s4 + $0x158] sm:$0xff] (!%p2354_p9), %vm466_vm0, %v3978_v15 }
 0x364   : > { %v3980_v2 = vpop.f32.mrb[12].mxu0  ;;  %v3982_v61 = vpop.f32.mrb[12].mxu1 }
 0x365   : > { %v3984_v14 = vpop.f32.mrb[13].mxu0  ;;  %v3986_v58 = vpop.f32.mrb[13].mxu1  ;;  %2020 = vst [vmem:[%s4844_s4 + $0x60] sm:$0xff] (!%p2354_p9), %v3980_v2  ;;  %2052 = vst [vmem:[%s4844_s4 + $0x160] sm:$0xff] (!%p2354_p9), %v3982_v61 }
 0x366   : > { %2021 = vst.msk [vmem:[%s4844_s4 + $0x68] sm:$0xff] (!%p2354_p9), %vm466_vm0, %v3984_v14  ;;  %2053 = vst.msk [vmem:[%s4844_s4 + $0x168] sm:$0xff] (!%p2354_p9), %vm466_vm0, %v3986_v58 }
 0x368   : > { %v3988_v44 = vpop.f32.mrb[14].mxu0  ;;  %v3990_v54 = vpop.f32.mrb[14].mxu1 }
 0x369   : > { %v3992_v21 = vpop.f32.mrb[15].mxu0  ;;  %v3994_v63 = vpop.f32.mrb[15].mxu1  ;;  %2022 = vst [vmem:[%s4844_s4 + $0x70] sm:$0xff] (!%p2354_p9), %v3988_v44  ;;  %2054 = vst [vmem:[%s4844_s4 + $0x170] sm:$0xff] (!%p2354_p9), %v3990_v54 }
 0x36a   : > { %2023 = vst.msk [vmem:[%s4844_s4 + $0x78] sm:$0xff] (!%p2354_p9), %vm466_vm0, %v3992_v21  ;;  %2055 = vst.msk [vmem:[%s4844_s4 + $0x178] sm:$0xff] (!%p2354_p9), %vm466_vm0, %v3994_v63 }
 0x36c   : > { %v3996_v36 = vpop.f32.mrb[16].mxu0  ;;  %v3998_v55 = vpop.f32.mrb[16].mxu1 }
 0x36d   : > { %v4000_v59 = vpop.f32.mrb[17].mxu0  ;;  %v4002_v62 = vpop.f32.mrb[17].mxu1  ;;  %2024 = vst [vmem:[%s4844_s4 + $0x80] sm:$0xff] (!%p2354_p9), %v3996_v36  ;;  %2056 = vst [vmem:[%s4844_s4 + $0x180] sm:$0xff] (!%p2354_p9), %v3998_v55 }
 0x36e   : > { %2025 = vst.msk [vmem:[%s4844_s4 + $0x88] sm:$0xff] (!%p2354_p9), %vm466_vm0, %v4000_v59  ;;  %2057 = vst.msk [vmem:[%s4844_s4 + $0x188] sm:$0xff] (!%p2354_p9), %vm466_vm0, %v4002_v62 }
 0x370   : > { %v4004_v39 = vpop.f32.mrb[18].mxu0  ;;  %v4006_v23 = vpop.f32.mrb[18].mxu1 }
 0x371   : > { %v4008_v12 = vpop.f32.mrb[19].mxu0  ;;  %v4010_v53 = vpop.f32.mrb[19].mxu1  ;;  %2026 = vst [vmem:[%s4844_s4 + $0x90] sm:$0xff] (!%p2354_p9), %v4004_v39  ;;  %2058 = vst [vmem:[%s4844_s4 + $0x190] sm:$0xff] (!%p2354_p9), %v4006_v23 }
 0x372   : > { %2027 = vst.msk [vmem:[%s4844_s4 + $0x98] sm:$0xff] (!%p2354_p9), %vm466_vm0, %v4008_v12  ;;  %2059 = vst.msk [vmem:[%s4844_s4 + $0x198] sm:$0xff] (!%p2354_p9), %vm466_vm0, %v4010_v53 }
 0x374   : > { %v4012_v56 = vpop.f32.mrb[20].mxu0  ;;  %v4014_v6 = vpop.f32.mrb[20].mxu1 }
 0x375   : > { %v4016_v19 = vpop.f32.mrb[21].mxu0  ;;  %v4018_v28 = vpop.f32.mrb[21].mxu1  ;;  %2028 = vst [vmem:[%s4844_s4 + $0xa0] sm:$0xff] (!%p2354_p9), %v4012_v56  ;;  %2060 = vst [vmem:[%s4844_s4 + $0x1a0] sm:$0xff] (!%p2354_p9), %v4014_v6 }
 0x376   : > { %2029 = vst.msk [vmem:[%s4844_s4 + $0xa8] sm:$0xff] (!%p2354_p9), %vm466_vm0, %v4016_v19  ;;  %2061 = vst.msk [vmem:[%s4844_s4 + $0x1a8] sm:$0xff] (!%p2354_p9), %vm466_vm0, %v4018_v28 }
 0x378   : > { %v4020_v50 = vpop.f32.mrb[22].mxu0  ;;  %v4022_v18 = vpop.f32.mrb[22].mxu1 }
 0x379   : > { %5098 = vst [vmem:[#allocation15_spill] sm:$0xff] %v4022_v18  ;;  %v4024_v45 = vpop.f32.mrb[23].mxu0  ;;  %v4026_v3 = vpop.f32.mrb[23].mxu1  ;;  %2030 = vst [vmem:[%s4844_s4 + $0xb0] sm:$0xff] (!%p2354_p9), %v4020_v50 }
 0x37a   : > { %5099 = vst [vmem:[#allocation16_spill] sm:$0xff] %v4026_v3  ;;  %2031 = vst.msk [vmem:[%s4844_s4 + $0xb8] sm:$0xff] (!%p2354_p9), %vm466_vm0, %v4024_v45 }
 0x37b   : > { %2062 = vst [vmem:[%s4844_s4 + $0x1b0] sm:$0xff] (!%p2354_p9), %v4022_v18  ;;  %2063 = vst.msk [vmem:[%s4844_s4 + $0x1b8] sm:$0xff] (!%p2354_p9), %vm466_vm0, %v4026_v3 }
 0x37c   : > { %v4028_v4 = vpop.f32.mrb[24].mxu0  ;;  %v4030_v9 = vpop.f32.mrb[24].mxu1 }
 0x37d   : > { %5100 = vst [vmem:[#allocation18_spill] sm:$0xff] %v4030_v9  ;;  %v4032_v35 = vpop.f32.mrb[25].mxu0  ;;  %v4034_v57 = vpop.f32.mrb[25].mxu1  ;;  %2032 = vst [vmem:[%s4844_s4 + $0xc0] sm:$0xff] (!%p2354_p9), %v4028_v4 }
 0x37e   : > { %5101 = vst [vmem:[#allocation20_spill] sm:$0xff] %v4034_v57  ;;  %2033 = vst.msk [vmem:[%s4844_s4 + $0xc8] sm:$0xff] (!%p2354_p9), %vm466_vm0, %v4032_v35 }
 0x37f   : > { %2064 = vst [vmem:[%s4844_s4 + $0x1c0] sm:$0xff] (!%p2354_p9), %v4030_v9  ;;  %2065 = vst.msk [vmem:[%s4844_s4 + $0x1c8] sm:$0xff] (!%p2354_p9), %vm466_vm0, %v4034_v57 }
 0x380   : > { %v4036_v33 = vpop.f32.mrb[26].mxu0  ;;  %v4038_v40 = vpop.f32.mrb[26].mxu1 }
 0x381   : > { %5102 = vst [vmem:[#allocation17_spill] sm:$0xff] %v4038_v40  ;;  %v4040_v34 = vpop.f32.mrb[27].mxu0  ;;  %v4042_v51 = vpop.f32.mrb[27].mxu1  ;;  %2034 = vst [vmem:[%s4844_s4 + $0xd0] sm:$0xff] (!%p2354_p9), %v4036_v33 }
 0x382   : > { %5103 = vst [vmem:[#allocation22_spill] sm:$0xff] %v4042_v51  ;;  %2035 = vst.msk [vmem:[%s4844_s4 + $0xd8] sm:$0xff] (!%p2354_p9), %vm466_vm0, %v4040_v34 }
 0x383   : > { %2066 = vst [vmem:[%s4844_s4 + $0x1d0] sm:$0xff] (!%p2354_p9), %v4038_v40  ;;  %2067 = vst.msk [vmem:[%s4844_s4 + $0x1d8] sm:$0xff] (!%p2354_p9), %vm466_vm0, %v4042_v51 }
 0x384   : > { %v4044_v42 = vpop.f32.mrb[28].mxu0  ;;  %v4046_v41 = vpop.f32.mrb[28].mxu1  ;;  %2007 = sbr.rel (%p2354_p9) target bundleno = 908 (0x38c), region = 63 }
 0x385   : > { %5104 = vst [vmem:[#allocation26_spill] sm:$0xff] %v4046_v41  ;;  %v4048_v43 = vpop.f32.mrb[29].mxu0  ;;  %v4050_v1 = vpop.f32.mrb[29].mxu1  ;;  %2036 = vst [vmem:[%s4844_s4 + $0xe0] sm:$0xff] (!%p2354_p9), %v4044_v42 }
 0x386   : > { %5105 = vst [vmem:[#allocation19_spill] sm:$0xff] %v4050_v1  ;;  %2037 = vst.msk [vmem:[%s4844_s4 + $0xe8] sm:$0xff] (!%p2354_p9), %vm466_vm0, %v4048_v43 }
 0x387   : > { %2068 = vst [vmem:[%s4844_s4 + $0x1e0] sm:$0xff] (!%p2354_p9), %v4046_v41  ;;  %2069 = vst.msk [vmem:[%s4844_s4 + $0x1e8] sm:$0xff] (!%p2354_p9), %vm466_vm0, %v4050_v1 }
 0x388   : > { %v4052_v0 = vpop.f32.mrb[30].mxu0  ;;  %v4054_v16 = vpop.f32.mrb[30].mxu1 }
 0x389   : > { %5106 = vst [vmem:[#allocation24_spill] sm:$0xff] %v4054_v16  ;;  %v4056_v52 = vpop.f32.mrb[31].mxu0  ;;  %v4058_v22 = vpop.f32.mrb[31].mxu1  ;;  %2038 = vst [vmem:[%s4844_s4 + $0xf0] sm:$0xff] (!%p2354_p9), %v4052_v0 }
 0x38a   : > { %5107 = vst [vmem:[#allocation29_spill] sm:$0xff] %v4058_v22  ;;  %2039 = vst.msk [vmem:[%s4844_s4 + $0xf8] sm:$0xff] (!%p2354_p9), %vm466_vm0, %v4056_v52 }
 0x38b   : > { %2070 = vst [vmem:[%s4844_s4 + $0x1f0] sm:$0xff] %v4054_v16  ;;  %2071 = vst.msk [vmem:[%s4844_s4 + $0x1f8] sm:$0xff] %vm466_vm0, %v4058_v22 }
 0x38c PF: > { %p2355_p10 = scmp.eq.s32.totalorder %s2626_s18, 0 }
 0x38d   : > { %v2076_v41 = vld [vmem:[%s4844_s4] sm:$0xff] (!%p2355_p10)  ;;  %v2077_v1 = vld [vmem:[%s4844_s4 + $0x8] sm:$0xff] (!%p2355_p10)  ;;  %v2078_v16 = vld [vmem:[%s4844_s4 + $0x10] sm:$0xff] (!%p2355_p10) }
 0x38e   : > { %2075 = sbr.rel (%p2355_p10) target bundleno = 946 (0x3b2), region = 67  ;;  %v2140_v51 = vadd.f32 (!%p2355_p10), %v2076_v41, %v3932_v38  ;;  %v2141_v22 = vadd.f32 (!%p2355_p10), %v2077_v1, %v3936_v26  ;;  %v2142_v40 = vadd.f32 (!%p2355_p10), %v2078_v16, %v3940_v11  ;;  %v2079_v57 = vld [vmem:[%s4844_s4 + $0x18] sm:$0xff] (!%p2355_p10)  ;;  %v2080_v9 = vld [vmem:[%s4844_s4 + $0x20] sm:$0xff] (!%p2355_p10)  ;;  %v2081_v3 = vld [vmem:[%s4844_s4 + $0x28] sm:$0xff] (!%p2355_p10) }
 0x38f   : > { %v2143_v18 = vadd.f32 (!%p2355_p10), %v2079_v57, %v3944_v46  ;;  %v2144_v38 = vadd.f32 (!%p2355_p10), %v2080_v9, %v3948_v31  ;;  %v2145_v26 = vadd.f32 (!%p2355_p10), %v2081_v3, %v3952_v27  ;;  %v2082_v11 = vld [vmem:[%s4844_s4 + $0x30] sm:$0xff] (!%p2355_p10)  ;;  %v2083_v41 = vld [vmem:[%s4844_s4 + $0x38] sm:$0xff] (!%p2355_p10)  ;;  %v2084_v1 = vld [vmem:[%s4844_s4 + $0x40] sm:$0xff] (!%p2355_p10) }
 0x390   : > { %2204 = vst [vmem:[%s4844_s4] sm:$0xff] (!%p2355_p10), %v2140_v51  ;;  %2205 = vst.msk [vmem:[%s4844_s4 + $0x8] sm:$0xff] (!%p2355_p10), %vm466_vm0, %v2141_v22  ;;  %v2146_v46 = vadd.f32 (!%p2355_p10), %v2082_v11, %v3956_v7  ;;  %v2147_v31 = vadd.f32 (!%p2355_p10), %v2083_v41, %v3960_v8  ;;  %v2148_v27 = vadd.f32 (!%p2355_p10), %v2084_v1, %v3964_v48  ;;  %v2085_v3 = vld [vmem:[%s4844_s4 + $0x48] sm:$0xff] (!%p2355_p10)  ;;  %v2086_v9 = vld [vmem:[%s4844_s4 + $0x50] sm:$0xff] (!%p2355_p10) }
 0x391   : > { %2206 = vst [vmem:[%s4844_s4 + $0x10] sm:$0xff] (!%p2355_p10), %v2142_v40  ;;  %v2087_v57 = vld [vmem:[%s4844_s4 + $0x58] sm:$0xff] (!%p2355_p10)  ;;  %2207 = vst.msk [vmem:[%s4844_s4 + $0x18] sm:$0xff] (!%p2355_p10), %vm466_vm0, %v2143_v18  ;;  %v2149_v7 = vadd.f32 (!%p2355_p10), %v2085_v3, %v3968_v49  ;;  %v2150_v8 = vadd.f32 (!%p2355_p10), %v2086_v9, %v3972_v37  ;;  %v2088_v40 = vld [vmem:[%s4844_s4 + $0x60] sm:$0xff] (!%p2355_p10) }
 0x392   : > { %2208 = vst [vmem:[%s4844_s4 + $0x20] sm:$0xff] (!%p2355_p10), %v2144_v38  ;;  %2209 = vst.msk [vmem:[%s4844_s4 + $0x28] sm:$0xff] (!%p2355_p10), %vm466_vm0, %v2145_v26  ;;  %v2151_v48 = vadd.f32 (!%p2355_p10), %v2087_v57, %v3976_v10  ;;  %v2089_v18 = vld [vmem:[%s4844_s4 + $0x68] sm:$0xff] (!%p2355_p10)  ;;  %v2090_v51 = vld [vmem:[%s4844_s4 + $0x70] sm:$0xff] (!%p2355_p10)  ;;  %v2152_v49 = vadd.f32 (!%p2355_p10), %v2088_v40, %v3980_v2 }
 0x393   : > { %2210 = vst [vmem:[%s4844_s4 + $0x30] sm:$0xff] (!%p2355_p10), %v2146_v46  ;;  %2211 = vst.msk [vmem:[%s4844_s4 + $0x38] sm:$0xff] (!%p2355_p10), %vm466_vm0, %v2147_v31  ;;  %v2153_v37 = vadd.f32 (!%p2355_p10), %v2089_v18, %v3984_v14  ;;  %v2154_v10 = vadd.f32 (!%p2355_p10), %v2090_v51, %v3988_v44  ;;  %v2091_v16 = vld [vmem:[%s4844_s4 + $0x78] sm:$0xff] (!%p2355_p10)  ;;  %v2092_v22 = vld [vmem:[%s4844_s4 + $0x80] sm:$0xff] (!%p2355_p10) }
 0x394   : > { %2212 = vst [vmem:[%s4844_s4 + $0x40] sm:$0xff] (!%p2355_p10), %v2148_v27  ;;  %v2093_v38 = vld [vmem:[%s4844_s4 + $0x88] sm:$0xff] (!%p2355_p10)  ;;  %2213 = vst.msk [vmem:[%s4844_s4 + $0x48] sm:$0xff] (!%p2355_p10), %vm466_vm0, %v2149_v7  ;;  %v2155_v2 = vadd.f32 (!%p2355_p10), %v2091_v16, %v3992_v21  ;;  %v2156_v14 = vadd.f32 (!%p2355_p10), %v2092_v22, %v3996_v36  ;;  %v2094_v26 = vld [vmem:[%s4844_s4 + $0x90] sm:$0xff] (!%p2355_p10) }
 0x395   : > { %2214 = vst [vmem:[%s4844_s4 + $0x50] sm:$0xff] %v2150_v8  ;;  %2215 = vst.msk [vmem:[%s4844_s4 + $0x58] sm:$0xff] %vm466_vm0, %v2151_v48  ;;  %v2157_v44 = vadd.f32 %v2093_v38, %v4000_v59  ;;  %v2095_v11 = vld [vmem:[%s4844_s4 + $0x98] sm:$0xff]  ;;  %v2096_v41 = vld [vmem:[%s4844_s4 + $0xa0] sm:$0xff]  ;;  %v2158_v21 = vadd.f32 %v2094_v26, %v4004_v39 }
 0x396   : > { %2216 = vst [vmem:[%s4844_s4 + $0x60] sm:$0xff] %v2152_v49  ;;  %2217 = vst.msk [vmem:[%s4844_s4 + $0x68] sm:$0xff] %vm466_vm0, %v2153_v37  ;;  %v2159_v36 = vadd.f32 %v2095_v11, %v4008_v12  ;;  %v2160_v59 = vadd.f32 %v2096_v41, %v4012_v56  ;;  %v2097_v1 = vld [vmem:[%s4844_s4 + $0xa8] sm:$0xff]  ;;  %v2098_v46 = vld [vmem:[%s4844_s4 + $0xb0] sm:$0xff] }
 0x397   : > { %2218 = vst [vmem:[%s4844_s4 + $0x70] sm:$0xff] %v2154_v10  ;;  %v2099_v31 = vld [vmem:[%s4844_s4 + $0xb8] sm:$0xff]  ;;  %2219 = vst.msk [vmem:[%s4844_s4 + $0x78] sm:$0xff] %vm466_vm0, %v2155_v2  ;;  %v2161_v39 = vadd.f32 %v2097_v1, %v4016_v19  ;;  %v2162_v12 = vadd.f32 %v2098_v46, %v4020_v50  ;;  %v2100_v27 = vld [vmem:[%s4844_s4 + $0xc0] sm:$0xff] }
 0x398   : > { %2220 = vst [vmem:[%s4844_s4 + $0x80] sm:$0xff] %v2156_v14  ;;  %2221 = vst.msk [vmem:[%s4844_s4 + $0x88] sm:$0xff] %vm466_vm0, %v2157_v44  ;;  %v2163_v56 = vadd.f32 %v2099_v31, %v4024_v45  ;;  %v2101_v3 = vld [vmem:[%s4844_s4 + $0xc8] sm:$0xff]  ;;  %v2102_v9 = vld [vmem:[%s4844_s4 + $0xd0] sm:$0xff]  ;;  %v2164_v19 = vadd.f32 %v2100_v27, %v4028_v4 }
 0x399   : > { %2222 = vst [vmem:[%s4844_s4 + $0x90] sm:$0xff] %v2158_v21  ;;  %2223 = vst.msk [vmem:[%s4844_s4 + $0x98] sm:$0xff] %vm466_vm0, %v2159_v36  ;;  %v2165_v50 = vadd.f32 %v2101_v3, %v4032_v35  ;;  %v2166_v45 = vadd.f32 %v2102_v9, %v4036_v33  ;;  %v2103_v57 = vld [vmem:[%s4844_s4 + $0xd8] sm:$0xff]  ;;  %v2104_v7 = vld [vmem:[%s4844_s4 + $0xe0] sm:$0xff] }
 0x39a   : > { %2224 = vst [vmem:[%s4844_s4 + $0xa0] sm:$0xff] %v2160_v59  ;;  %v2105_v8 = vld [vmem:[%s4844_s4 + $0xe8] sm:$0xff]  ;;  %2225 = vst.msk [vmem:[%s4844_s4 + $0xa8] sm:$0xff] %vm466_vm0, %v2161_v39  ;;  %v2167_v4 = vadd.f32 %v2103_v57, %v4040_v34  ;;  %v2168_v35 = vadd.f32 %v2104_v7, %v4044_v42  ;;  %v2106_v48 = vld [vmem:[%s4844_s4 + $0xf0] sm:$0xff] }
 0x39b   : > { %2226 = vst [vmem:[%s4844_s4 + $0xb0] sm:$0xff] %v2162_v12  ;;  %2227 = vst.msk [vmem:[%s4844_s4 + $0xb8] sm:$0xff] %vm466_vm0, %v2163_v56  ;;  %v2169_v33 = vadd.f32 %v2105_v8, %v4048_v43  ;;  %v2107_v40 = vld [vmem:[%s4844_s4 + $0xf8] sm:$0xff]  ;;  %v2108_v18 = vld [vmem:[%s4844_s4 + $0x100] sm:$0xff]  ;;  %v2170_v34 = vadd.f32 %v2106_v48, %v4052_v0 }
 0x39c   : > { %2228 = vst [vmem:[%s4844_s4 + $0xc0] sm:$0xff] %v2164_v19  ;;  %2229 = vst.msk [vmem:[%s4844_s4 + $0xc8] sm:$0xff] %vm466_vm0, %v2165_v50  ;;  %v2171_v42 = vadd.f32 %v2107_v40, %v4056_v52  ;;  %v2172_v43 = vadd.f32 %v2108_v18, %v3934_v13  ;;  %v2109_v51 = vld [vmem:[%s4844_s4 + $0x108] sm:$0xff]  ;;  %v2110_v49 = vld [vmem:[%s4844_s4 + $0x110] sm:$0xff] }
 0x39d   : > { %2230 = vst [vmem:[%s4844_s4 + $0xd0] sm:$0xff] %v2166_v45  ;;  %v2111_v37 = vld [vmem:[%s4844_s4 + $0x118] sm:$0xff]  ;;  %2231 = vst.msk [vmem:[%s4844_s4 + $0xd8] sm:$0xff] %vm466_vm0, %v2167_v4  ;;  %v2173_v13 = vadd.f32 %v2109_v51, %v3938_v29  ;;  %v2174_v0 = vadd.f32 %v2110_v49, %v3942_v17  ;;  %v2112_v10 = vld [vmem:[%s4844_s4 + $0x120] sm:$0xff] }
 0x39e   : > { %2232 = vst [vmem:[%s4844_s4 + $0xe0] sm:$0xff] %v2168_v35  ;;  %2233 = vst.msk [vmem:[%s4844_s4 + $0xe8] sm:$0xff] %vm466_vm0, %v2169_v33  ;;  %v2175_v52 = vadd.f32 %v2111_v37, %v3946_v5  ;;  %v2113_v16 = vld [vmem:[%s4844_s4 + $0x128] sm:$0xff]  ;;  %v2114_v22 = vld [vmem:[%s4844_s4 + $0x130] sm:$0xff]  ;;  %v2176_v29 = vadd.f32 %v2112_v10, %v3950_v30 }
 0x39f   : > { %2234 = vst [vmem:[%s4844_s4 + $0xf0] sm:$0xff] %v2170_v34  ;;  %2235 = vst.msk [vmem:[%s4844_s4 + $0xf8] sm:$0xff] %vm466_vm0, %v2171_v42  ;;  %v2177_v17 = vadd.f32 %v2113_v16, %v3954_v20  ;;  %v2178_v5 = vadd.f32 %v2114_v22, %v3958_v24  ;;  %v2115_v38 = vld [vmem:[%s4844_s4 + $0x138] sm:$0xff]  ;;  %v2116_v2 = vld [vmem:[%s4844_s4 + $0x140] sm:$0xff] }
 0x3a0   : > { %2236 = vst [vmem:[%s4844_s4 + $0x100] sm:$0xff] %v2172_v43  ;;  %v2117_v14 = vld [vmem:[%s4844_s4 + $0x148] sm:$0xff]  ;;  %2237 = vst.msk [vmem:[%s4844_s4 + $0x108] sm:$0xff] %vm466_vm0, %v2173_v13  ;;  %v2179_v30 = vadd.f32 %v2115_v38, %v3962_v25  ;;  %v2180_v20 = vadd.f32 %v2116_v2, %v3966_v32  ;;  %v2118_v44 = vld [vmem:[%s4844_s4 + $0x150] sm:$0xff] }
 0x3a1   : > { %2238 = vst [vmem:[%s4844_s4 + $0x110] sm:$0xff] %v2174_v0  ;;  %2239 = vst.msk [vmem:[%s4844_s4 + $0x118] sm:$0xff] %vm466_vm0, %v2175_v52  ;;  %v2181_v24 = vadd.f32 %v2117_v14, %v3970_v60  ;;  %v2119_v26 = vld [vmem:[%s4844_s4 + $0x158] sm:$0xff]  ;;  %v2120_v11 = vld [vmem:[%s4844_s4 + $0x160] sm:$0xff]  ;;  %v2182_v25 = vadd.f32 %v2118_v44, %v3974_v47 }
 0x3a2   : > { %2240 = vst [vmem:[%s4844_s4 + $0x120] sm:$0xff] %v2176_v29  ;;  %2241 = vst.msk [vmem:[%s4844_s4 + $0x128] sm:$0xff] %vm466_vm0, %v2177_v17  ;;  %v2183_v32 = vadd.f32 %v2119_v26, %v3978_v15  ;;  %v2184_v60 = vadd.f32 %v2120_v11, %v3982_v61  ;;  %v2121_v41 = vld [vmem:[%s4844_s4 + $0x168] sm:$0xff]  ;;  %v2122_v21 = vld [vmem:[%s4844_s4 + $0x170] sm:$0xff] }
 0x3a3   : > { %2242 = vst [vmem:[%s4844_s4 + $0x130] sm:$0xff] %v2178_v5  ;;  %v2123_v36 = vld [vmem:[%s4844_s4 + $0x178] sm:$0xff]  ;;  %2243 = vst.msk [vmem:[%s4844_s4 + $0x138] sm:$0xff] %vm466_vm0, %v2179_v30  ;;  %v2185_v47 = vadd.f32 %v2121_v41, %v3986_v58  ;;  %v2186_v15 = vadd.f32 %v2122_v21, %v3990_v54  ;;  %v2124_v59 = vld [vmem:[%s4844_s4 + $0x180] sm:$0xff] }
 0x3a4   : > { %2244 = vst [vmem:[%s4844_s4 + $0x140] sm:$0xff] %v2180_v20  ;;  %2245 = vst.msk [vmem:[%s4844_s4 + $0x148] sm:$0xff] %vm466_vm0, %v2181_v24  ;;  %v2187_v61 = vadd.f32 %v2123_v36, %v3994_v63  ;;  %v2125_v1 = vld [vmem:[%s4844_s4 + $0x188] sm:$0xff]  ;;  %v2126_v46 = vld [vmem:[%s4844_s4 + $0x190] sm:$0xff]  ;;  %v2188_v58 = vadd.f32 %v2124_v59, %v3998_v55 }
 0x3a5   : > { %2246 = vst [vmem:[%s4844_s4 + $0x150] sm:$0xff] %v2182_v25  ;;  %2247 = vst.msk [vmem:[%s4844_s4 + $0x158] sm:$0xff] %vm466_vm0, %v2183_v32  ;;  %v2189_v54 = vadd.f32 %v2125_v1, %v4002_v62  ;;  %v2190_v63 = vadd.f32 %v2126_v46, %v4006_v23  ;;  %v2127_v31 = vld [vmem:[%s4844_s4 + $0x198] sm:$0xff]  ;;  %v2128_v39 = vld [vmem:[%s4844_s4 + $0x1a0] sm:$0xff] }
 0x3a6   : > { %2248 = vst [vmem:[%s4844_s4 + $0x160] sm:$0xff] %v2184_v60  ;;  %v2129_v12 = vld [vmem:[%s4844_s4 + $0x1a8] sm:$0xff]  ;;  %2249 = vst.msk [vmem:[%s4844_s4 + $0x168] sm:$0xff] %vm466_vm0, %v2185_v47  ;;  %v2191_v55 = vadd.f32 %v2127_v31, %v4010_v53  ;;  %v2192_v62 = vadd.f32 %v2128_v39, %v4014_v6  ;;  %v2130_v56 = vld [vmem:[%s4844_s4 + $0x1b0] sm:$0xff] }
 0x3a7   : > { %2250 = vst [vmem:[%s4844_s4 + $0x170] sm:$0xff] %v2186_v15  ;;  %2251 = vst.msk [vmem:[%s4844_s4 + $0x178] sm:$0xff] %vm466_vm0, %v2187_v61  ;;  %v2193_v23 = vadd.f32 %v2129_v12, %v4018_v28  ;;  %v2131_v27 = vld [vmem:[%s4844_s4 + $0x1b8] sm:$0xff]  ;;  %v2132_v3 = vld [vmem:[%s4844_s4 + $0x1c0] sm:$0xff] }
 0x3a8   : > { %2252 = vst [vmem:[%s4844_s4 + $0x180] sm:$0xff] %v2188_v58  ;;  %2253 = vst.msk [vmem:[%s4844_s4 + $0x188] sm:$0xff] %vm466_vm0, %v2189_v54  ;;  %v5108_v53 = vld [vmem:[#allocation15_spill] sm:$0xff]  ;;  %v5109_v28 = vld [vmem:[#allocation16_spill] sm:$0xff] }
 0x3a9   : > { %2254 = vst [vmem:[%s4844_s4 + $0x190] sm:$0xff] %v2190_v63  ;;  %v2194_v6 = vadd.f32 %v2130_v56, %v5108_v53  ;;  %v2195_v9 = vadd.f32 %v2131_v27, %v5109_v28  ;;  %v5110_v19 = vld [vmem:[#allocation18_spill] sm:$0xff]  ;;  %v2133_v45 = vld [vmem:[%s4844_s4 + $0x1c8] sm:$0xff]  ;;  %v2134_v57 = vld [vmem:[%s4844_s4 + $0x1d0] sm:$0xff] }
 0x3aa   : > { %v2196_v50 = vadd.f32 %v2132_v3, %v5110_v19  ;;  %v2135_v7 = vld [vmem:[%s4844_s4 + $0x1d8] sm:$0xff]  ;;  %2255 = vst.msk [vmem:[%s4844_s4 + $0x198] sm:$0xff] %vm466_vm0, %v2191_v55  ;;  %2256 = vst [vmem:[%s4844_s4 + $0x1a0] sm:$0xff] %v2192_v62  ;;  %v5111_v8 = vld [vmem:[#allocation20_spill] sm:$0xff] }
 0x3ab   : > { %2257 = vst.msk [vmem:[%s4844_s4 + $0x1a8] sm:$0xff] %vm466_vm0, %v2193_v23  ;;  %v2197_v4 = vadd.f32 %v2133_v45, %v5111_v8  ;;  %v5112_v35 = vld [vmem:[#allocation17_spill] sm:$0xff]  ;;  %v5113_v48 = vld [vmem:[#allocation22_spill] sm:$0xff]  ;;  %v2136_v18 = vld [vmem:[%s4844_s4 + $0x1e0] sm:$0xff] }
 0x3ac   : > { %v2198_v33 = vadd.f32 %v2134_v57, %v5112_v35  ;;  %v2199_v40 = vadd.f32 %v2135_v7, %v5113_v48  ;;  %v2137_v34 = vld [vmem:[%s4844_s4 + $0x1e8] sm:$0xff]  ;;  %v2138_v42 = vld [vmem:[%s4844_s4 + $0x1f0] sm:$0xff]  ;;  %2258 = vst [vmem:[%s4844_s4 + $0x1b0] sm:$0xff] %v2194_v6  ;;  %2259 = vst.msk [vmem:[%s4844_s4 + $0x1b8] sm:$0xff] %vm466_vm0, %v2195_v9 }
 0x3ad   : > { %2260 = vst [vmem:[%s4844_s4 + $0x1c0] sm:$0xff] %v2196_v50  ;;  %v5114_v43 = vld [vmem:[#allocation26_spill] sm:$0xff]  ;;  %v5115_v49 = vld [vmem:[#allocation19_spill] sm:$0xff]  ;;  %v5116_v13 = vld [vmem:[#allocation24_spill] sm:$0xff] }
 0x3ae   : > { %v2200_v51 = vadd.f32 %v2136_v18, %v5114_v43  ;;  %v2201_v37 = vadd.f32 %v2137_v34, %v5115_v49  ;;  %v2202_v0 = vadd.f32 %v2138_v42, %v5116_v13  ;;  %v2139_v52 = vld [vmem:[%s4844_s4 + $0x1f8] sm:$0xff]  ;;  %2261 = vst.msk [vmem:[%s4844_s4 + $0x1c8] sm:$0xff] %vm466_vm0, %v2197_v4  ;;  %2262 = vst [vmem:[%s4844_s4 + $0x1d0] sm:$0xff] %v2198_v33  ;;  %v5117_v10 = vld [vmem:[#allocation29_spill] sm:$0xff] }
 0x3af   : > { %2263 = vst.msk [vmem:[%s4844_s4 + $0x1d8] sm:$0xff] %vm466_vm0, %v2199_v40  ;;  %v2203_v16 = vadd.f32 %v2139_v52, %v5117_v10 }
 0x3b0   : > { %2264 = vst [vmem:[%s4844_s4 + $0x1e0] sm:$0xff] %v2200_v51  ;;  %2265 = vst.msk [vmem:[%s4844_s4 + $0x1e8] sm:$0xff] %vm466_vm0, %v2201_v37 }
 0x3b1   : > { %2266 = vst [vmem:[%s4844_s4 + $0x1f0] sm:$0xff] %v2202_v0  ;;  %2267 = vst.msk [vmem:[%s4844_s4 + $0x1f8] sm:$0xff] %vm466_vm0, %v2203_v16 }
 0x3b2 PF: > { %p11_p11 = scmp.ge.s32.totalorder %s2629_s19, 6   ;;  %s5118_s15 = smov %s2577_s16 }
 0x3b3   : > { %s5119_s16 = smov %s2638_s22  ;;  %s5120_s17 = smov %s2629_s19 }
 0x3b4   :  { %13 = sbr.rel (!%p11_p11) target bundleno = 2 (0x2), region = 107 }

</bundles_post_ra>
